<compile_context>
chip_gen: v6e
topology: v6e:2x2x1
jax: 0.10.0
libtpu: 0.0.40
codegen_flags: <defaults>
</compile_context>

<pallas_src>
import functools

import jax
import jax.numpy as jnp
from jax.experimental import pallas as pl
from jax.experimental.pallas import tpu as pltpu

M_TARGET = 1024   # target flattened output rows per grid step (review: 1024-2048)


def _cdiv(a, b):
    return -(-a // b)


def _round_up(x, m):
    return _cdiv(x, m) * m


# ----------------------------------------------------------------------------
# Pallas kernel: direct conv over kp*kp phased taps (stride-2 conv expressed as
# a stride-1 conv on the space-to-depth input), f32 accumulate in VMEM scratch,
# fused BN-affine + ReLU epilogue, optional fused trailing 1x1 conv stage.
# ----------------------------------------------------------------------------
def _conv_kernel(x_ref, *refs, kp, ws, cp, m_pad):
    # refs = (w1, s1, b1, [w2, s2, b2], o_ref, acc_ref)
    acc_ref = refs[-1]
    o_ref = refs[-2]
    w1_ref, s1_ref, b1_ref = refs[0], refs[1], refs[2]
    two_stage = len(refs) > 5

    acc_ref[...] = jnp.zeros_like(acc_ref)
    for t in range(kp * kp):
        ih, jw = divmod(t, kp)
        off = ih * ws + jw                      # static flat offset of this tap
        lhs = x_ref[off:off + m_pad, :]          # (m_pad, 4*Cin) bf16, contiguous
        acc_ref[...] += jnp.dot(lhs, w1_ref[t * cp:(t + 1) * cp, :],
                                preferred_element_type=jnp.float32)

    y = jnp.maximum(acc_ref[...] * s1_ref[...] + b1_ref[...], 0.0)   # BN + ReLU

    if two_stage:                                # fused 1x1 ConvBNReLU epilogue
        w2_ref, s2_ref, b2_ref = refs[3], refs[4], refs[5]
        y2 = jnp.dot(y.astype(w2_ref.dtype), w2_ref[...],
                     preferred_element_type=jnp.float32)
        y = jnp.maximum(y2 * s2_ref[...] + b2_ref[...], 0.0)

    o_ref[...] = y.astype(o_ref.dtype)


# ----------------------------------------------------------------------------
# One _ConvBNReLU layer (stride 2), optionally with the 1x1 conv fused in.
# JAX side only does: zero-pad, space-to-depth, halo row-block gather.
# ----------------------------------------------------------------------------
def _conv_layer(x, lp, *, k, pad, fused=None, out_dtype=jnp.bfloat16):
    stride = 2
    n, h, w, c = x.shape
    ho = (h + 2 * pad - k) // stride + 1
    wo = (w + 2 * pad - k) // stride + 1
    kp = (k + 1) // 2            # phased tap extent
    halo = kp - 1                # extra phased rows needed below a row block
    ws = _cdiv(w + 2 * pad, 2)   # phased width (>= wo + halo by construction)
    cp = 4 * c                   # phased channels

    # Row-block tiling: each grid step computes `toh` output rows over the full
    # width, as a flattened raster of m = (toh-1)*ws + wo matmul rows.
    toh = max(1, min(ho, M_TARGET // max(ws, 1)))
    if n * _cdiv(ho, toh) < 2 and ho >= 2:       # keep >= 2 grid steps (v7x megacore)
        toh = _cdiv(ho, 2)
    nb = _cdiv(ho, toh)
    n_blocks = n * nb
    rows_in = toh + halo
    hs_needed = nb * toh + halo
    m = (toh - 1) * ws + wo
    m_pad = _round_up(m, 16)                     # bf16 packs 16 sublanes per vreg
    lbuf = max(rows_in * ws, halo * ws + halo + m_pad)

    # --- JAX-side prep: pad, space-to-depth (stride phases -> channels), halo
    # row-block gather, flatten rows*width. ---
    hp, wp = 2 * hs_needed, 2 * ws
    xp = jnp.pad(x, ((0, 0), (pad, hp - h - pad), (pad, wp - w - pad), (0, 0)))
    xs = xp.reshape(n, hs_needed, 2, ws, 2, c)
    xs = xs.transpose(0, 1, 3, 2, 4, 5).reshape(n, hs_needed, ws, cp)
    ridx = jnp.arange(nb)[:, None] * toh + jnp.arange(rows_in)[None, :]
    xb = xs[:, ridx].reshape(n_blocks, rows_in * ws, cp)
    if lbuf > rows_in * ws:
        xb = jnp.pad(xb, ((0, 0), (0, lbuf - rows_in * ws), (0, 0)))

    cout1 = lp["w"].shape[1]
    operands = [xb, lp["w"], lp["scale"], lp["bias"]]
    in_specs = [pl.BlockSpec((None, lbuf, cp), lambda i: (i, 0, 0)),
                pl.BlockSpec(lp["w"].shape, lambda i: (0, 0)),
                pl.BlockSpec((1, cout1), lambda i: (0, 0)),
                pl.BlockSpec((1, cout1), lambda i: (0, 0))]
    cout_out = cout1
    if fused is not None:
        cout_out = fused["w"].shape[1]
        operands += [fused["w"], fused["scale"], fused["bias"]]
        in_specs += [pl.BlockSpec(fused["w"].shape, lambda i: (0, 0)),
                     pl.BlockSpec((1, cout_out), lambda i: (0, 0)),
                     pl.BlockSpec((1, cout_out), lambda i: (0, 0))]

    flops = 2 * n_blocks * m_pad * (kp * kp * cp) * cout1
    if fused is not None:
        flops += 2 * n_blocks * m_pad * cout1 * cout_out
    bytes_accessed = (xb.size * xb.dtype.itemsize
                      + sum(o.size * o.dtype.itemsize for o in operands[1:])
                      + n_blocks * m_pad * cout_out * jnp.dtype(out_dtype).itemsize)

    y = pl.pallas_call(
        functools.partial(_conv_kernel, kp=kp, ws=ws, cp=cp, m_pad=m_pad),
        out_shape=jax.ShapeDtypeStruct((n_blocks, m_pad, cout_out), out_dtype),
        grid=(n_blocks,),
        in_specs=in_specs,
        out_specs=pl.BlockSpec((None, m_pad, cout_out), lambda i: (i, 0, 0)),
        scratch_shapes=[pltpu.VMEM((m_pad, cout1), jnp.float32)],
        compiler_params=pltpu.CompilerParams(
            dimension_semantics=("parallel",)),
        cost_estimate=pl.CostEstimate(flops=int(flops), transcendentals=0,
                                      bytes_accessed=int(bytes_accessed)),
    )(*operands)

    # Un-block the flattened raster back to (N, Ho, Wo, Cout); junk positions
    # (width padding / rows past Ho / the 16-row round-up) are never read.
    oidx = jnp.arange(toh)[:, None] * ws + jnp.arange(wo)[None, :]
    y = y.reshape(n, nb, m_pad, cout_out)[:, :, oidx, :]
    return y.reshape(n, nb * toh, wo, cout_out)[:, :ho]


# ----------------------------------------------------------------------------
# Parameters (mirror PyTorch __init__ shapes; BN folded in eval mode)
# ----------------------------------------------------------------------------
def _make_layer_params(key, cin, cout, k):
    kw_key, g_key, b_key = jax.random.split(key, 3)
    # PyTorch Conv2d weight (Cout, Cin, KH, KW), bias=False.  Quantize to bf16
    # once so the kernel and the f32 reference share identical weights.
    w = (jax.random.normal(kw_key, (cout, cin, k, k), jnp.float32) * 0.05)
    w = w.astype(jnp.bfloat16).astype(jnp.float32)
    gamma = 1.0 + 0.1 * jax.random.normal(g_key, (cout,), jnp.float32)
    beta = 0.1 * jax.random.normal(b_key, (cout,), jnp.float32)
    running_mean = jnp.zeros((cout,), jnp.float32)
    running_var = jnp.ones((cout,), jnp.float32)
    eps = 1e-5
    scale = gamma / jnp.sqrt(running_var + eps)
    bias = beta - running_mean * scale

    if k == 1:
        # Used only as the fused trailing 1x1 stage: plain (Cin, Cout) matrix.
        w_kernel = jnp.transpose(w[:, :, 0, 0])
    else:
        # Phased-tap layout: row index = ((ih*kp + jw)*2 + pr)*2 + pc)*Cin + c,
        # matching the space-to-depth channel order; taps past k are zero.
        kp = (k + 1) // 2
        wpad = jnp.zeros((cout, cin, 2 * kp, 2 * kp), w.dtype).at[:, :, :k, :k].set(w)
        w_kernel = (wpad.reshape(cout, cin, kp, 2, kp, 2)
                    .transpose(2, 4, 3, 5, 1, 0)
                    .reshape(kp * kp * 4 * cin, cout))
    return {
        "w_raw": w,                                   # for the f32 reference
        "w": w_kernel.astype(jnp.bfloat16),           # kernel layout
        "scale": scale.reshape(1, cout),
        "bias": bias.reshape(1, cout),
    }


def init_spatial_path_params(key, in_channels, out_channels):
    inter = 64
    k0, k1, k2, k3 = jax.random.split(key, 4)
    return {
        "conv7x7": _make_layer_params(k0, in_channels, inter, 7),
        "conv3x3_1": _make_layer_params(k1, inter, inter, 3),
        "conv3x3_2": _make_layer_params(k2, inter, inter, 3),
        "conv1x1": _make_layer_params(k3, inter, out_channels, 1),
    }


# ----------------------------------------------------------------------------
# SpatialPath forward (NCHW in/out for PyTorch parity)
# ----------------------------------------------------------------------------
@functools.partial(jax.jit, static_argnames=("out_channels",))
def spatial_path_forward(params, x_nchw, *, out_channels):
    assert params["conv1x1"]["w"].shape[1] == out_channels
    x = jnp.transpose(x_nchw, (0, 2, 3, 1)).astype(jnp.bfloat16)   # NCHW -> NHWC
    x = _conv_layer(x, params["conv7x7"], k=7, pad=3)
    x = _conv_layer(x, params["conv3x3_1"], k=3, pad=1)
    # conv3x3_2 with the 1x1 ConvBNReLU fused into its epilogue (one kernel).
    x = _conv_layer(x, params["conv3x3_2"], k=3, pad=1,
                    fused=params["conv1x1"], out_dtype=jnp.float32)
    return jnp.transpose(x, (0, 3, 1, 2))                          # NHWC -> NCHW


# ----------------------------------------------------------------------------
# Pure-JAX f32 reference (same folded-BN math) for correctness checking
# ----------------------------------------------------------------------------
def _reference_forward(params, x_nchw):
    def layer(x, p, stride, pad):
        y = jax.lax.conv_general_dilated(
            x, p["w_raw"], (stride, stride), [(pad, pad), (pad, pad)],
            dimension_numbers=("NCHW", "OIHW", "NCHW"))
        scale = p["scale"].reshape(1, -1, 1, 1)
        bias = p["bias"].reshape(1, -1, 1, 1)
        return jnp.maximum(y * scale + bias, 0.0)

    x = layer(x_nchw, params["conv7x7"], 2, 3)
    x = layer(x, params["conv3x3_1"], 2, 1)
    x = layer(x, params["conv3x3_2"], 2, 1)
    x = layer(x, params["conv1x1"], 1, 0)
    return x


if __name__ == "__main__":
    key = jax.random.PRNGKey(0)
    pkey, xkey = jax.random.split(key)

    in_channels, out_channels = 4, 32
    params = init_spatial_path_params(pkey, in_channels, out_channels)

    x = jax.random.normal(xkey, (2, in_channels, 16, 16), jnp.float32)  # NCHW

    out = spatial_path_forward(params, x, out_channels=out_channels)
    out = jax.block_until_ready(out)

    expected_shape = (2, out_channels, 2, 2)   # 16 -> /2 -> /2 -> /2 = 2
    assert out.shape == expected_shape, (out.shape, expected_shape)
    assert bool(jnp.all(out >= 0.0)), "ReLU output must be non-negative"

    ref = _reference_forward(params, x)
    max_err = float(jnp.max(jnp.abs(out - ref)))
    assert max_err < 6e-2, f"mismatch vs f32 reference: max abs err {max_err}"

    print("KERNEL_OK")
</pallas_src>

<mosaic_0001>
module attributes {stable_mosaic.version = 11 : i64} {
  func.func @_conv_kernel(%arg0: i32, %arg1: memref<1x132x16xbf16, #tpu.memory_space<vmem>>, %arg2: memref<256x64xbf16, #tpu.memory_space<vmem>>, %arg3: memref<1x64xf32, #tpu.memory_space<vmem>>, %arg4: memref<1x64xf32, #tpu.memory_space<vmem>>, %arg5: memref<1x96x64xbf16, #tpu.memory_space<vmem>>, %arg6: memref<96x64xf32, #tpu.memory_space<vmem>>) attributes {dimension_semantics = [#tpu.dimension_semantics<parallel>], iteration_bounds = array<i64: 2>, scalar_prefetch = 0 : i64, scratch_operands = 1 : i64, tpu.core_type = #tpu.core_type<tc>, window_params = [{transform_indices = @transform_0, window_bounds = array<i64: 1, 132, 16>}, {pipeline_mode = #tpu.pipeline_mode<synchronous>, transform_indices = @transform_1, window_bounds = array<i64: 256, 64>}, {pipeline_mode = #tpu.pipeline_mode<synchronous>, transform_indices = @transform_2, window_bounds = array<i64: 1, 64>}, {pipeline_mode = #tpu.pipeline_mode<synchronous>, transform_indices = @transform_3, window_bounds = array<i64: 1, 64>}, {transform_indices = @transform_4, window_bounds = array<i64: 1, 96, 64>}]} {
    %cst = arith.constant 0.000000e+00 : f32
    %0 = vector.broadcast %cst : f32 to vector<96x64xf32>
    %c0 = arith.constant 0 : index
    %c0_0 = arith.constant 0 : index
    %1 = vector.load %arg6[%c0, %c0_0] : memref<96x64xf32, #tpu.memory_space<vmem>>, vector<96x64xf32>
    tpu.vector_store %arg6[%c0, %c0_0], %0 {strides = array<i32>} : memref<96x64xf32, #tpu.memory_space<vmem>>, vector<96x64xf32>,
    %c0_1 = arith.constant 0 : index
    %c0_2 = arith.constant 0 : index
    %c0_3 = arith.constant 0 : index
    %2 = vector.load %arg1[%c0_1, %c0_2, %c0_3] : memref<1x132x16xbf16, #tpu.memory_space<vmem>>, vector<1x96x16xbf16>
    %3 = vector.shape_cast %2 : vector<1x96x16xbf16> to vector<96x16xbf16>
    %c0_4 = arith.constant 0 : index
    %c0_5 = arith.constant 0 : index
    %4 = vector.load %arg6[%c0_4, %c0_5] : memref<96x64xf32, #tpu.memory_space<vmem>>, vector<96x64xf32>
    %c0_6 = arith.constant 0 : index
    %c0_7 = arith.constant 0 : index
    %5 = vector.load %arg2[%c0_6, %c0_7] : memref<256x64xbf16, #tpu.memory_space<vmem>>, vector<16x64xbf16>
    %cst_8 = arith.constant dense<0.000000e+00> : vector<96x64xf32>
    %6 = tpu.matmul %3, %5, %cst_8 {dimension_numbers = #tpu.dot_dimension_numbers<[1], [0], [0], [1], [0, 0, 1, 1], [], []>} : vector<96x16xbf16>, vector<16x64xbf16>, vector<96x64xf32> -> vector<96x64xf32>
    %7 = arith.addf %4, %6 : vector<96x64xf32>
    %c0_9 = arith.constant 0 : index
    %c0_10 = arith.constant 0 : index
    %8 = vector.load %arg6[%c0_9, %c0_10] : memref<96x64xf32, #tpu.memory_space<vmem>>, vector<96x64xf32>
    tpu.vector_store %arg6[%c0_9, %c0_10], %7 {strides = array<i32>} : memref<96x64xf32, #tpu.memory_space<vmem>>, vector<96x64xf32>,
    %c0_11 = arith.constant 0 : index
    %c1 = arith.constant 1 : index
    %c0_12 = arith.constant 0 : index
    %9 = vector.load %arg1[%c0_11, %c1, %c0_12] : memref<1x132x16xbf16, #tpu.memory_space<vmem>>, vector<1x96x16xbf16>
    %10 = vector.shape_cast %9 : vector<1x96x16xbf16> to vector<96x16xbf16>
    %c0_13 = arith.constant 0 : index
    %c0_14 = arith.constant 0 : index
    %11 = vector.load %arg6[%c0_13, %c0_14] : memref<96x64xf32, #tpu.memory_space<vmem>>, vector<96x64xf32>
    %c16 = arith.constant 16 : index
    %c0_15 = arith.constant 0 : index
    %12 = vector.load %arg2[%c16, %c0_15] : memref<256x64xbf16, #tpu.memory_space<vmem>>, vector<16x64xbf16>
    %cst_16 = arith.constant dense<0.000000e+00> : vector<96x64xf32>
    %13 = tpu.matmul %10, %12, %cst_16 {dimension_numbers = #tpu.dot_dimension_numbers<[1], [0], [0], [1], [0, 0, 1, 1], [], []>} : vector<96x16xbf16>, vector<16x64xbf16>, vector<96x64xf32> -> vector<96x64xf32>
    %14 = arith.addf %11, %13 : vector<96x64xf32>
    %c0_17 = arith.constant 0 : index
    %c0_18 = arith.constant 0 : index
    %15 = vector.load %arg6[%c0_17, %c0_18] : memref<96x64xf32, #tpu.memory_space<vmem>>, vector<96x64xf32>
    tpu.vector_store %arg6[%c0_17, %c0_18], %14 {strides = array<i32>} : memref<96x64xf32, #tpu.memory_space<vmem>>, vector<96x64xf32>,
    %c0_19 = arith.constant 0 : index
    %c2 = arith.constant 2 : index
    %c0_20 = arith.constant 0 : index
    %16 = vector.load %arg1[%c0_19, %c2, %c0_20] : memref<1x132x16xbf16, #tpu.memory_space<vmem>>, vector<1x96x16xbf16>
    %17 = vector.shape_cast %16 : vector<1x96x16xbf16> to vector<96x16xbf16>
    %c0_21 = arith.constant 0 : index
    %c0_22 = arith.constant 0 : index
    %18 = vector.load %arg6[%c0_21, %c0_22] : memref<96x64xf32, #tpu.memory_space<vmem>>, vector<96x64xf32>
    %c32 = arith.constant 32 : index
    %c0_23 = arith.constant 0 : index
    %19 = vector.load %arg2[%c32, %c0_23] : memref<256x64xbf16, #tpu.memory_space<vmem>>, vector<16x64xbf16>
    %cst_24 = arith.constant dense<0.000000e+00> : vector<96x64xf32>
    %20 = tpu.matmul %17, %19, %cst_24 {dimension_numbers = #tpu.dot_dimension_numbers<[1], [0], [0], [1], [0, 0, 1, 1], [], []>} : vector<96x16xbf16>, vector<16x64xbf16>, vector<96x64xf32> -> vector<96x64xf32>
    %21 = arith.addf %18, %20 : vector<96x64xf32>
    %c0_25 = arith.constant 0 : index
    %c0_26 = arith.constant 0 : index
    %22 = vector.load %arg6[%c0_25, %c0_26] : memref<96x64xf32, #tpu.memory_space<vmem>>, vector<96x64xf32>
    tpu.vector_store %arg6[%c0_25, %c0_26], %21 {strides = array<i32>} : memref<96x64xf32, #tpu.memory_space<vmem>>, vector<96x64xf32>,
    %c0_27 = arith.constant 0 : index
    %c3 = arith.constant 3 : index
    %c0_28 = arith.constant 0 : index
    %23 = vector.load %arg1[%c0_27, %c3, %c0_28] : memref<1x132x16xbf16, #tpu.memory_space<vmem>>, vector<1x96x16xbf16>
    %24 = vector.shape_cast %23 : vector<1x96x16xbf16> to vector<96x16xbf16>
    %c0_29 = arith.constant 0 : index
    %c0_30 = arith.constant 0 : index
    %25 = vector.load %arg6[%c0_29, %c0_30] : memref<96x64xf32, #tpu.memory_space<vmem>>, vector<96x64xf32>
    %c48 = arith.constant 48 : index
    %c0_31 = arith.constant 0 : index
    %26 = vector.load %arg2[%c48, %c0_31] : memref<256x64xbf16, #tpu.memory_space<vmem>>, vector<16x64xbf16>
    %cst_32 = arith.constant dense<0.000000e+00> : vector<96x64xf32>
    %27 = tpu.matmul %24, %26, %cst_32 {dimension_numbers = #tpu.dot_dimension_numbers<[1], [0], [0], [1], [0, 0, 1, 1], [], []>} : vector<96x16xbf16>, vector<16x64xbf16>, vector<96x64xf32> -> vector<96x64xf32>
    %28 = arith.addf %25, %27 : vector<96x64xf32>
    %c0_33 = arith.constant 0 : index
    %c0_34 = arith.constant 0 : index
    %29 = vector.load %arg6[%c0_33, %c0_34] : memref<96x64xf32, #tpu.memory_space<vmem>>, vector<96x64xf32>
    tpu.vector_store %arg6[%c0_33, %c0_34], %28 {strides = array<i32>} : memref<96x64xf32, #tpu.memory_space<vmem>>, vector<96x64xf32>,
    %c0_35 = arith.constant 0 : index
    %c11 = arith.constant 11 : index
    %c0_36 = arith.constant 0 : index
    %30 = vector.load %arg1[%c0_35, %c11, %c0_36] : memref<1x132x16xbf16, #tpu.memory_space<vmem>>, vector<1x96x16xbf16>
    %31 = vector.shape_cast %30 : vector<1x96x16xbf16> to vector<96x16xbf16>
    %c0_37 = arith.constant 0 : index
    %c0_38 = arith.constant 0 : index
    %32 = vector.load %arg6[%c0_37, %c0_38] : memref<96x64xf32, #tpu.memory_space<vmem>>, vector<96x64xf32>
    %c64 = arith.constant 64 : index
    %c0_39 = arith.constant 0 : index
    %33 = vector.load %arg2[%c64, %c0_39] : memref<256x64xbf16, #tpu.memory_space<vmem>>, vector<16x64xbf16>
    %cst_40 = arith.constant dense<0.000000e+00> : vector<96x64xf32>
    %34 = tpu.matmul %31, %33, %cst_40 {dimension_numbers = #tpu.dot_dimension_numbers<[1], [0], [0], [1], [0, 0, 1, 1], [], []>} : vector<96x16xbf16>, vector<16x64xbf16>, vector<96x64xf32> -> vector<96x64xf32>
    %35 = arith.addf %32, %34 : vector<96x64xf32>
    %c0_41 = arith.constant 0 : index
    %c0_42 = arith.constant 0 : index
    %36 = vector.load %arg6[%c0_41, %c0_42] : memref<96x64xf32, #tpu.memory_space<vmem>>, vector<96x64xf32>
    tpu.vector_store %arg6[%c0_41, %c0_42], %35 {strides = array<i32>} : memref<96x64xf32, #tpu.memory_space<vmem>>, vector<96x64xf32>,
    %c0_43 = arith.constant 0 : index
    %c12 = arith.constant 12 : index
    %c0_44 = arith.constant 0 : index
    %37 = vector.load %arg1[%c0_43, %c12, %c0_44] : memref<1x132x16xbf16, #tpu.memory_space<vmem>>, vector<1x96x16xbf16>
    %38 = vector.shape_cast %37 : vector<1x96x16xbf16> to vector<96x16xbf16>
    %c0_45 = arith.constant 0 : index
    %c0_46 = arith.constant 0 : index
    %39 = vector.load %arg6[%c0_45, %c0_46] : memref<96x64xf32, #tpu.memory_space<vmem>>, vector<96x64xf32>
    %c80 = arith.constant 80 : index
    %c0_47 = arith.constant 0 : index
    %40 = vector.load %arg2[%c80, %c0_47] : memref<256x64xbf16, #tpu.memory_space<vmem>>, vector<16x64xbf16>
    %cst_48 = arith.constant dense<0.000000e+00> : vector<96x64xf32>
    %41 = tpu.matmul %38, %40, %cst_48 {dimension_numbers = #tpu.dot_dimension_numbers<[1], [0], [0], [1], [0, 0, 1, 1], [], []>} : vector<96x16xbf16>, vector<16x64xbf16>, vector<96x64xf32> -> vector<96x64xf32>
    %42 = arith.addf %39, %41 : vector<96x64xf32>
    %c0_49 = arith.constant 0 : index
    %c0_50 = arith.constant 0 : index
    %43 = vector.load %arg6[%c0_49, %c0_50] : memref<96x64xf32, #tpu.memory_space<vmem>>, vector<96x64xf32>
    tpu.vector_store %arg6[%c0_49, %c0_50], %42 {strides = array<i32>} : memref<96x64xf32, #tpu.memory_space<vmem>>, vector<96x64xf32>,
    %c0_51 = arith.constant 0 : index
    %c13 = arith.constant 13 : index
    %c0_52 = arith.constant 0 : index
    %44 = vector.load %arg1[%c0_51, %c13, %c0_52] : memref<1x132x16xbf16, #tpu.memory_space<vmem>>, vector<1x96x16xbf16>
    %45 = vector.shape_cast %44 : vector<1x96x16xbf16> to vector<96x16xbf16>
    %c0_53 = arith.constant 0 : index
    %c0_54 = arith.constant 0 : index
    %46 = vector.load %arg6[%c0_53, %c0_54] : memref<96x64xf32, #tpu.memory_space<vmem>>, vector<96x64xf32>
    %c96 = arith.constant 96 : index
    %c0_55 = arith.constant 0 : index
    %47 = vector.load %arg2[%c96, %c0_55] : memref<256x64xbf16, #tpu.memory_space<vmem>>, vector<16x64xbf16>
    %cst_56 = arith.constant dense<0.000000e+00> : vector<96x64xf32>
    %48 = tpu.matmul %45, %47, %cst_56 {dimension_numbers = #tpu.dot_dimension_numbers<[1], [0], [0], [1], [0, 0, 1, 1], [], []>} : vector<96x16xbf16>, vector<16x64xbf16>, vector<96x64xf32> -> vector<96x64xf32>
    %49 = arith.addf %46, %48 : vector<96x64xf32>
    %c0_57 = arith.constant 0 : index
    %c0_58 = arith.constant 0 : index
    %50 = vector.load %arg6[%c0_57, %c0_58] : memref<96x64xf32, #tpu.memory_space<vmem>>, vector<96x64xf32>
    tpu.vector_store %arg6[%c0_57, %c0_58], %49 {strides = array<i32>} : memref<96x64xf32, #tpu.memory_space<vmem>>, vector<96x64xf32>,
    %c0_59 = arith.constant 0 : index
    %c14 = arith.constant 14 : index
    %c0_60 = arith.constant 0 : index
    %51 = vector.load %arg1[%c0_59, %c14, %c0_60] : memref<1x132x16xbf16, #tpu.memory_space<vmem>>, vector<1x96x16xbf16>
    %52 = vector.shape_cast %51 : vector<1x96x16xbf16> to vector<96x16xbf16>
    %c0_61 = arith.constant 0 : index
    %c0_62 = arith.constant 0 : index
    %53 = vector.load %arg6[%c0_61, %c0_62] : memref<96x64xf32, #tpu.memory_space<vmem>>, vector<96x64xf32>
    %c112 = arith.constant 112 : index
    %c0_63 = arith.constant 0 : index
    %54 = vector.load %arg2[%c112, %c0_63] : memref<256x64xbf16, #tpu.memory_space<vmem>>, vector<16x64xbf16>
    %cst_64 = arith.constant dense<0.000000e+00> : vector<96x64xf32>
    %55 = tpu.matmul %52, %54, %cst_64 {dimension_numbers = #tpu.dot_dimension_numbers<[1], [0], [0], [1], [0, 0, 1, 1], [], []>} : vector<96x16xbf16>, vector<16x64xbf16>, vector<96x64xf32> -> vector<96x64xf32>
    %56 = arith.addf %53, %55 : vector<96x64xf32>
    %c0_65 = arith.constant 0 : index
    %c0_66 = arith.constant 0 : index
    %57 = vector.load %arg6[%c0_65, %c0_66] : memref<96x64xf32, #tpu.memory_space<vmem>>, vector<96x64xf32>
    tpu.vector_store %arg6[%c0_65, %c0_66], %56 {strides = array<i32>} : memref<96x64xf32, #tpu.memory_space<vmem>>, vector<96x64xf32>,
    %c0_67 = arith.constant 0 : index
    %c22 = arith.constant 22 : index
    %c0_68 = arith.constant 0 : index
    %58 = vector.load %arg1[%c0_67, %c22, %c0_68] : memref<1x132x16xbf16, #tpu.memory_space<vmem>>, vector<1x96x16xbf16>
    %59 = vector.shape_cast %58 : vector<1x96x16xbf16> to vector<96x16xbf16>
    %c0_69 = arith.constant 0 : index
    %c0_70 = arith.constant 0 : index
    %60 = vector.load %arg6[%c0_69, %c0_70] : memref<96x64xf32, #tpu.memory_space<vmem>>, vector<96x64xf32>
    %c128 = arith.constant 128 : index
    %c0_71 = arith.constant 0 : index
    %61 = vector.load %arg2[%c128, %c0_71] : memref<256x64xbf16, #tpu.memory_space<vmem>>, vector<16x64xbf16>
    %cst_72 = arith.constant dense<0.000000e+00> : vector<96x64xf32>
    %62 = tpu.matmul %59, %61, %cst_72 {dimension_numbers = #tpu.dot_dimension_numbers<[1], [0], [0], [1], [0, 0, 1, 1], [], []>} : vector<96x16xbf16>, vector<16x64xbf16>, vector<96x64xf32> -> vector<96x64xf32>
    %63 = arith.addf %60, %62 : vector<96x64xf32>
    %c0_73 = arith.constant 0 : index
    %c0_74 = arith.constant 0 : index
    %64 = vector.load %arg6[%c0_73, %c0_74] : memref<96x64xf32, #tpu.memory_space<vmem>>, vector<96x64xf32>
    tpu.vector_store %arg6[%c0_73, %c0_74], %63 {strides = array<i32>} : memref<96x64xf32, #tpu.memory_space<vmem>>, vector<96x64xf32>,
    %c0_75 = arith.constant 0 : index
    %c23 = arith.constant 23 : index
    %c0_76 = arith.constant 0 : index
    %65 = vector.load %arg1[%c0_75, %c23, %c0_76] : memref<1x132x16xbf16, #tpu.memory_space<vmem>>, vector<1x96x16xbf16>
    %66 = vector.shape_cast %65 : vector<1x96x16xbf16> to vector<96x16xbf16>
    %c0_77 = arith.constant 0 : index
    %c0_78 = arith.constant 0 : index
    %67 = vector.load %arg6[%c0_77, %c0_78] : memref<96x64xf32, #tpu.memory_space<vmem>>, vector<96x64xf32>
    %c144 = arith.constant 144 : index
    %c0_79 = arith.constant 0 : index
    %68 = vector.load %arg2[%c144, %c0_79] : memref<256x64xbf16, #tpu.memory_space<vmem>>, vector<16x64xbf16>
    %cst_80 = arith.constant dense<0.000000e+00> : vector<96x64xf32>
    %69 = tpu.matmul %66, %68, %cst_80 {dimension_numbers = #tpu.dot_dimension_numbers<[1], [0], [0], [1], [0, 0, 1, 1], [], []>} : vector<96x16xbf16>, vector<16x64xbf16>, vector<96x64xf32> -> vector<96x64xf32>
    %70 = arith.addf %67, %69 : vector<96x64xf32>
    %c0_81 = arith.constant 0 : index
    %c0_82 = arith.constant 0 : index
    %71 = vector.load %arg6[%c0_81, %c0_82] : memref<96x64xf32, #tpu.memory_space<vmem>>, vector<96x64xf32>
    tpu.vector_store %arg6[%c0_81, %c0_82], %70 {strides = array<i32>} : memref<96x64xf32, #tpu.memory_space<vmem>>, vector<96x64xf32>,
    %c0_83 = arith.constant 0 : index
    %c24 = arith.constant 24 : index
    %c0_84 = arith.constant 0 : index
    %72 = vector.load %arg1[%c0_83, %c24, %c0_84] : memref<1x132x16xbf16, #tpu.memory_space<vmem>>, vector<1x96x16xbf16>
    %73 = vector.shape_cast %72 : vector<1x96x16xbf16> to vector<96x16xbf16>
    %c0_85 = arith.constant 0 : index
    %c0_86 = arith.constant 0 : index
    %74 = vector.load %arg6[%c0_85, %c0_86] : memref<96x64xf32, #tpu.memory_space<vmem>>, vector<96x64xf32>
    %c160 = arith.constant 160 : index
    %c0_87 = arith.constant 0 : index
    %75 = vector.load %arg2[%c160, %c0_87] : memref<256x64xbf16, #tpu.memory_space<vmem>>, vector<16x64xbf16>
    %cst_88 = arith.constant dense<0.000000e+00> : vector<96x64xf32>
    %76 = tpu.matmul %73, %75, %cst_88 {dimension_numbers = #tpu.dot_dimension_numbers<[1], [0], [0], [1], [0, 0, 1, 1], [], []>} : vector<96x16xbf16>, vector<16x64xbf16>, vector<96x64xf32> -> vector<96x64xf32>
    %77 = arith.addf %74, %76 : vector<96x64xf32>
    %c0_89 = arith.constant 0 : index
    %c0_90 = arith.constant 0 : index
    %78 = vector.load %arg6[%c0_89, %c0_90] : memref<96x64xf32, #tpu.memory_space<vmem>>, vector<96x64xf32>
    tpu.vector_store %arg6[%c0_89, %c0_90], %77 {strides = array<i32>} : memref<96x64xf32, #tpu.memory_space<vmem>>, vector<96x64xf32>,
    %c0_91 = arith.constant 0 : index
    %c25 = arith.constant 25 : index
    %c0_92 = arith.constant 0 : index
    %79 = vector.load %arg1[%c0_91, %c25, %c0_92] : memref<1x132x16xbf16, #tpu.memory_space<vmem>>, vector<1x96x16xbf16>
    %80 = vector.shape_cast %79 : vector<1x96x16xbf16> to vector<96x16xbf16>
    %c0_93 = arith.constant 0 : index
    %c0_94 = arith.constant 0 : index
    %81 = vector.load %arg6[%c0_93, %c0_94] : memref<96x64xf32, #tpu.memory_space<vmem>>, vector<96x64xf32>
    %c176 = arith.constant 176 : index
    %c0_95 = arith.constant 0 : index
    %82 = vector.load %arg2[%c176, %c0_95] : memref<256x64xbf16, #tpu.memory_space<vmem>>, vector<16x64xbf16>
    %cst_96 = arith.constant dense<0.000000e+00> : vector<96x64xf32>
    %83 = tpu.matmul %80, %82, %cst_96 {dimension_numbers = #tpu.dot_dimension_numbers<[1], [0], [0], [1], [0, 0, 1, 1], [], []>} : vector<96x16xbf16>, vector<16x64xbf16>, vector<96x64xf32> -> vector<96x64xf32>
    %84 = arith.addf %81, %83 : vector<96x64xf32>
    %c0_97 = arith.constant 0 : index
    %c0_98 = arith.constant 0 : index
    %85 = vector.load %arg6[%c0_97, %c0_98] : memref<96x64xf32, #tpu.memory_space<vmem>>, vector<96x64xf32>
    tpu.vector_store %arg6[%c0_97, %c0_98], %84 {strides = array<i32>} : memref<96x64xf32, #tpu.memory_space<vmem>>, vector<96x64xf32>,
    %c0_99 = arith.constant 0 : index
    %c33 = arith.constant 33 : index
    %c0_100 = arith.constant 0 : index
    %86 = vector.load %arg1[%c0_99, %c33, %c0_100] : memref<1x132x16xbf16, #tpu.memory_space<vmem>>, vector<1x96x16xbf16>
    %87 = vector.shape_cast %86 : vector<1x96x16xbf16> to vector<96x16xbf16>
    %c0_101 = arith.constant 0 : index
    %c0_102 = arith.constant 0 : index
    %88 = vector.load %arg6[%c0_101, %c0_102] : memref<96x64xf32, #tpu.memory_space<vmem>>, vector<96x64xf32>
    %c192 = arith.constant 192 : index
    %c0_103 = arith.constant 0 : index
    %89 = vector.load %arg2[%c192, %c0_103] : memref<256x64xbf16, #tpu.memory_space<vmem>>, vector<16x64xbf16>
    %cst_104 = arith.constant dense<0.000000e+00> : vector<96x64xf32>
    %90 = tpu.matmul %87, %89, %cst_104 {dimension_numbers = #tpu.dot_dimension_numbers<[1], [0], [0], [1], [0, 0, 1, 1], [], []>} : vector<96x16xbf16>, vector<16x64xbf16>, vector<96x64xf32> -> vector<96x64xf32>
    %91 = arith.addf %88, %90 : vector<96x64xf32>
    %c0_105 = arith.constant 0 : index
    %c0_106 = arith.constant 0 : index
    %92 = vector.load %arg6[%c0_105, %c0_106] : memref<96x64xf32, #tpu.memory_space<vmem>>, vector<96x64xf32>
    tpu.vector_store %arg6[%c0_105, %c0_106], %91 {strides = array<i32>} : memref<96x64xf32, #tpu.memory_space<vmem>>, vector<96x64xf32>,
    %c0_107 = arith.constant 0 : index
    %c34 = arith.constant 34 : index
    %c0_108 = arith.constant 0 : index
    %93 = vector.load %arg1[%c0_107, %c34, %c0_108] : memref<1x132x16xbf16, #tpu.memory_space<vmem>>, vector<1x96x16xbf16>
    %94 = vector.shape_cast %93 : vector<1x96x16xbf16> to vector<96x16xbf16>
    %c0_109 = arith.constant 0 : index
    %c0_110 = arith.constant 0 : index
    %95 = vector.load %arg6[%c0_109, %c0_110] : memref<96x64xf32, #tpu.memory_space<vmem>>, vector<96x64xf32>
    %c208 = arith.constant 208 : index
    %c0_111 = arith.constant 0 : index
    %96 = vector.load %arg2[%c208, %c0_111] : memref<256x64xbf16, #tpu.memory_space<vmem>>, vector<16x64xbf16>
    %cst_112 = arith.constant dense<0.000000e+00> : vector<96x64xf32>
    %97 = tpu.matmul %94, %96, %cst_112 {dimension_numbers = #tpu.dot_dimension_numbers<[1], [0], [0], [1], [0, 0, 1, 1], [], []>} : vector<96x16xbf16>, vector<16x64xbf16>, vector<96x64xf32> -> vector<96x64xf32>
    %98 = arith.addf %95, %97 : vector<96x64xf32>
    %c0_113 = arith.constant 0 : index
    %c0_114 = arith.constant 0 : index
    %99 = vector.load %arg6[%c0_113, %c0_114] : memref<96x64xf32, #tpu.memory_space<vmem>>, vector<96x64xf32>
    tpu.vector_store %arg6[%c0_113, %c0_114], %98 {strides = array<i32>} : memref<96x64xf32, #tpu.memory_space<vmem>>, vector<96x64xf32>,
    %c0_115 = arith.constant 0 : index
    %c35 = arith.constant 35 : index
    %c0_116 = arith.constant 0 : index
    %100 = vector.load %arg1[%c0_115, %c35, %c0_116] : memref<1x132x16xbf16, #tpu.memory_space<vmem>>, vector<1x96x16xbf16>
    %101 = vector.shape_cast %100 : vector<1x96x16xbf16> to vector<96x16xbf16>
    %c0_117 = arith.constant 0 : index
    %c0_118 = arith.constant 0 : index
    %102 = vector.load %arg6[%c0_117, %c0_118] : memref<96x64xf32, #tpu.memory_space<vmem>>, vector<96x64xf32>
    %c224 = arith.constant 224 : index
    %c0_119 = arith.constant 0 : index
    %103 = vector.load %arg2[%c224, %c0_119] : memref<256x64xbf16, #tpu.memory_space<vmem>>, vector<16x64xbf16>
    %cst_120 = arith.constant dense<0.000000e+00> : vector<96x64xf32>
    %104 = tpu.matmul %101, %103, %cst_120 {dimension_numbers = #tpu.dot_dimension_numbers<[1], [0], [0], [1], [0, 0, 1, 1], [], []>} : vector<96x16xbf16>, vector<16x64xbf16>, vector<96x64xf32> -> vector<96x64xf32>
    %105 = arith.addf %102, %104 : vector<96x64xf32>
    %c0_121 = arith.constant 0 : index
    %c0_122 = arith.constant 0 : index
    %106 = vector.load %arg6[%c0_121, %c0_122] : memref<96x64xf32, #tpu.memory_space<vmem>>, vector<96x64xf32>
    tpu.vector_store %arg6[%c0_121, %c0_122], %105 {strides = array<i32>} : memref<96x64xf32, #tpu.memory_space<vmem>>, vector<96x64xf32>,
    %c0_123 = arith.constant 0 : index
    %c36 = arith.constant 36 : index
    %c0_124 = arith.constant 0 : index
    %107 = vector.load %arg1[%c0_123, %c36, %c0_124] : memref<1x132x16xbf16, #tpu.memory_space<vmem>>, vector<1x96x16xbf16>
    %108 = vector.shape_cast %107 : vector<1x96x16xbf16> to vector<96x16xbf16>
    %c0_125 = arith.constant 0 : index
    %c0_126 = arith.constant 0 : index
    %109 = vector.load %arg6[%c0_125, %c0_126] : memref<96x64xf32, #tpu.memory_space<vmem>>, vector<96x64xf32>
    %c240 = arith.constant 240 : index
    %c0_127 = arith.constant 0 : index
    %110 = vector.load %arg2[%c240, %c0_127] : memref<256x64xbf16, #tpu.memory_space<vmem>>, vector<16x64xbf16>
    %cst_128 = arith.constant dense<0.000000e+00> : vector<96x64xf32>
    %111 = tpu.matmul %108, %110, %cst_128 {dimension_numbers = #tpu.dot_dimension_numbers<[1], [0], [0], [1], [0, 0, 1, 1], [], []>} : vector<96x16xbf16>, vector<16x64xbf16>, vector<96x64xf32> -> vector<96x64xf32>
    %112 = arith.addf %109, %111 : vector<96x64xf32>
    %c0_129 = arith.constant 0 : index
    %c0_130 = arith.constant 0 : index
    %113 = vector.load %arg6[%c0_129, %c0_130] : memref<96x64xf32, #tpu.memory_space<vmem>>, vector<96x64xf32>
    tpu.vector_store %arg6[%c0_129, %c0_130], %112 {strides = array<i32>} : memref<96x64xf32, #tpu.memory_space<vmem>>, vector<96x64xf32>,
    %c0_131 = arith.constant 0 : index
    %c0_132 = arith.constant 0 : index
    %114 = vector.load %arg6[%c0_131, %c0_132] : memref<96x64xf32, #tpu.memory_space<vmem>>, vector<96x64xf32>
    %c0_133 = arith.constant 0 : index
    %c0_134 = arith.constant 0 : index
    %115 = vector.load %arg3[%c0_133, %c0_134] : memref<1x64xf32, #tpu.memory_space<vmem>>, vector<1x64xf32>
    %116 = vector.broadcast %115 : vector<1x64xf32> to vector<96x64xf32>
    %117 = arith.mulf %114, %116 : vector<96x64xf32>
    %c0_135 = arith.constant 0 : index
    %c0_136 = arith.constant 0 : index
    %118 = vector.load %arg4[%c0_135, %c0_136] : memref<1x64xf32, #tpu.memory_space<vmem>>, vector<1x64xf32>
    %119 = vector.broadcast %118 : vector<1x64xf32> to vector<96x64xf32>
    %120 = arith.addf %117, %119 : vector<96x64xf32>
    %cst_137 = arith.constant 0.000000e+00 : f32
    %121 = vector.broadcast %cst_137 : f32 to vector<96x64xf32>
    %122 = arith.maximumf %120, %121 : vector<96x64xf32>
    %123 = arith.truncf %122 : vector<96x64xf32> to vector<96x64xbf16>
    %c0_138 = arith.constant 0 : index
    %c0_139 = arith.constant 0 : index
    %c0_140 = arith.constant 0 : index
    %124 = vector.load %arg5[%c0_138, %c0_139, %c0_140] : memref<1x96x64xbf16, #tpu.memory_space<vmem>>, vector<1x96x64xbf16>
    %125 = vector.shape_cast %124 : vector<1x96x64xbf16> to vector<96x64xbf16>
    %126 = vector.shape_cast %123 : vector<96x64xbf16> to vector<1x96x64xbf16>
    tpu.vector_store %arg5[%c0_138, %c0_139, %c0_140], %126 {strides = array<i32>} : memref<1x96x64xbf16, #tpu.memory_space<vmem>>, vector<1x96x64xbf16>,
    return
  }
  func.func @transform_0(%arg0: i32) -> (i32, i32, i32) {
    %c0_i32 = arith.constant 0 : i32
    %c0_i32_0 = arith.constant 0 : i32
    %c0_i32_1 = arith.constant 0 : i32
    return %arg0, %c0_i32, %c0_i32_0 : i32, i32, i32
  }
  func.func @transform_1(%arg0: i32) -> (i32, i32) {
    %c0_i32 = arith.constant 0 : i32
    %c0_i32_0 = arith.constant 0 : i32
    %c0_i32_1 = arith.constant 0 : i32
    return %c0_i32, %c0_i32_0 : i32, i32
  }
  func.func @transform_2(%arg0: i32) -> (i32, i32) {
    %c0_i32 = arith.constant 0 : i32
    %c0_i32_0 = arith.constant 0 : i32
    %c0_i32_1 = arith.constant 0 : i32
    return %c0_i32, %c0_i32_0 : i32, i32
  }
  func.func @transform_3(%arg0: i32) -> (i32, i32) {
    %c0_i32 = arith.constant 0 : i32
    %c0_i32_0 = arith.constant 0 : i32
    %c0_i32_1 = arith.constant 0 : i32
    return %c0_i32, %c0_i32_0 : i32, i32
  }
  func.func @transform_4(%arg0: i32) -> (i32, i32, i32) {
    %c0_i32 = arith.constant 0 : i32
    %c0_i32_0 = arith.constant 0 : i32
    %c0_i32_1 = arith.constant 0 : i32
    return %arg0, %c0_i32, %c0_i32_0 : i32, i32, i32
  }
}

module attributes {stable_mosaic.version = 11 : i64} {
  func.func @_conv_kernel(%arg0: i32, %arg1: memref<1x38x256xbf16, #tpu.memory_space<vmem>>, %arg2: memref<1024x64xbf16, #tpu.memory_space<vmem>>, %arg3: memref<1x64xf32, #tpu.memory_space<vmem>>, %arg4: memref<1x64xf32, #tpu.memory_space<vmem>>, %arg5: memref<1x32x64xbf16, #tpu.memory_space<vmem>>, %arg6: memref<32x64xf32, #tpu.memory_space<vmem>>) attributes {dimension_semantics = [#tpu.dimension_semantics<parallel>], iteration_bounds = array<i64: 2>, scalar_prefetch = 0 : i64, scratch_operands = 1 : i64, tpu.core_type = #tpu.core_type<tc>, window_params = [{transform_indices = @transform_0, window_bounds = array<i64: 1, 38, 256>}, {pipeline_mode = #tpu.pipeline_mode<synchronous>, transform_indices = @transform_1, window_bounds = array<i64: 1024, 64>}, {pipeline_mode = #tpu.pipeline_mode<synchronous>, transform_indices = @transform_2, window_bounds = array<i64: 1, 64>}, {pipeline_mode = #tpu.pipeline_mode<synchronous>, transform_indices = @transform_3, window_bounds = array<i64: 1, 64>}, {transform_indices = @transform_4, window_bounds = array<i64: 1, 32, 64>}]} {
    %cst = arith.constant 0.000000e+00 : f32
    %0 = vector.broadcast %cst : f32 to vector<32x64xf32>
    %c0 = arith.constant 0 : index
    %c0_0 = arith.constant 0 : index
    %1 = vector.load %arg6[%c0, %c0_0] : memref<32x64xf32, #tpu.memory_space<vmem>>, vector<32x64xf32>
    tpu.vector_store %arg6[%c0, %c0_0], %0 {strides = array<i32>} : memref<32x64xf32, #tpu.memory_space<vmem>>, vector<32x64xf32>,
    %c0_1 = arith.constant 0 : index
    %c0_2 = arith.constant 0 : index
    %c0_3 = arith.constant 0 : index
    %2 = vector.load %arg1[%c0_1, %c0_2, %c0_3] : memref<1x38x256xbf16, #tpu.memory_space<vmem>>, vector<1x32x256xbf16>
    %3 = vector.shape_cast %2 : vector<1x32x256xbf16> to vector<32x256xbf16>
    %c0_4 = arith.constant 0 : index
    %c0_5 = arith.constant 0 : index
    %4 = vector.load %arg6[%c0_4, %c0_5] : memref<32x64xf32, #tpu.memory_space<vmem>>, vector<32x64xf32>
    %c0_6 = arith.constant 0 : index
    %c0_7 = arith.constant 0 : index
    %5 = vector.load %arg2[%c0_6, %c0_7] : memref<1024x64xbf16, #tpu.memory_space<vmem>>, vector<256x64xbf16>
    %cst_8 = arith.constant dense<0.000000e+00> : vector<32x64xf32>
    %6 = tpu.matmul %3, %5, %cst_8 {dimension_numbers = #tpu.dot_dimension_numbers<[1], [0], [0], [1], [0, 0, 1, 1], [], []>} : vector<32x256xbf16>, vector<256x64xbf16>, vector<32x64xf32> -> vector<32x64xf32>
    %7 = arith.addf %4, %6 : vector<32x64xf32>
    %c0_9 = arith.constant 0 : index
    %c0_10 = arith.constant 0 : index
    %8 = vector.load %arg6[%c0_9, %c0_10] : memref<32x64xf32, #tpu.memory_space<vmem>>, vector<32x64xf32>
    tpu.vector_store %arg6[%c0_9, %c0_10], %7 {strides = array<i32>} : memref<32x64xf32, #tpu.memory_space<vmem>>, vector<32x64xf32>,
    %c0_11 = arith.constant 0 : index
    %c1 = arith.constant 1 : index
    %c0_12 = arith.constant 0 : index
    %9 = vector.load %arg1[%c0_11, %c1, %c0_12] : memref<1x38x256xbf16, #tpu.memory_space<vmem>>, vector<1x32x256xbf16>
    %10 = vector.shape_cast %9 : vector<1x32x256xbf16> to vector<32x256xbf16>
    %c0_13 = arith.constant 0 : index
    %c0_14 = arith.constant 0 : index
    %11 = vector.load %arg6[%c0_13, %c0_14] : memref<32x64xf32, #tpu.memory_space<vmem>>, vector<32x64xf32>
    %c256 = arith.constant 256 : index
    %c0_15 = arith.constant 0 : index
    %12 = vector.load %arg2[%c256, %c0_15] : memref<1024x64xbf16, #tpu.memory_space<vmem>>, vector<256x64xbf16>
    %cst_16 = arith.constant dense<0.000000e+00> : vector<32x64xf32>
    %13 = tpu.matmul %10, %12, %cst_16 {dimension_numbers = #tpu.dot_dimension_numbers<[1], [0], [0], [1], [0, 0, 1, 1], [], []>} : vector<32x256xbf16>, vector<256x64xbf16>, vector<32x64xf32> -> vector<32x64xf32>
    %14 = arith.addf %11, %13 : vector<32x64xf32>
    %c0_17 = arith.constant 0 : index
    %c0_18 = arith.constant 0 : index
    %15 = vector.load %arg6[%c0_17, %c0_18] : memref<32x64xf32, #tpu.memory_space<vmem>>, vector<32x64xf32>
    tpu.vector_store %arg6[%c0_17, %c0_18], %14 {strides = array<i32>} : memref<32x64xf32, #tpu.memory_space<vmem>>, vector<32x64xf32>,
    %c0_19 = arith.constant 0 : index
    %c5 = arith.constant 5 : index
    %c0_20 = arith.constant 0 : index
    %16 = vector.load %arg1[%c0_19, %c5, %c0_20] : memref<1x38x256xbf16, #tpu.memory_space<vmem>>, vector<1x32x256xbf16>
    %17 = vector.shape_cast %16 : vector<1x32x256xbf16> to vector<32x256xbf16>
    %c0_21 = arith.constant 0 : index
    %c0_22 = arith.constant 0 : index
    %18 = vector.load %arg6[%c0_21, %c0_22] : memref<32x64xf32, #tpu.memory_space<vmem>>, vector<32x64xf32>
    %c512 = arith.constant 512 : index
    %c0_23 = arith.constant 0 : index
    %19 = vector.load %arg2[%c512, %c0_23] : memref<1024x64xbf16, #tpu.memory_space<vmem>>, vector<256x64xbf16>
    %cst_24 = arith.constant dense<0.000000e+00> : vector<32x64xf32>
    %20 = tpu.matmul %17, %19, %cst_24 {dimension_numbers = #tpu.dot_dimension_numbers<[1], [0], [0], [1], [0, 0, 1, 1], [], []>} : vector<32x256xbf16>, vector<256x64xbf16>, vector<32x64xf32> -> vector<32x64xf32>
    %21 = arith.addf %18, %20 : vector<32x64xf32>
    %c0_25 = arith.constant 0 : index
    %c0_26 = arith.constant 0 : index
    %22 = vector.load %arg6[%c0_25, %c0_26] : memref<32x64xf32, #tpu.memory_space<vmem>>, vector<32x64xf32>
    tpu.vector_store %arg6[%c0_25, %c0_26], %21 {strides = array<i32>} : memref<32x64xf32, #tpu.memory_space<vmem>>, vector<32x64xf32>,
    %c0_27 = arith.constant 0 : index
    %c6 = arith.constant 6 : index
    %c0_28 = arith.constant 0 : index
    %23 = vector.load %arg1[%c0_27, %c6, %c0_28] : memref<1x38x256xbf16, #tpu.memory_space<vmem>>, vector<1x32x256xbf16>
    %24 = vector.shape_cast %23 : vector<1x32x256xbf16> to vector<32x256xbf16>
    %c0_29 = arith.constant 0 : index
    %c0_30 = arith.constant 0 : index
    %25 = vector.load %arg6[%c0_29, %c0_30] : memref<32x64xf32, #tpu.memory_space<vmem>>, vector<32x64xf32>
    %c768 = arith.constant 768 : index
    %c0_31 = arith.constant 0 : index
    %26 = vector.load %arg2[%c768, %c0_31] : memref<1024x64xbf16, #tpu.memory_space<vmem>>, vector<256x64xbf16>
    %cst_32 = arith.constant dense<0.000000e+00> : vector<32x64xf32>
    %27 = tpu.matmul %24, %26, %cst_32 {dimension_numbers = #tpu.dot_dimension_numbers<[1], [0], [0], [1], [0, 0, 1, 1], [], []>} : vector<32x256xbf16>, vector<256x64xbf16>, vector<32x64xf32> -> vector<32x64xf32>
    %28 = arith.addf %25, %27 : vector<32x64xf32>
    %c0_33 = arith.constant 0 : index
    %c0_34 = arith.constant 0 : index
    %29 = vector.load %arg6[%c0_33, %c0_34] : memref<32x64xf32, #tpu.memory_space<vmem>>, vector<32x64xf32>
    tpu.vector_store %arg6[%c0_33, %c0_34], %28 {strides = array<i32>} : memref<32x64xf32, #tpu.memory_space<vmem>>, vector<32x64xf32>,
    %c0_35 = arith.constant 0 : index
    %c0_36 = arith.constant 0 : index
    %30 = vector.load %arg6[%c0_35, %c0_36] : memref<32x64xf32, #tpu.memory_space<vmem>>, vector<32x64xf32>
    %c0_37 = arith.constant 0 : index
    %c0_38 = arith.constant 0 : index
    %31 = vector.load %arg3[%c0_37, %c0_38] : memref<1x64xf32, #tpu.memory_space<vmem>>, vector<1x64xf32>
    %32 = vector.broadcast %31 : vector<1x64xf32> to vector<32x64xf32>
    %33 = arith.mulf %30, %32 : vector<32x64xf32>
    %c0_39 = arith.constant 0 : index
    %c0_40 = arith.constant 0 : index
    %34 = vector.load %arg4[%c0_39, %c0_40] : memref<1x64xf32, #tpu.memory_space<vmem>>, vector<1x64xf32>
    %35 = vector.broadcast %34 : vector<1x64xf32> to vector<32x64xf32>
    %36 = arith.addf %33, %35 : vector<32x64xf32>
    %cst_41 = arith.constant 0.000000e+00 : f32
    %37 = vector.broadcast %cst_41 : f32 to vector<32x64xf32>
    %38 = arith.maximumf %36, %37 : vector<32x64xf32>
    %39 = arith.truncf %38 : vector<32x64xf32> to vector<32x64xbf16>
    %c0_42 = arith.constant 0 : index
    %c0_43 = arith.constant 0 : index
    %c0_44 = arith.constant 0 : index
    %40 = vector.load %arg5[%c0_42, %c0_43, %c0_44] : memref<1x32x64xbf16, #tpu.memory_space<vmem>>, vector<1x32x64xbf16>
    %41 = vector.shape_cast %40 : vector<1x32x64xbf16> to vector<32x64xbf16>
    %42 = vector.shape_cast %39 : vector<32x64xbf16> to vector<1x32x64xbf16>
    tpu.vector_store %arg5[%c0_42, %c0_43, %c0_44], %42 {strides = array<i32>} : memref<1x32x64xbf16, #tpu.memory_space<vmem>>, vector<1x32x64xbf16>,
    return
  }
  func.func @transform_0(%arg0: i32) -> (i32, i32, i32) {
    %c0_i32 = arith.constant 0 : i32
    %c0_i32_0 = arith.constant 0 : i32
    %c0_i32_1 = arith.constant 0 : i32
    return %arg0, %c0_i32, %c0_i32_0 : i32, i32, i32
  }
  func.func @transform_1(%arg0: i32) -> (i32, i32) {
    %c0_i32 = arith.constant 0 : i32
    %c0_i32_0 = arith.constant 0 : i32
    %c0_i32_1 = arith.constant 0 : i32
    return %c0_i32, %c0_i32_0 : i32, i32
  }
  func.func @transform_2(%arg0: i32) -> (i32, i32) {
    %c0_i32 = arith.constant 0 : i32
    %c0_i32_0 = arith.constant 0 : i32
    %c0_i32_1 = arith.constant 0 : i32
    return %c0_i32, %c0_i32_0 : i32, i32
  }
  func.func @transform_3(%arg0: i32) -> (i32, i32) {
    %c0_i32 = arith.constant 0 : i32
    %c0_i32_0 = arith.constant 0 : i32
    %c0_i32_1 = arith.constant 0 : i32
    return %c0_i32, %c0_i32_0 : i32, i32
  }
  func.func @transform_4(%arg0: i32) -> (i32, i32, i32) {
    %c0_i32 = arith.constant 0 : i32
    %c0_i32_0 = arith.constant 0 : i32
    %c0_i32_1 = arith.constant 0 : i32
    return %arg0, %c0_i32, %c0_i32_0 : i32, i32, i32
  }
}

module attributes {stable_mosaic.version = 11 : i64} {
  func.func @_conv_kernel(%arg0: i32, %arg1: memref<1x20x256xbf16, #tpu.memory_space<vmem>>, %arg2: memref<1024x64xbf16, #tpu.memory_space<vmem>>, %arg3: memref<1x64xf32, #tpu.memory_space<vmem>>, %arg4: memref<1x64xf32, #tpu.memory_space<vmem>>, %arg5: memref<64x32xbf16, #tpu.memory_space<vmem>>, %arg6: memref<1x32xf32, #tpu.memory_space<vmem>>, %arg7: memref<1x32xf32, #tpu.memory_space<vmem>>, %arg8: memref<1x16x32xf32, #tpu.memory_space<vmem>>, %arg9: memref<16x64xf32, #tpu.memory_space<vmem>>) attributes {dimension_semantics = [#tpu.dimension_semantics<parallel>], iteration_bounds = array<i64: 2>, scalar_prefetch = 0 : i64, scratch_operands = 1 : i64, tpu.core_type = #tpu.core_type<tc>, window_params = [{transform_indices = @transform_0, window_bounds = array<i64: 1, 20, 256>}, {pipeline_mode = #tpu.pipeline_mode<synchronous>, transform_indices = @transform_1, window_bounds = array<i64: 1024, 64>}, {pipeline_mode = #tpu.pipeline_mode<synchronous>, transform_indices = @transform_2, window_bounds = array<i64: 1, 64>}, {pipeline_mode = #tpu.pipeline_mode<synchronous>, transform_indices = @transform_3, window_bounds = array<i64: 1, 64>}, {pipeline_mode = #tpu.pipeline_mode<synchronous>, transform_indices = @transform_4, window_bounds = array<i64: 64, 32>}, {pipeline_mode = #tpu.pipeline_mode<synchronous>, transform_indices = @transform_5, window_bounds = array<i64: 1, 32>}, {pipeline_mode = #tpu.pipeline_mode<synchronous>, transform_indices = @transform_6, window_bounds = array<i64: 1, 32>}, {transform_indices = @transform_7, window_bounds = array<i64: 1, 16, 32>}]} {
    %cst = arith.constant 0.000000e+00 : f32
    %0 = vector.broadcast %cst : f32 to vector<16x64xf32>
    %c0 = arith.constant 0 : index
    %c0_0 = arith.constant 0 : index
    %1 = vector.load %arg9[%c0, %c0_0] : memref<16x64xf32, #tpu.memory_space<vmem>>, vector<16x64xf32>
    tpu.vector_store %arg9[%c0, %c0_0], %0 {strides = array<i32>} : memref<16x64xf32, #tpu.memory_space<vmem>>, vector<16x64xf32>,
    %c0_1 = arith.constant 0 : index
    %c0_2 = arith.constant 0 : index
    %c0_3 = arith.constant 0 : index
    %2 = vector.load %arg1[%c0_1, %c0_2, %c0_3] : memref<1x20x256xbf16, #tpu.memory_space<vmem>>, vector<1x16x256xbf16>
    %3 = vector.shape_cast %2 : vector<1x16x256xbf16> to vector<16x256xbf16>
    %c0_4 = arith.constant 0 : index
    %c0_5 = arith.constant 0 : index
    %4 = vector.load %arg9[%c0_4, %c0_5] : memref<16x64xf32, #tpu.memory_space<vmem>>, vector<16x64xf32>
    %c0_6 = arith.constant 0 : index
    %c0_7 = arith.constant 0 : index
    %5 = vector.load %arg2[%c0_6, %c0_7] : memref<1024x64xbf16, #tpu.memory_space<vmem>>, vector<256x64xbf16>
    %cst_8 = arith.constant dense<0.000000e+00> : vector<16x64xf32>
    %6 = tpu.matmul %3, %5, %cst_8 {dimension_numbers = #tpu.dot_dimension_numbers<[1], [0], [0], [1], [0, 0, 1, 1], [], []>} : vector<16x256xbf16>, vector<256x64xbf16>, vector<16x64xf32> -> vector<16x64xf32>
    %7 = arith.addf %4, %6 : vector<16x64xf32>
    %c0_9 = arith.constant 0 : index
    %c0_10 = arith.constant 0 : index
    %8 = vector.load %arg9[%c0_9, %c0_10] : memref<16x64xf32, #tpu.memory_space<vmem>>, vector<16x64xf32>
    tpu.vector_store %arg9[%c0_9, %c0_10], %7 {strides = array<i32>} : memref<16x64xf32, #tpu.memory_space<vmem>>, vector<16x64xf32>,
    %c0_11 = arith.constant 0 : index
    %c1 = arith.constant 1 : index
    %c0_12 = arith.constant 0 : index
    %9 = vector.load %arg1[%c0_11, %c1, %c0_12] : memref<1x20x256xbf16, #tpu.memory_space<vmem>>, vector<1x16x256xbf16>
    %10 = vector.shape_cast %9 : vector<1x16x256xbf16> to vector<16x256xbf16>
    %c0_13 = arith.constant 0 : index
    %c0_14 = arith.constant 0 : index
    %11 = vector.load %arg9[%c0_13, %c0_14] : memref<16x64xf32, #tpu.memory_space<vmem>>, vector<16x64xf32>
    %c256 = arith.constant 256 : index
    %c0_15 = arith.constant 0 : index
    %12 = vector.load %arg2[%c256, %c0_15] : memref<1024x64xbf16, #tpu.memory_space<vmem>>, vector<256x64xbf16>
    %cst_16 = arith.constant dense<0.000000e+00> : vector<16x64xf32>
    %13 = tpu.matmul %10, %12, %cst_16 {dimension_numbers = #tpu.dot_dimension_numbers<[1], [0], [0], [1], [0, 0, 1, 1], [], []>} : vector<16x256xbf16>, vector<256x64xbf16>, vector<16x64xf32> -> vector<16x64xf32>
    %14 = arith.addf %11, %13 : vector<16x64xf32>
    %c0_17 = arith.constant 0 : index
    %c0_18 = arith.constant 0 : index
    %15 = vector.load %arg9[%c0_17, %c0_18] : memref<16x64xf32, #tpu.memory_space<vmem>>, vector<16x64xf32>
    tpu.vector_store %arg9[%c0_17, %c0_18], %14 {strides = array<i32>} : memref<16x64xf32, #tpu.memory_space<vmem>>, vector<16x64xf32>,
    %c0_19 = arith.constant 0 : index
    %c3 = arith.constant 3 : index
    %c0_20 = arith.constant 0 : index
    %16 = vector.load %arg1[%c0_19, %c3, %c0_20] : memref<1x20x256xbf16, #tpu.memory_space<vmem>>, vector<1x16x256xbf16>
    %17 = vector.shape_cast %16 : vector<1x16x256xbf16> to vector<16x256xbf16>
    %c0_21 = arith.constant 0 : index
    %c0_22 = arith.constant 0 : index
    %18 = vector.load %arg9[%c0_21, %c0_22] : memref<16x64xf32, #tpu.memory_space<vmem>>, vector<16x64xf32>
    %c512 = arith.constant 512 : index
    %c0_23 = arith.constant 0 : index
    %19 = vector.load %arg2[%c512, %c0_23] : memref<1024x64xbf16, #tpu.memory_space<vmem>>, vector<256x64xbf16>
    %cst_24 = arith.constant dense<0.000000e+00> : vector<16x64xf32>
    %20 = tpu.matmul %17, %19, %cst_24 {dimension_numbers = #tpu.dot_dimension_numbers<[1], [0], [0], [1], [0, 0, 1, 1], [], []>} : vector<16x256xbf16>, vector<256x64xbf16>, vector<16x64xf32> -> vector<16x64xf32>
    %21 = arith.addf %18, %20 : vector<16x64xf32>
    %c0_25 = arith.constant 0 : index
    %c0_26 = arith.constant 0 : index
    %22 = vector.load %arg9[%c0_25, %c0_26] : memref<16x64xf32, #tpu.memory_space<vmem>>, vector<16x64xf32>
    tpu.vector_store %arg9[%c0_25, %c0_26], %21 {strides = array<i32>} : memref<16x64xf32, #tpu.memory_space<vmem>>, vector<16x64xf32>,
    %c0_27 = arith.constant 0 : index
    %c4 = arith.constant 4 : index
    %c0_28 = arith.constant 0 : index
    %23 = vector.load %arg1[%c0_27, %c4, %c0_28] : memref<1x20x256xbf16, #tpu.memory_space<vmem>>, vector<1x16x256xbf16>
    %24 = vector.shape_cast %23 : vector<1x16x256xbf16> to vector<16x256xbf16>
    %c0_29 = arith.constant 0 : index
    %c0_30 = arith.constant 0 : index
    %25 = vector.load %arg9[%c0_29, %c0_30] : memref<16x64xf32, #tpu.memory_space<vmem>>, vector<16x64xf32>
    %c768 = arith.constant 768 : index
    %c0_31 = arith.constant 0 : index
    %26 = vector.load %arg2[%c768, %c0_31] : memref<1024x64xbf16, #tpu.memory_space<vmem>>, vector<256x64xbf16>
    %cst_32 = arith.constant dense<0.000000e+00> : vector<16x64xf32>
    %27 = tpu.matmul %24, %26, %cst_32 {dimension_numbers = #tpu.dot_dimension_numbers<[1], [0], [0], [1], [0, 0, 1, 1], [], []>} : vector<16x256xbf16>, vector<256x64xbf16>, vector<16x64xf32> -> vector<16x64xf32>
    %28 = arith.addf %25, %27 : vector<16x64xf32>
    %c0_33 = arith.constant 0 : index
    %c0_34 = arith.constant 0 : index
    %29 = vector.load %arg9[%c0_33, %c0_34] : memref<16x64xf32, #tpu.memory_space<vmem>>, vector<16x64xf32>
    tpu.vector_store %arg9[%c0_33, %c0_34], %28 {strides = array<i32>} : memref<16x64xf32, #tpu.memory_space<vmem>>, vector<16x64xf32>,
    %c0_35 = arith.constant 0 : index
    %c0_36 = arith.constant 0 : index
    %30 = vector.load %arg9[%c0_35, %c0_36] : memref<16x64xf32, #tpu.memory_space<vmem>>, vector<16x64xf32>
    %c0_37 = arith.constant 0 : index
    %c0_38 = arith.constant 0 : index
    %31 = vector.load %arg3[%c0_37, %c0_38] : memref<1x64xf32, #tpu.memory_space<vmem>>, vector<1x64xf32>
    %32 = vector.broadcast %31 : vector<1x64xf32> to vector<16x64xf32>
    %33 = arith.mulf %30, %32 : vector<16x64xf32>
    %c0_39 = arith.constant 0 : index
    %c0_40 = arith.constant 0 : index
    %34 = vector.load %arg4[%c0_39, %c0_40] : memref<1x64xf32, #tpu.memory_space<vmem>>, vector<1x64xf32>
    %35 = vector.broadcast %34 : vector<1x64xf32> to vector<16x64xf32>
    %36 = arith.addf %33, %35 : vector<16x64xf32>
    %cst_41 = arith.constant 0.000000e+00 : f32
    %37 = vector.broadcast %cst_41 : f32 to vector<16x64xf32>
    %38 = arith.maximumf %36, %37 : vector<16x64xf32>
    %39 = arith.truncf %38 : vector<16x64xf32> to vector<16x64xbf16>
    %c0_42 = arith.constant 0 : index
    %c0_43 = arith.constant 0 : index
    %40 = vector.load %arg5[%c0_42, %c0_43] : memref<64x32xbf16, #tpu.memory_space<vmem>>, vector<64x32xbf16>
    %cst_44 = arith.constant dense<0.000000e+00> : vector<16x32xf32>
    %41 = tpu.matmul %39, %40, %cst_44 {dimension_numbers = #tpu.dot_dimension_numbers<[1], [0], [0], [1], [0, 0, 1, 1], [], []>} : vector<16x64xbf16>, vector<64x32xbf16>, vector<16x32xf32> -> vector<16x32xf32>
    %c0_45 = arith.constant 0 : index
    %c0_46 = arith.constant 0 : index
    %42 = vector.load %arg6[%c0_45, %c0_46] : memref<1x32xf32, #tpu.memory_space<vmem>>, vector<1x32xf32>
    %43 = vector.broadcast %42 : vector<1x32xf32> to vector<16x32xf32>
    %44 = arith.mulf %41, %43 : vector<16x32xf32>
    %c0_47 = arith.constant 0 : index
    %c0_48 = arith.constant 0 : index
    %45 = vector.load %arg7[%c0_47, %c0_48] : memref<1x32xf32, #tpu.memory_space<vmem>>, vector<1x32xf32>
    %46 = vector.broadcast %45 : vector<1x32xf32> to vector<16x32xf32>
    %47 = arith.addf %44, %46 : vector<16x32xf32>
    %cst_49 = arith.constant 0.000000e+00 : f32
    %48 = vector.broadcast %cst_49 : f32 to vector<16x32xf32>
    %49 = arith.maximumf %47, %48 : vector<16x32xf32>
    %c0_50 = arith.constant 0 : index
    %c0_51 = arith.constant 0 : index
    %c0_52 = arith.constant 0 : index
    %50 = vector.load %arg8[%c0_50, %c0_51, %c0_52] : memref<1x16x32xf32, #tpu.memory_space<vmem>>, vector<1x16x32xf32>
    %51 = vector.shape_cast %50 : vector<1x16x32xf32> to vector<16x32xf32>
    %52 = vector.shape_cast %49 : vector<16x32xf32> to vector<1x16x32xf32>
    tpu.vector_store %arg8[%c0_50, %c0_51, %c0_52], %52 {strides = array<i32>} : memref<1x16x32xf32, #tpu.memory_space<vmem>>, vector<1x16x32xf32>,
    return
  }
  func.func @transform_0(%arg0: i32) -> (i32, i32, i32) {
    %c0_i32 = arith.constant 0 : i32
    %c0_i32_0 = arith.constant 0 : i32
    %c0_i32_1 = arith.constant 0 : i32
    return %arg0, %c0_i32, %c0_i32_0 : i32, i32, i32
  }
  func.func @transform_1(%arg0: i32) -> (i32, i32) {
    %c0_i32 = arith.constant 0 : i32
    %c0_i32_0 = arith.constant 0 : i32
    %c0_i32_1 = arith.constant 0 : i32
    return %c0_i32, %c0_i32_0 : i32, i32
  }
  func.func @transform_2(%arg0: i32) -> (i32, i32) {
    %c0_i32 = arith.constant 0 : i32
    %c0_i32_0 = arith.constant 0 : i32
    %c0_i32_1 = arith.constant 0 : i32
    return %c0_i32, %c0_i32_0 : i32, i32
  }
  func.func @transform_3(%arg0: i32) -> (i32, i32) {
    %c0_i32 = arith.constant 0 : i32
    %c0_i32_0 = arith.constant 0 : i32
    %c0_i32_1 = arith.constant 0 : i32
    return %c0_i32, %c0_i32_0 : i32, i32
  }
  func.func @transform_4(%arg0: i32) -> (i32, i32) {
    %c0_i32 = arith.constant 0 : i32
    %c0_i32_0 = arith.constant 0 : i32
    %c0_i32_1 = arith.constant 0 : i32
    return %c0_i32, %c0_i32_0 : i32, i32
  }
  func.func @transform_5(%arg0: i32) -> (i32, i32) {
    %c0_i32 = arith.constant 0 : i32
    %c0_i32_0 = arith.constant 0 : i32
    %c0_i32_1 = arith.constant 0 : i32
    return %c0_i32, %c0_i32_0 : i32, i32
  }
  func.func @transform_6(%arg0: i32) -> (i32, i32) {
    %c0_i32 = arith.constant 0 : i32
    %c0_i32_0 = arith.constant 0 : i32
    %c0_i32_1 = arith.constant 0 : i32
    return %c0_i32, %c0_i32_0 : i32, i32
  }
  func.func @transform_7(%arg0: i32) -> (i32, i32, i32) {
    %c0_i32 = arith.constant 0 : i32
    %c0_i32_0 = arith.constant 0 : i32
    %c0_i32_1 = arith.constant 0 : i32
    return %arg0, %c0_i32, %c0_i32_0 : i32, i32, i32
  }
}

</mosaic_0001>

<bundles_post_ra>
// kernel: spatial_path_forward.4
= control target key start
LH: loop header
LB: loop body
LE: loop exit
PB: predicated region body
PF: predicated region fallthrough
CT: control target
= control target key end

     0   :  { %s1627_s15 = smov 0   ;;  %s1929_s0 = inlined_call_operand.vmem [shape: bf16[2,38,256], index: 0, kind: input, shape index: {}]   ;;  %s1930_s1 = inlined_call_operand.vmem [shape: bf16[1024,64], index: 1, kind: input, shape index: {}]   ;;  %s1931_s2 = inlined_call_operand.vmem [shape: f32[1,64], index: 2, kind: input, shape index: {}]   ;;  %s1932_s3 = inlined_call_operand.vmem [shape: f32[1,64], index: 3, kind: input, shape index: {}]   ;;  %s1933_s4 = inlined_call_operand.vmem [shape: bf16[2,32,64], index: 4, kind: output, shape index: {}]  }
   0x1 LB: > { %s1285_s16 = sadd.s32 4294967295, %s1599_s15   ;;  %p1289_p0 = scmp.ge.s32.totalorder %s1599_s15, 1  ;;  %s1599_s15 = sphi %s1627_s15, %s14_s15  }
   0x2   : > { %p162_p1 = scmp.lt.s32.totalorder %s1599_s15, 3 }
   0x4   : > { %p163_p2 = pnand %p1289_p0, %p162_p1 }
   0x5   : > { %p188_p3 = scmp.lt.s32.totalorder (!%p163_p2), %s1285_s16, 1 }
   0x6   : > { %166 = sbr.rel (%p163_p2) target bundleno = 314 (0x13a), region = 36 }
   0xb   : > { %v1514_v0 = vld [vmem:[%s1930_s1 + $0x78] sm:$0xff]   ;;  %v1516_v2 = vld [vmem:[%s1930_s1 + $0x70] sm:$0xff]   ;;  %v1520_v6 = vld [vmem:[%s1930_s1 + $0x68] sm:$0xff]   ;;  %s1935_s16 = smov (!%p188_p3, %s1285_s16), 1  ;;  %vm479_vm0 = vsmask.f32 7424 }
   0xc   : > { %v1515_v1 = vld [vmem:[%s1930_s1 + $0x38] sm:$0xff]   ;;  %1392 = vmatprep.subr.bf16.mxu0 %v1514_v0  ;;  %v1518_v4 = vld [vmem:[%s1930_s1 + $0x30] sm:$0xff]   ;;  %v1522_v8 = vld [vmem:[%s1930_s1 + $0x28] sm:$0xff]   ;;  %s1504_s17 = smul.u32 40, %s1935_s16  ;;  %vm1011_vm1 = vcmask 1044480   ;;  %vm199_vm3 = vcmask 523264  }
   0xd   : > { %1393 = vmatpush3.bf16.msra.mxu0 %v1515_v1  ;;  %v1517_v3 = vld [vmem:[%s1930_s1 + $0xf8] sm:$0xff]   ;;  %v1521_v7 = vld [vmem:[%s1930_s1 + $0xf0] sm:$0xff]   ;;  %v1524_v10 = vld [vmem:[%s1930_s1 + $0x60] sm:$0xff]   ;;  %vm739_vm2 = vsmask.f32 5376  ;;  %s1387_s9 = sshll.u32 %s1935_s16, 4 }
   0xe   : > { %1394 = vmatprep.subr.bf16.mxu0 %v1516_v2  ;;  %1420 = vmatprep.subr.bf16.mxu1 %v1517_v3  ;;  %v1519_v5 = vld [vmem:[%s1930_s1 + $0xb8] sm:$0xff]   ;;  %v1523_v9 = vld [vmem:[%s1930_s1 + $0xb0] sm:$0xff]   ;;  %v1525_v11 = vld [vmem:[%s1930_s1 + $0xe8] sm:$0xff]   ;;  %s1729_s28 = scalar_lea.vmem %s1929_s0, %s1504_s17  ;;  %s197_s12 = scalar_lea.vmem %s1933_s4, %s1387_s9  ;;  %vm1225_vm4 = vcmask 519168  }
   0xf   : > { %1421 = vmatpush3.bf16.msra.mxu1 %v1519_v5  ;;  %v1526_v12 = vld [vmem:[%s1930_s1 + $0x20] sm:$0xff]   ;;  %v1527_v13 = vld [vmem:[%s1930_s1 + $0xa8] sm:$0xff]   ;;  %v1528_v14 = vld [vmem:[%s1930_s1 + $0x58] sm:$0xff]  }
  0x10   : > { %1422 = vmatprep.subr.bf16.mxu1 %v1521_v7  ;;  %v1529_v15 = vld [vmem:[%s1930_s1 + $0xe0] sm:$0xff]   ;;  %v1530_v16 = vld [vmem:[%s1930_s1 + $0x18] sm:$0xff]   ;;  %v1532_v18 = vld [vmem:[%s1930_s1 + $0x50] sm:$0xff]  }
  0x11   : > { %1395 = vmatpush3.bf16.msra.mxu0 %v1518_v4  ;;  %v1531_v17 = vld [vmem:[%s1930_s1 + $0xa0] sm:$0xff]   ;;  %v1533_v19 = vld [vmem:[%s1930_s1 + $0xd8] sm:$0xff]   ;;  %v1534_v20 = vld [vmem:[%s1930_s1 + $0x10] sm:$0xff]  }
  0x12   : > { %1396 = vmatprep.subr.bf16.mxu0 %v1520_v6  ;;  %v1535_v21 = vld [vmem:[%s1930_s1 + $0x98] sm:$0xff]   ;;  %v1536_v22 = vld [vmem:[%s1930_s1 + $0x48] sm:$0xff]   ;;  %v1537_v23 = vld [vmem:[%s1930_s1 + $0xd0] sm:$0xff]  }
  0x13   : > { %1423 = vmatpush3.bf16.msra.mxu1 %v1523_v9  ;;  %v1538_v24 = vld [vmem:[%s1930_s1 + $0x8] sm:$0xff]   ;;  %v1539_v25 = vld [vmem:[%s1930_s1 + $0x90] sm:$0xff]   ;;  %v1540_v26 = vld [vmem:[%s1930_s1 + $0x40] sm:$0xff]  }
  0x14   : > { %1424 = vmatprep.subr.bf16.mxu1 %v1525_v11  ;;  %v1541_v27 = vld [vmem:[%s1930_s1 + $0xc8] sm:$0xff]   ;;  %v1542_v28 = vld [vmem:[%s1930_s1] sm:$0xff]   ;;  %v1547_v35 = vld [vmem:[%s1930_s1 + $0x178] sm:$0xff]  }
  0x15   : > { %1397 = vmatpush3.bf16.msra.mxu0 %v1522_v8  ;;  %v1543_v29 = vld [vmem:[%s1930_s1 + $0x88] sm:$0xff]   ;;  %v204_v30 = vld [vmem:[%s1729_s28] sm:$0xff]  ;;  %v1549_v38 = vld [vmem:[%s1930_s1 + $0x138] sm:$0xff]  }
  0x16   : > { %1398 = vmatprep.subr.bf16.mxu0 %v1524_v10  ;;  %v1739_v31 = vld [vmem:[%s1729_s28 + $0x8] sm:$0xff]  ;;  %v1546_v34 = vld [vmem:[%s1930_s1 + $0xc0] sm:$0xff]   ;;  %v1756_v41 = vld [vmem:[%s1729_s28 + $0x14] ss:$8 sps:$4 sm:$0xff]  }
  0x17   : > { %1425 = vmatpush3.bf16.msra.mxu1 %v1527_v13  ;;  %v1293_v32 = vcombine.low %v204_v30, %v1739_v31  ;;  %v1294_v33 = vcombine.high %v204_v30, %v1739_v31  ;;  %v1548_v36 = vld [vmem:[%s1930_s1 + $0x80] sm:$0xff]   ;;  %v1552_v44 = vld [vmem:[%s1930_s1 + $0x170] sm:$0xff]   ;;  %v500_v45 = vshll.u32 %v1756_v41, 16  ;;  %v1553_v46 = vld [vmem:[%s1930_s1 + $0x1f8] sm:$0xff]   ;;  %v512_v8 = vshrl.u32 %v1756_v41, 16 }
  0x18   : > { %1426 = vmatprep.subr.bf16.mxu1 %v1529_v15  ;;  %v1766_v47 = vld [vmem:[%s1729_s28 + $0x10] ss:$8 sps:$4 sm:$0xff]   ;;  %v1557_v57 = vld [vmem:[%s1930_s1 + $0x168] sm:$0xff]   ;;  %v1561_v62 = vld [vmem:[%s1930_s1 + $0x160] sm:$0xff]  }
  0x19   : > { %1399 = vmatpush3.bf16.msra.mxu0 %v1526_v12  ;;  %392 = vmatprep.mubr.bf16.mxu0 %v1294_v33  ;;  %v493_v37 = vshrl.u32 %v1294_v33, 16  ;;  %v495_v39 = vshll.u32 %v1294_v33, 16  ;;  %v481_v40 = vshrl.u32 %v1293_v32, 16  ;;  %v483_v42 = vshll.u32 %v1293_v32, 16  ;;  %v1555_v50 = vld [vmem:[%s1930_s1 + $0x130] sm:$0xff]   ;;  %v1556_v54 = vld [vmem:[%s1930_s1 + $0x1b8] sm:$0xff]  }
  0x1a   : > { %1400 = vmatprep.subr.bf16.mxu0 %v1528_v14  ;;  %v502_v51 = vrot.slane %v500_v45, 1  ;;  %v488_v52 = vshll.u32 %v1766_v47, 16  ;;  %v1558_v58 = vld [vmem:[%s1930_s1 + $0x1f0] sm:$0xff]   ;;  %v1559_v60 = vld [vmem:[%s1930_s1 + $0x128] sm:$0xff]   ;;  %v1563_v0 = vld [vmem:[%s1930_s1 + $0x120] sm:$0xff]   ;;  %v504_v10 = vshrl.u32 %v1766_v47, 16 }
  0x1b   : > { %1427 = vmatpush3.bf16.msra.mxu1 %v1531_v17  ;;  %v497_v43 = vrot.slane %v495_v39, 1  ;;  %v485_v49 = vrot.slane %v483_v42, 1  ;;  %v1560_v61 = vld [vmem:[%s1930_s1 + $0x1b0] sm:$0xff]   ;;  %v1562_v63 = vld [vmem:[%s1930_s1 + $0x1e8] sm:$0xff]   ;;  %v1565_v2 = vld [vmem:[%s1930_s1 + $0x158] sm:$0xff]  }
  0x1c   : > { %1428 = vmatprep.subr.bf16.mxu1 %v1533_v19  ;;  %v490_v56 = vrot.slane %v488_v52, 1  ;;  %v1564_v1 = vld [vmem:[%s1930_s1 + $0x1a8] sm:$0xff]   ;;  %v1566_v3 = vld [vmem:[%s1930_s1 + $0x1e0] sm:$0xff]   ;;  %v1567_v4 = vld [vmem:[%s1930_s1 + $0x118] sm:$0xff]   ;;  %v751_v33 = vrot.slane %v504_v10, 2 }
  0x1d   : > { %1401 = vmatpush3.bf16.msra.mxu0 %v1530_v16  ;;  %v498_v48 = vor.u32 %v497_v43, %v493_v37  ;;  %v486_v53 = vor.u32 %v485_v49, %v481_v40  ;;  %v1568_v5 = vld [vmem:[%s1930_s1 + $0x1a0] sm:$0xff]   ;;  %v1569_v6 = vld [vmem:[%s1930_s1 + $0x150] sm:$0xff]   ;;  %v1570_v7 = vld [vmem:[%s1930_s1 + $0x1d8] sm:$0xff]   ;;  %v514_v16 = vor.u32 %v512_v8, %v502_v51  ;;  %v1016_v40 = vrot.slane %v1756_v41, 3 }
  0x1e   : > { %1402 = vmatprep.subr.bf16.mxu0 %v1532_v18  ;;  %v1571_v9 = vld [vmem:[%s1930_s1 + $0x110] sm:$0xff]   ;;  %v1572_v11 = vld [vmem:[%s1930_s1 + $0x198] sm:$0xff]   ;;  %v421_v12 = vld [vmem:[%s1729_s28 + $0x20] sm:$0x11]  ;;  %v768_v18 = vrot.slane %v512_v8, 2 }
  0x1f   : > { %1429 = vmatpush3.bf16.msra.mxu1 %v1535_v21  ;;  %v503_v55 = vsel %vm479_vm0, %v498_v48, %v502_v51  ;;  %v491_v59 = vsel %vm479_vm0, %v486_v53, %v490_v56  ;;  %v1318_v13 = vcombine.high %v421_v12, %v421_v12  ;;  %v1317_v14 = vcombine.low %v421_v12, %v421_v12  ;;  %v1575_v15 = vld [vmem:[%s1930_s1 + $0x148] sm:$0xff]   ;;  %v1576_v17 = vld [vmem:[%s1930_s1 + $0x1d0] sm:$0xff]   ;;  %v681_v51 = vld [vmem:[%s1729_s28 + $0x20] sm:$0x77] }
  0x20   : > { %1430 = vmatprep.subr.bf16.mxu1 %v1537_v23  ;;  %652 = vmatprep.mubr.bf16.mxu1 %v503_v55  ;;  %v771_v23 = vrot.slane %v500_v45, 3  ;;  %v1582_v37 = vld [vmem:[%s1930_s1 + $0x188] sm:$0xff]  }
  0x21   : > { %1403 = vmatpush3.bf16.msra.mxu0 %v1534_v20  ;;  %v516_v19 = vshll.u32 %v1318_v13, 16  ;;  %v506_v20 = vor.u32 %v504_v10, %v490_v56  ;;  %v508_v21 = vshll.u32 %v1317_v14, 16  ;;  %v1586_v56 = vld [vmem:[%s1930_s1 + $0x180] sm:$0xff]  }
  0x22   : > { %1404 = vmatprep.subr.bf16.mxu0 %v1536_v22  ;;  %v1577_v22 = vld [vmem:[%s1930_s1 + $0x108] sm:$0xff]   ;;  %v772_v48 = vor.u32 %v771_v23, %v768_v18 }
  0x23   : > { %1431 = vmatpush3.bf16.msra.mxu1 %v1539_v25  ;;  %v518_v25 = vrot.slane %v516_v19, 1 }
  0x24   : > { %1432 = vmatprep.subr.bf16.mxu1 %v1541_v27  ;;  %v1579_v27 = vld [vmem:[%s1930_s1 + $0x140] sm:$0xff]  }
  0x25   : > { %1405 = vmatpush3.bf16.msra.mxu0 %v1538_v24  ;;  %v1578_v24 = vld [vmem:[%s1930_s1 + $0x190] sm:$0xff]  }
  0x26   : > { %1406 = vmatprep.subr.bf16.mxu0 %v1540_v26  ;;  %v510_v26 = vrot.slane %v508_v21, 1 }
  0x27   : > { %1433 = vmatpush3.bf16.msra.mxu1 %v1543_v29  ;;  %v519_v29 = vsel %vm479_vm0, %v514_v16, %v518_v25 }
  0x28   : > { %1434 = vmatprep.subr.bf16.mxu1 %v1546_v34  ;;  %v511_v30 = vsel %vm479_vm0, %v506_v20, %v510_v26  ;;  %v677_v34 = vld [vmem:[%s1729_s28] sm:$0xcc] }
  0x29   : > { %1407 = vmatpush3.bf16.msra.mxu0 %v1542_v28  ;;  %v1580_v28 = vld [vmem:[%s1930_s1 + $0x1c8] sm:$0xff]   ;;  %v1336_v39 = vcombine.high %v677_v34, %v1739_v31 }
  0x2a   : > { %1448 = vmatprep.subr.bf16.mxu0 %v1547_v35  ;;  %v754_v35 = vrot.slane %v488_v52, 3  ;;  %v953_v52 = vld [vmem:[%s1729_s28 + $0x20] sm:$0x77] }
  0x2b   : > { %1435 = vmatpush3.bf16.msra.mxu1 %v1548_v36  ;;  %v1013_v36 = vrot.slane %v1766_v47, 3  ;;  %v758_v42 = vshrl.u32 %v1336_v39, 16  ;;  %v761_v43 = vshll.u32 %v1336_v39, 16 }
  0x2c   : > { %393 = vmatmul.mubr.bf16.vlgmr.msra.gmra.mxu0 %v1293_v32  ;;  %1476 = vmatprep.subr.bf16.mxu1 %v1553_v46  ;;  %v1581_v32 = vld [vmem:[%s1930_s1 + $0x100] sm:$0xff]   ;;  %v755_v49 = vor.u32 %v754_v35, %v751_v33 }
  0x2d   : > { %1449 = vmatpush3.bf16.msra.mxu0 %v1549_v38  ;;  %400 = vmatprep.mubr.bf16.mxu0 %v1756_v41  ;;  %v1335_v38 = vcombine.low %v677_v34, %v1739_v31  ;;  %v1585_v46 = vld [vmem:[%s1930_s1 + $0x1c0] sm:$0xff]   ;;  %v760_v53 = vrot.slane %v758_v42, 2 }
  0x2e   : > { %1450 = vmatprep.subr.bf16.mxu0 %v1552_v44  ;;  %653 = vmatmul.mubr.bf16.vlgmr.msra.gmra.mxu1 %v491_v59  ;;  %v1340_v59 = vcombine.high %v681_v51, %v681_v51 }
  0x2f   : > { %1477 = vmatpush3.bf16.msra.mxu1 %v1556_v54  ;;  %660 = vmatprep.mubr.bf16.mxu1 %v519_v29  ;;  %v741_v44 = vshrl.u32 %v1335_v38, 16  ;;  %v744_v45 = vshll.u32 %v1335_v38, 16  ;;  %v763_v54 = vrot.slane %v761_v43, 3 }
  0x30   : > { %1478 = vmatprep.subr.bf16.mxu1 %v1558_v58 }
  0x31   : > { %1451 = vmatpush3.bf16.msra.mxu0 %v1555_v50  ;;  %v949_v50 = vld [vmem:[%s1729_s28] sm:$0x88]  ;;  %v743_v55 = vrot.slane %v741_v44, 2  ;;  %v746_v41 = vrot.slane %v744_v45, 3 }
  0x32   : > { %1452 = vmatprep.subr.bf16.mxu0 %v1557_v57  ;;  %v1357_v57 = vcombine.low %v949_v50, %v1739_v31  ;;  %v1358_v58 = vcombine.high %v949_v50, %v1739_v31 }
  0x33   : > { %1479 = vmatpush3.bf16.msra.mxu1 %v1560_v61  ;;  %v764_v61 = vor.u32 %v763_v54, %v760_v53 }
  0x34   : > { %401 = vmatmul.mubr.bf16.gmra.mxu0 %v1766_v47  ;;  %1480 = vmatprep.subr.bf16.mxu1 %v1562_v63  ;;  %v1362_v63 = vcombine.high %v953_v52, %v953_v52 }
  0x35   : > { %1453 = vmatpush3.bf16.msra.mxu0 %v1559_v60  ;;  %v1339_v60 = vcombine.low %v681_v51, %v681_v51 }
  0x36   : > { %1454 = vmatprep.subr.bf16.mxu0 %v1561_v62  ;;  %661 = vmatmul.mubr.bf16.gmra.mxu1 %v511_v30  ;;  %v747_v62 = vor.u32 %v746_v41, %v743_v55  ;;  %v1020_v14 = vrot.slane %v1362_v63, 3 }
  0x37   : > { %1481 = vmatpush3.bf16.msra.mxu1 %v1564_v1  ;;  %v1012_v1 = vrot.slane %v1357_v57, 3  ;;  %v778_v8 = vshll.u32 %v1339_v60, 16 }
  0x38   : > { %1482 = vmatprep.subr.bf16.mxu1 %v1566_v3  ;;  %v784_v3 = vshrl.u32 %v1340_v59, 16 }
  0x39   : > { %1455 = vmatpush3.bf16.msra.mxu0 %v1563_v0  ;;  %v1361_v0 = vcombine.low %v953_v52, %v953_v52  ;;  %v780_v13 = vrot.slane %v778_v8, 3 }
  0x3a   : > { %1456 = vmatprep.subr.bf16.mxu0 %v1565_v2  ;;  %v1015_v2 = vrot.slane %v1358_v58, 3  ;;  %v786_v10 = vrot.slane %v784_v3, 2 }
  0x3b   : > { %1483 = vmatpush3.bf16.msra.mxu1 %v1568_v5  ;;  %v773_v5 = vsel %vm739_vm2, %v764_v61, %v772_v48  ;;  %v1018_v19 = vrot.slane %v1361_v0, 3 }
  0x3c   : > { %1484 = vmatprep.subr.bf16.mxu1 %v1570_v7  ;;  %v775_v7 = vshrl.u32 %v1339_v60, 16  ;;  %924 = vmatprep.mubr.bf16.mxu0 %v773_v5  ;;  %v1017_v31 = vsel %vm1011_vm1, %v1015_v2, %v1016_v40 }
  0x3d   : > { %1457 = vmatpush3.bf16.msra.mxu0 %v1567_v4  ;;  %v787_v4 = vshll.u32 %v1340_v59, 16  ;;  %1154 = vmatprep.mubr.bf16.mxu1 %v1017_v31  ;;  %v1019_v21 = vsel %vm1011_vm1, %v1013_v36, %v1018_v19 }
  0x3e   : > { %1458 = vmatprep.subr.bf16.mxu0 %v1569_v6  ;;  %v756_v6 = vsel %vm739_vm2, %v747_v62, %v755_v49  ;;  %v777_v12 = vrot.slane %v775_v7, 2 }
  0x3f   : > { %1485 = vmatpush3.bf16.msra.mxu1 %v1572_v11  ;;  %v789_v11 = vrot.slane %v787_v4, 3 }
  0x40   : > { %1486 = vmatprep.subr.bf16.mxu1 %v1576_v17  ;;  %v781_v16 = vor.u32 %v780_v13, %v777_v12  ;;  %v1021_v17 = vsel %vm1011_vm1, %v1016_v40, %v1020_v14 }
  0x41   : > { %1459 = vmatpush3.bf16.msra.mxu0 %v1571_v9  ;;  %v1014_v9 = vsel %vm1011_vm1, %v1012_v1, %v1013_v36 }
  0x42   : > { %1460 = vmatprep.subr.bf16.mxu0 %v1575_v15  ;;  %v790_v15 = vor.u32 %v789_v11, %v786_v10  ;;  %v782_v20 = vsel %vm739_vm2, %v755_v49, %v781_v16 }
  0x43   : > { %1487 = vmatpush3.bf16.msra.mxu1 %v1578_v24 }
  0x44   : > { %1488 = vmatprep.subr.bf16.mxu1 %v1580_v28  ;;  %v791_v18 = vsel %vm739_vm2, %v772_v48, %v790_v15 }
  0x45   : > { %1461 = vmatpush3.bf16.msra.mxu0 %v1577_v22  ;;  %v1601_v22 = vmov 0.0  }
  0x46   : > { %1462 = vmatprep.subr.bf16.mxu0 %v1579_v27  ;;  %200 = vst.msk [vmem:[#allocation2] sm:$0xff] %vm199_vm3, %v1601_v22  ;;  %201 = vst.msk [vmem:[#allocation2 + $0x8] sm:$0xff] %vm199_vm3, %v1601_v22 }
  0x47   : > { %1489 = vmatpush3.bf16.msra.mxu1 %v1582_v37  ;;  %202 = vst.msk [vmem:[#allocation2 + $0x10] sm:$0xff] %vm199_vm3, %v1601_v22  ;;  %203 = vst.msk [vmem:[#allocation2 + $0x18] sm:$0xff] %vm199_vm3, %v1601_v22 }
  0x48   : > { %1490 = vmatprep.subr.bf16.mxu1 %v1585_v46 }
  0x49   : > { %1463 = vmatpush3.bf16.msra.mxu0 %v1581_v32 }
  0x4b   : > { %1491 = vmatpush3.bf16.msra.mxu1 %v1586_v56 }
  0x4c   : > { %925 = vmatmul.mubr.bf16.vlgmr.msra.gmra.mxu0 %v756_v6 }
  0x4d   : > { %932 = vmatprep.mubr.bf16.mxu0 %v791_v18  ;;  %v208_v24 = vld [vmem:[#allocation2] sm:$0xff]  ;;  %v209_v28 = vld [vmem:[#allocation2 + $0x8] sm:$0xff] }
  0x4e   : > { %1155 = vmatmul.mubr.bf16.vlgmr.msra.gmra.mxu1 %v1014_v9  ;;  %v210_v35 = vld [vmem:[#allocation2 + $0x10] sm:$0xff]  ;;  %v211_v45 = vld [vmem:[#allocation2 + $0x18] sm:$0xff] }
  0x4f   : > { %1162 = vmatprep.mubr.bf16.mxu1 %v1021_v17 }
  0x54   : > { %933 = vmatmul.mubr.bf16.gmra.mxu0 %v782_v20 }
  0x56   : > { %1163 = vmatmul.mubr.bf16.gmra.mxu1 %v1019_v21 }
  0xec   : > { %v1408_v23 = vpop.f32.mrf.mxu0 }
  0xee   : > { %v1409_v25 = vpop.f32.mrf.mxu0  ;;  %v1436_v34 = vpop.f32.mrf.mxu1 }
  0xef   : > { %v1410_v26 = vadd.f32 %v1409_v25, %v1408_v23 }
  0xf0   : > { %v1411_v27 = vpop.f32.mrf.mxu0  ;;  %v1437_v38 = vpop.f32.mrf.mxu1 }
  0xf1   : > { %v409_v47 = vadd.f32 %v1410_v26, %v208_v24  ;;  %v1438_v40 = vadd.f32 %v1437_v38, %v1436_v34  ;;  %v1380_v38 = vld [vmem:[%s1932_s3] ss:$0 sm:$0xff] }
  0xf2   : > { %v1412_v29 = vpop.f32.mrf.mxu0  ;;  %v1439_v44 = vpop.f32.mrf.mxu1 }
  0xf3   : > { %413 = vst.msk [vmem:[#allocation2] sm:$0xff] %vm199_vm3, %v409_v47  ;;  %v1413_v30 = vadd.f32 %v1412_v29, %v1411_v27 }
  0xf4   : > { %v1414_v32 = vpop.f32.mrf.mxu0  ;;  %v1440_v50 = vpop.f32.mrf.mxu1 }
  0xf5   : > { %v410_v33 = vadd.f32 %v1413_v30, %v209_v28  ;;  %v1441_v51 = vadd.f32 %v1440_v50, %v1439_v44 }
  0xf6   : > { %v1415_v36 = vpop.f32.mrf.mxu0  ;;  %v1442_v55 = vpop.f32.mrf.mxu1 }
  0xf7   : > { %414 = vst.msk [vmem:[#allocation2 + $0x8] sm:$0xff] %vm199_vm3, %v410_v33  ;;  %v1416_v37 = vadd.f32 %v1415_v36, %v1414_v32  ;;  %v1379_v33 = vld [vmem:[%s1931_s2] ss:$0 sm:$0xff] }
  0xf8   : > { %v1417_v39 = vpop.f32.mrf.mxu0  ;;  %v1443_v56 = vpop.f32.mrf.mxu1 }
  0xf9   : > { %v411_v42 = vadd.f32 %v1416_v37, %v210_v35  ;;  %v1444_v57 = vadd.f32 %v1443_v56, %v1442_v55 }
  0xfa   : > { %v422_v43 = vld [vmem:[#allocation2] sm:$0xff]  ;;  %v1418_v46 = vpop.f32.mrf.mxu0  ;;  %v1445_v58 = vpop.f32.mrf.mxu1 }
  0xfb   : > { %v669_v48 = vadd.f32 %v1438_v40, %v422_v43  ;;  %415 = vst.msk [vmem:[#allocation2 + $0x10] sm:$0xff] %vm199_vm3, %v411_v42  ;;  %v1419_v49 = vadd.f32 %v1418_v46, %v1417_v39 }
  0xfc   : > { %v1446_v61 = vpop.f32.mrf.mxu1 }
  0xfd   : > { %673 = vst.msk [vmem:[#allocation2] sm:$0xff] %vm199_vm3, %v669_v48  ;;  %v412_v52 = vadd.f32 %v1419_v49, %v211_v45  ;;  %v1447_v62 = vadd.f32 %v1446_v61, %v1445_v58 }
  0xfe   : > { %v423_v53 = vld [vmem:[#allocation2 + $0x8] sm:$0xff] }
  0xff   : > { %v670_v54 = vadd.f32 %v1441_v51, %v423_v53  ;;  %416 = vst.msk [vmem:[#allocation2 + $0x18] sm:$0xff] %vm199_vm3, %v412_v52 }
 0x101   : > { %674 = vst.msk [vmem:[#allocation2 + $0x8] sm:$0xff] %vm199_vm3, %v670_v54 }
 0x102   : > { %v424_v41 = vld [vmem:[#allocation2 + $0x10] sm:$0xff] }
 0x103   : > { %v671_v59 = vadd.f32 %v1444_v57, %v424_v41 }
 0x104   : > { %v682_v4 = vld [vmem:[#allocation2] sm:$0xff] }
 0x105   : > { %675 = vst.msk [vmem:[#allocation2 + $0x10] sm:$0xff] %vm199_vm3, %v671_v59 }
 0x106   : > { %v425_v60 = vld [vmem:[#allocation2 + $0x18] sm:$0xff] }
 0x107   : > { %v672_v63 = vadd.f32 %v1447_v62, %v425_v60 }
 0x108   : > { %v683_v10 = vld [vmem:[#allocation2 + $0x8] sm:$0xff] }
 0x109   : > { %676 = vst.msk [vmem:[#allocation2 + $0x18] sm:$0xff] %vm199_vm3, %v672_v63 }
 0x10c   : > { %v1464_v0 = vpop.f32.mrf.mxu0  ;;  %v684_v17 = vld [vmem:[#allocation2 + $0x10] sm:$0xff] }
 0x10e   : > { %v1465_v1 = vpop.f32.mrf.mxu0  ;;  %v1492_v2 = vpop.f32.mrf.mxu1 }
 0x10f   : > { %v1466_v3 = vadd.f32 %v1465_v1, %v1464_v0 }
 0x110   : > { %v1467_v5 = vpop.f32.mrf.mxu0  ;;  %v1493_v6 = vpop.f32.mrf.mxu1  ;;  %v685_v26 = vld [vmem:[#allocation2 + $0x18] sm:$0xff] }
 0x111   : > { %v941_v7 = vadd.f32 %v1466_v3, %v682_v4  ;;  %v1494_v19 = vadd.f32 %v1493_v6, %v1492_v2 }
 0x112   : > { %v1468_v8 = vpop.f32.mrf.mxu0  ;;  %v1495_v31 = vpop.f32.mrf.mxu1 }
 0x113   : > { %945 = vst.msk [vmem:[#allocation2] sm:$0xff] %vm199_vm3, %v941_v7  ;;  %v1469_v9 = vadd.f32 %v1468_v8, %v1467_v5 }
 0x114   : > { %v1470_v11 = vpop.f32.mrf.mxu0  ;;  %v1496_v12 = vpop.f32.mrf.mxu1 }
 0x115   : > { %v942_v13 = vadd.f32 %v1469_v9, %v683_v10  ;;  %v1497_v27 = vadd.f32 %v1496_v12, %v1495_v31 }
 0x116   : > { %v1471_v14 = vpop.f32.mrf.mxu0  ;;  %v1498_v15 = vpop.f32.mrf.mxu1 }
 0x117   : > { %946 = vst.msk [vmem:[#allocation2 + $0x8] sm:$0xff] %vm199_vm3, %v942_v13  ;;  %v1472_v16 = vadd.f32 %v1471_v14, %v1470_v11 }
 0x118   : > { %v1473_v18 = vpop.f32.mrf.mxu0  ;;  %v1499_v23 = vpop.f32.mrf.mxu1 }
 0x119   : > { %v943_v20 = vadd.f32 %v1472_v16, %v684_v17  ;;  %v1500_v32 = vadd.f32 %v1499_v23, %v1498_v15 }
 0x11a   : > { %v954_v21 = vld [vmem:[#allocation2] sm:$0xff]  ;;  %v1474_v22 = vpop.f32.mrf.mxu0  ;;  %v1501_v29 = vpop.f32.mrf.mxu1 }
 0x11b   : > { %v1171_v24 = vadd.f32 %v1494_v19, %v954_v21  ;;  %947 = vst.msk [vmem:[#allocation2 + $0x10] sm:$0xff] %vm199_vm3, %v943_v20  ;;  %v1475_v25 = vadd.f32 %v1474_v22, %v1473_v18 }
 0x11c   : > { %v1502_v35 = vpop.f32.mrf.mxu1 }
 0x11d   : > { %1175 = vst.msk [vmem:[#allocation2] sm:$0xff] %vm199_vm3, %v1171_v24  ;;  %v944_v47 = vadd.f32 %v1475_v25, %v685_v26  ;;  %v1503_v40 = vadd.f32 %v1502_v35, %v1501_v29 }
 0x11e   : > { %v955_v28 = vld [vmem:[#allocation2 + $0x8] sm:$0xff] }
 0x11f   : > { %v1172_v30 = vadd.f32 %v1497_v27, %v955_v28  ;;  %948 = vst.msk [vmem:[#allocation2 + $0x18] sm:$0xff] %vm199_vm3, %v944_v47 }
 0x121   : > { %1176 = vst.msk [vmem:[#allocation2 + $0x8] sm:$0xff] %vm199_vm3, %v1172_v30 }
 0x122   : > { %v956_v34 = vld [vmem:[#allocation2 + $0x10] sm:$0xff] }
 0x123   : > { %v1173_v36 = vadd.f32 %v1500_v32, %v956_v34 }
 0x124   : > { %v1179_v37 = vld [vmem:[#allocation2] sm:$0xff] }
 0x125   : > { %v1190_v39 = vmul.f32 %v1379_v33, %v1179_v37  ;;  %1177 = vst.msk [vmem:[#allocation2 + $0x10] sm:$0xff] %vm199_vm3, %v1173_v36 }
 0x126   : > { %v957_v42 = vld [vmem:[#allocation2 + $0x18] sm:$0xff] }
 0x127   : > { %v1201_v43 = vadd.f32 %v1380_v38, %v1190_v39  ;;  %v1174_v44 = vadd.f32 %v1503_v40, %v957_v42 }
 0x128   : > { %v1180_v45 = vld [vmem:[#allocation2 + $0x8] sm:$0xff] }
 0x129   : > { %v1205_v46 = vmax.f32 %v1201_v43, 0.0  ;;  %v1191_v48 = vmul.f32 %v1379_v33, %v1180_v45  ;;  %1178 = vst.msk [vmem:[#allocation2 + $0x18] sm:$0xff] %vm199_vm3, %v1174_v44 }
 0x12b   : > { %v1388_v49 = vpack.c.bf16 %v1205_v46, %v1205_v46  ;;  %v1202_v50 = vadd.f32 %v1380_v38, %v1191_v48 }
 0x12c   : > { %v1181_v51 = vld [vmem:[#allocation2 + $0x10] sm:$0xff] }
 0x12d   : > { %1226 = vst.msk [vmem:[%s197_s12] sm:$0xf] %vm1225_vm4, %v1388_v49  ;;  %v1206_v52 = vmax.f32 %v1202_v50, 0.0  ;;  %v1192_v53 = vmul.f32 %v1379_v33, %v1181_v51 }
 0x12f   : > { %v1389_v54 = vpack.c.bf16 %v1206_v52, %v1206_v52  ;;  %v1203_v55 = vadd.f32 %v1380_v38, %v1192_v53 }
 0x130   : > { %v1182_v41 = vld [vmem:[#allocation2 + $0x18] sm:$0xff] }
 0x131   : > { %1227 = vst.msk [vmem:[%s197_s12 + $0x4] sm:$0xf] %vm1225_vm4, %v1389_v54  ;;  %v1207_v56 = vmax.f32 %v1203_v55, 0.0  ;;  %v1193_v57 = vmul.f32 %v1379_v33, %v1182_v41 }
 0x133   : > { %v1390_v58 = vpack.c.bf16 %v1207_v56, %v1207_v56  ;;  %v1204_v59 = vadd.f32 %v1380_v38, %v1193_v57 }
 0x135   : > { %1228 = vst.msk [vmem:[%s197_s12 + $0x8] sm:$0xf] %vm1225_vm4, %v1390_v58  ;;  %v1208_v60 = vmax.f32 %v1204_v59, 0.0 }
 0x137   : > { %v1391_v61 = vpack.c.bf16 %v1208_v60, %v1208_v60 }
 0x139   : > { %1229 = vst.msk [vmem:[%s197_s12 + $0xc] sm:$0xf] %vm1225_vm4, %v1391_v61 }
 0x13a PF: > { %s14_s15 = sadd.s32 1, %s1599_s15  }
 0x13b   : > { %p11_p4 = scmp.ge.s32.totalorder %s14_s15, 4  }
 0x13d   :  { %13 = sbr.rel (!%p11_p4) target bundleno = 1 (0x1), region = 66 }

// kernel: spatial_path_forward.5
= control target key start
LH: loop header
LB: loop body
LE: loop exit
PB: predicated region body
PF: predicated region fallthrough
CT: control target
= control target key end

     0   :  { %s1637_s24 = smov 0   ;;  %s1912_s0 = inlined_call_operand.vmem [shape: bf16[2,20,256], index: 0, kind: input, shape index: {}]   ;;  %s1913_s1 = inlined_call_operand.vmem [shape: bf16[1024,64], index: 1, kind: input, shape index: {}]   ;;  %s1914_s2 = inlined_call_operand.vmem [shape: f32[1,64], index: 2, kind: input, shape index: {}]   ;;  %s1915_s3 = inlined_call_operand.vmem [shape: f32[1,64], index: 3, kind: input, shape index: {}]   ;;  %s1916_s4 = inlined_call_operand.vmem [shape: bf16[64,32], index: 4, kind: input, shape index: {}]   ;;  %s1917_s5 = inlined_call_operand.vmem [shape: f32[1,32], index: 5, kind: input, shape index: {}]   ;;  %s1918_s6 = inlined_call_operand.vmem [shape: f32[1,32], index: 6, kind: input, shape index: {}]   ;;  %s1919_s7 = inlined_call_operand.vmem [shape: f32[2,16,32], index: 7, kind: output, shape index: {}]  }
   0x1 LB: > { %s1293_s25 = sadd.s32 4294967295, %s1593_s24   ;;  %p1297_p0 = scmp.ge.s32.totalorder %s1593_s24, 1  ;;  %s1593_s24 = sphi %s1637_s24, %s17_s24  }
   0x2   : > { %p237_p1 = scmp.lt.s32.totalorder %s1593_s24, 3 }
   0x4   : > { %p238_p2 = pnand %p1297_p0, %p237_p1 }
   0x5   : > { %p269_p3 = scmp.lt.s32.totalorder (!%p238_p2), %s1293_s25, 1 }
   0x6   : > { %241 = sbr.rel (%p238_p2) target bundleno = 509 (0x1fd), region = 48 }
   0xb   : > { %v1507_v0 = vld [vmem:[%s1913_s1 + $0x78] sm:$0xff]   ;;  %v1509_v2 = vld [vmem:[%s1913_s1 + $0x70] sm:$0xff]   ;;  %v1513_v6 = vld [vmem:[%s1913_s1 + $0x68] sm:$0xff]   ;;  %s1921_s25 = smov (!%p269_p3, %s1293_s25), 1  ;;  %vm520_vm0 = vsmask.f32 7424 }
   0xc   : > { %v1508_v1 = vld [vmem:[%s1913_s1 + $0x38] sm:$0xff]   ;;  %1391 = vmatprep.subr.bf16.mxu0 %v1507_v0  ;;  %v1511_v4 = vld [vmem:[%s1913_s1 + $0x30] sm:$0xff]   ;;  %v1515_v8 = vld [vmem:[%s1913_s1 + $0x28] sm:$0xff]   ;;  %s1496_s9 = smul.u32 24, %s1921_s25  ;;  %vm738_vm1 = vsmask.f32 6400 }
   0xd   : > { %1392 = vmatpush3.bf16.msra.mxu0 %v1508_v1  ;;  %v1510_v3 = vld [vmem:[%s1913_s1 + $0xf8] sm:$0xff]   ;;  %v1514_v7 = vld [vmem:[%s1913_s1 + $0xf0] sm:$0xff]   ;;  %v1517_v10 = vld [vmem:[%s1913_s1 + $0x60] sm:$0xff]   ;;  %vm966_vm2 = vcmask 1045504   ;;  %vm280_vm3 = vcmask 523264   ;;  %vm1596_vm4 = vmmov 0  }
   0xe   : > { %1393 = vmatprep.subr.bf16.mxu0 %v1509_v2  ;;  %1413 = vmatprep.subr.bf16.mxu1 %v1510_v3  ;;  %v1512_v5 = vld [vmem:[%s1913_s1 + $0xb8] sm:$0xff]   ;;  %v1516_v9 = vld [vmem:[%s1913_s1 + $0xb0] sm:$0xff]   ;;  %v1518_v11 = vld [vmem:[%s1913_s1 + $0xe8] sm:$0xff]   ;;  %s1739_s20 = scalar_lea.vmem %s1912_s0, %s1496_s9  ;;  %s1390_s30 = sshll.u32 %s1921_s25, 4  ;;  %vm1235_vm5 = vcmask 261120  }
   0xf   : > { %1414 = vmatpush3.bf16.msra.mxu1 %v1512_v5  ;;  %v1519_v12 = vld [vmem:[%s1913_s1 + $0x20] sm:$0xff]   ;;  %v1520_v13 = vld [vmem:[%s1913_s1 + $0xa8] sm:$0xff]   ;;  %v1521_v14 = vld [vmem:[%s1913_s1 + $0x58] sm:$0xff]   ;;  %s278_s10 = scalar_lea.vmem %s1919_s7, %s1390_s30 }
  0x10   : > { %1415 = vmatprep.subr.bf16.mxu1 %v1514_v7  ;;  %v1522_v15 = vld [vmem:[%s1913_s1 + $0xe0] sm:$0xff]   ;;  %v1523_v16 = vld [vmem:[%s1913_s1 + $0x18] sm:$0xff]   ;;  %v1525_v18 = vld [vmem:[%s1913_s1 + $0x50] sm:$0xff]  }
  0x11   : > { %1394 = vmatpush3.bf16.msra.mxu0 %v1511_v4  ;;  %v1524_v17 = vld [vmem:[%s1913_s1 + $0xa0] sm:$0xff]   ;;  %v1526_v19 = vld [vmem:[%s1913_s1 + $0xd8] sm:$0xff]   ;;  %v1527_v20 = vld [vmem:[%s1913_s1 + $0x10] sm:$0xff]  }
  0x12   : > { %1395 = vmatprep.subr.bf16.mxu0 %v1513_v6  ;;  %v1528_v21 = vld [vmem:[%s1913_s1 + $0x98] sm:$0xff]   ;;  %v1529_v22 = vld [vmem:[%s1913_s1 + $0x48] sm:$0xff]   ;;  %v1530_v23 = vld [vmem:[%s1913_s1 + $0xd0] sm:$0xff]  }
  0x13   : > { %1416 = vmatpush3.bf16.msra.mxu1 %v1516_v9  ;;  %v1531_v24 = vld [vmem:[%s1913_s1 + $0x8] sm:$0xff]   ;;  %v1532_v25 = vld [vmem:[%s1913_s1 + $0x90] sm:$0xff]   ;;  %v1533_v26 = vld [vmem:[%s1913_s1 + $0x40] sm:$0xff]  }
  0x14   : > { %1417 = vmatprep.subr.bf16.mxu1 %v1518_v11  ;;  %v1534_v27 = vld [vmem:[%s1913_s1 + $0xc8] sm:$0xff]   ;;  %v1535_v28 = vld [vmem:[%s1913_s1] sm:$0xff]   ;;  %v1540_v35 = vld [vmem:[%s1913_s1 + $0x178] sm:$0xff]  }
  0x15   : > { %1396 = vmatpush3.bf16.msra.mxu0 %v1515_v8  ;;  %v1536_v29 = vld [vmem:[%s1913_s1 + $0x88] sm:$0xff]   ;;  %v283_v30 = vld [vmem:[%s1739_s20] sm:$0xff]  ;;  %v1542_v38 = vld [vmem:[%s1913_s1 + $0x138] sm:$0xff]  }
  0x16   : > { %1397 = vmatprep.subr.bf16.mxu0 %v1517_v10  ;;  %v1749_v31 = vld [vmem:[%s1739_s20 + $0x8] sm:$0xff]  ;;  %v1539_v33 = vld [vmem:[%s1913_s1 + $0xc0] sm:$0xff]   ;;  %v472_v39 = vld [vmem:[%s1739_s20 + $0x10] sm:$0x11] }
  0x17   : > { %1418 = vmatpush3.bf16.msra.mxu1 %v1520_v13  ;;  %v1302_v32 = vcombine.high %v283_v30, %v1749_v31  ;;  %v1301_v34 = vcombine.low %v283_v30, %v1749_v31  ;;  %v1541_v36 = vld [vmem:[%s1913_s1 + $0x80] sm:$0xff]   ;;  %v1322_v41 = vcombine.high %v472_v39, %v472_v39  ;;  %v1544_v42 = vld [vmem:[%s1913_s1 + $0x170] sm:$0xff]   ;;  %v1321_v43 = vcombine.low %v472_v39, %v472_v39  ;;  %v1545_v46 = vld [vmem:[%s1913_s1 + $0x1f8] sm:$0xff]  }
  0x18   : > { %1419 = vmatprep.subr.bf16.mxu1 %v1522_v15  ;;  %v1547_v50 = vld [vmem:[%s1913_s1 + $0x130] sm:$0xff]   ;;  %v1548_v55 = vld [vmem:[%s1913_s1 + $0x1b8] sm:$0xff]   ;;  %v1549_v56 = vld [vmem:[%s1913_s1 + $0x168] sm:$0xff]  }
  0x19   : > { %1398 = vmatpush3.bf16.msra.mxu0 %v1519_v12  ;;  %457 = vmatprep.mubr.bf16.mxu0 %v1302_v32  ;;  %v534_v37 = vshrl.u32 %v1302_v32, 16  ;;  %v536_v40 = vshll.u32 %v1302_v32, 16  ;;  %v522_v44 = vshrl.u32 %v1301_v34, 16  ;;  %v541_v47 = vshll.u32 %v1322_v41, 16  ;;  %v1550_v59 = vld [vmem:[%s1913_s1 + $0x1f0] sm:$0xff]   ;;  %v1551_v60 = vld [vmem:[%s1913_s1 + $0x128] sm:$0xff]  }
  0x1a   : > { %1399 = vmatprep.subr.bf16.mxu0 %v1521_v14  ;;  %v524_v48 = vshll.u32 %v1301_v34, 16  ;;  %v529_v49 = vshll.u32 %v1321_v43, 16  ;;  %v1552_v62 = vld [vmem:[%s1913_s1 + $0x1b0] sm:$0xff]   ;;  %v1553_v63 = vld [vmem:[%s1913_s1 + $0x160] sm:$0xff]   ;;  %v1554_v0 = vld [vmem:[%s1913_s1 + $0x1e8] sm:$0xff]  }
  0x1b   : > { %1420 = vmatpush3.bf16.msra.mxu1 %v1524_v17  ;;  %v538_v45 = vrot.slane %v536_v40, 1  ;;  %v543_v52 = vrot.slane %v541_v47, 1  ;;  %v1555_v1 = vld [vmem:[%s1913_s1 + $0x120] sm:$0xff]   ;;  %v1556_v2 = vld [vmem:[%s1913_s1 + $0x1a8] sm:$0xff]   ;;  %v1557_v3 = vld [vmem:[%s1913_s1 + $0x158] sm:$0xff]  }
  0x1c   : > { %1421 = vmatprep.subr.bf16.mxu1 %v1526_v19  ;;  %v526_v53 = vrot.slane %v524_v48, 1  ;;  %v531_v54 = vrot.slane %v529_v49, 1  ;;  %v1558_v4 = vld [vmem:[%s1913_s1 + $0x1e0] sm:$0xff]   ;;  %v1559_v5 = vld [vmem:[%s1913_s1 + $0x118] sm:$0xff]   ;;  %v1561_v7 = vld [vmem:[%s1913_s1 + $0x150] sm:$0xff]  }
  0x1d   : > { %1400 = vmatpush3.bf16.msra.mxu0 %v1523_v16  ;;  %v539_v51 = vor.u32 %v538_v45, %v534_v37  ;;  %v1560_v6 = vld [vmem:[%s1913_s1 + $0x1a0] sm:$0xff]   ;;  %v1562_v8 = vld [vmem:[%s1913_s1 + $0x1d8] sm:$0xff]   ;;  %v1563_v9 = vld [vmem:[%s1913_s1 + $0x110] sm:$0xff]  }
  0x1e   : > { %1401 = vmatprep.subr.bf16.mxu0 %v1525_v18  ;;  %v527_v58 = vor.u32 %v526_v53, %v522_v44  ;;  %v1564_v10 = vld [vmem:[%s1913_s1 + $0x198] sm:$0xff]   ;;  %v1565_v11 = vld [vmem:[%s1913_s1 + $0x148] sm:$0xff]   ;;  %v1566_v12 = vld [vmem:[%s1913_s1 + $0x1d0] sm:$0xff]  }
  0x1f   : > { %1422 = vmatpush3.bf16.msra.mxu1 %v1528_v21  ;;  %v544_v57 = vsel %vm520_vm0, %v539_v51, %v543_v52  ;;  %v1567_v13 = vld [vmem:[%s1913_s1 + $0x108] sm:$0xff]   ;;  %v1568_v14 = vld [vmem:[%s1913_s1 + $0x190] sm:$0xff]   ;;  %v1569_v15 = vld [vmem:[%s1913_s1 + $0x140] sm:$0xff]  }
  0x20   : > { %1423 = vmatprep.subr.bf16.mxu1 %v1530_v23  ;;  %675 = vmatprep.mubr.bf16.mxu1 %v544_v57  ;;  %v532_v61 = vsel %vm520_vm0, %v527_v58, %v531_v54  ;;  %v1570_v16 = vld [vmem:[%s1913_s1 + $0x1c8] sm:$0xff]   ;;  %v1571_v17 = vld [vmem:[%s1913_s1 + $0x100] sm:$0xff]   ;;  %v918_v45 = vld [vmem:[%s1739_s20 + $0x10] sm:$0x33] }
  0x21   : > { %1402 = vmatpush3.bf16.msra.mxu0 %v1527_v20  ;;  %v1572_v18 = vld [vmem:[%s1913_s1 + $0x188] sm:$0xff]   ;;  %v688_v19 = vld [vmem:[%s1739_s20] sm:$0xee]  ;;  %v690_v20 = vld [vmem:[%s1739_s20 + $0x10] sm:$0x33]  ;;  %v1362_v49 = vcombine.high %v918_v45, %v918_v45  ;;  %v1361_v53 = vcombine.low %v918_v45, %v918_v45 }
  0x22   : > { %1403 = vmatprep.subr.bf16.mxu0 %v1529_v22  ;;  %v1340_v21 = vcombine.high %v688_v19, %v1749_v31  ;;  %v1339_v22 = vcombine.low %v688_v19, %v1749_v31  ;;  %v1342_v23 = vcombine.high %v690_v20, %v690_v20  ;;  %v916_v40 = vld [vmem:[%s1739_s20] sm:$0xcc] }
  0x23   : > { %1424 = vmatpush3.bf16.msra.mxu1 %v1532_v25  ;;  %v1577_v25 = vld [vmem:[%s1913_s1 + $0x1c0] sm:$0xff]   ;;  %v1360_v48 = vcombine.high %v916_v40, %v1749_v31  ;;  %v1359_v52 = vcombine.low %v916_v40, %v1749_v31  ;;  %v1595_v31 = vmov 0.0  }
  0x24   : > { %1425 = vmatprep.subr.bf16.mxu1 %v1534_v27  ;;  %v760_v27 = vshll.u32 %v1340_v21, 16  ;;  %v765_v30 = vshrl.u32 %v1342_v23, 16  ;;  %v768_v32 = vshll.u32 %v1342_v23, 16  ;;  %281 = vst.msk [vmem:[#allocation2] sm:$0xff] %vm280_vm3, %v1595_v31  ;;  %282 = vst.msk [vmem:[#allocation2 + $0x8] sm:$0xff] %vm280_vm3, %v1595_v31 }
  0x25   : > { %1404 = vmatpush3.bf16.msra.mxu0 %v1531_v24  ;;  %v1341_v24 = vcombine.low %v690_v20, %v690_v20  ;;  %v970_v54 = vrot.slane %v1360_v48, 2  ;;  %v967_v58 = vrot.slane %v1359_v52, 2 }
  0x26   : > { %1405 = vmatprep.subr.bf16.mxu0 %v1533_v26  ;;  %v757_v26 = vshrl.u32 %v1340_v21, 16  ;;  %v762_v37 = vrot.slane %v760_v27, 2  ;;  %v767_v41 = vrot.slane %v765_v30, 1 }
  0x27   : > { %1426 = vmatpush3.bf16.msra.mxu1 %v1536_v29  ;;  %v743_v29 = vshll.u32 %v1339_v22, 16 }
  0x28   : > { %1427 = vmatprep.subr.bf16.mxu1 %v1539_v33  ;;  %v748_v33 = vshrl.u32 %v1341_v24, 16 }
  0x29   : > { %1406 = vmatpush3.bf16.msra.mxu0 %v1535_v28  ;;  %v740_v28 = vshrl.u32 %v1339_v22, 16  ;;  %v745_v39 = vrot.slane %v743_v29, 2 }
  0x2a   : > { %1435 = vmatprep.subr.bf16.mxu0 %v1540_v35  ;;  %v1578_v35 = vld [vmem:[%s1913_s1 + $0x180] sm:$0xff]   ;;  %v750_v43 = vrot.slane %v748_v33, 1 }
  0x2b   : > { %1428 = vmatpush3.bf16.msra.mxu1 %v1541_v36  ;;  %v759_v36 = vrot.slane %v757_v26, 1 }
  0x2c   : > { %458 = vmatmul.mubr.bf16.vlgmr.msra.gmra.mxu0 %v1301_v34  ;;  %1457 = vmatprep.subr.bf16.mxu1 %v1545_v46  ;;  %v751_v34 = vshll.u32 %v1341_v24, 16 }
  0x2d   : > { %1436 = vmatpush3.bf16.msra.mxu0 %v1542_v38  ;;  %v742_v38 = vrot.slane %v740_v28, 1  ;;  %v763_v46 = vor.u32 %v762_v37, %v759_v36 }
  0x2e   : > { %1437 = vmatprep.subr.bf16.mxu0 %v1544_v42  ;;  %676 = vmatmul.mubr.bf16.vlgmr.msra.gmra.mxu1 %v532_v61  ;;  %v770_v42 = vrot.slane %v768_v32, 2  ;;  %v753_v44 = vrot.slane %v751_v34, 2 }
  0x2f   : > { %1458 = vmatpush3.bf16.msra.mxu1 %v1548_v55  ;;  %v746_v47 = vor.u32 %v745_v39, %v742_v38  ;;  %v971_v55 = vrot.slane %v1362_v49, 2 }
  0x30   : > { %1459 = vmatprep.subr.bf16.mxu1 %v1550_v59  ;;  %v754_v51 = vor.u32 %v753_v44, %v750_v43  ;;  %v968_v59 = vrot.slane %v1361_v53, 2  ;;  %v1379_v43 = vld [vmem:[%s1914_s2] ss:$0 sm:$0xff] }
  0x31   : > { %1438 = vmatpush3.bf16.msra.mxu0 %v1547_v50  ;;  %v771_v50 = vor.u32 %v770_v42, %v767_v41 }
  0x32   : > { %1439 = vmatprep.subr.bf16.mxu0 %v1549_v56  ;;  %v755_v57 = vsel %vm738_vm1, %v746_v47, %v754_v51  ;;  %v969_v61 = vsel %vm966_vm2, %v967_v58, %v968_v59 }
  0x33   : > { %1460 = vmatpush3.bf16.msra.mxu1 %v1552_v62  ;;  %v772_v56 = vsel %vm738_vm1, %v763_v46, %v771_v50  ;;  %v1583_v62 = vld [vmem:[%s1916_s4 + $0x18] sm:$0xff]   ;;  %v1380_v46 = vld [vmem:[%s1915_s3] ss:$0 sm:$0xff] }
  0x34   : > { %1461 = vmatprep.subr.bf16.mxu1 %v1554_v0  ;;  %903 = vmatprep.mubr.bf16.mxu0 %v772_v56  ;;  %v1585_v0 = vld [vmem:[%s1916_s4 + $0x8] sm:$0xff]   ;;  %v1387_v56 = vld [vmem:[%s1918_s6] ss:$0 sm:$0xff] }
  0x35   : > { %1440 = vmatpush3.bf16.msra.mxu0 %v1551_v60  ;;  %v972_v60 = vsel %vm966_vm2, %v970_v54, %v971_v55  ;;  %v1386_v54 = vld [vmem:[%s1917_s5] ss:$0 sm:$0xff] }
  0x36   : > { %1441 = vmatprep.subr.bf16.mxu0 %v1553_v63  ;;  %1103 = vmatprep.mubr.bf16.mxu1 %v972_v60  ;;  %v1584_v63 = vld [vmem:[%s1916_s4 + $0x10] sm:$0xff]  }
  0x37   : > { %1462 = vmatpush3.bf16.msra.mxu1 %v1556_v2 }
  0x38   : > { %1463 = vmatprep.subr.bf16.mxu1 %v1558_v4 }
  0x39   : > { %1442 = vmatpush3.bf16.msra.mxu0 %v1555_v1  ;;  %v1586_v1 = vld [vmem:[%s1916_s4] sm:$0xff]  }
  0x3a   : > { %1443 = vmatprep.subr.bf16.mxu0 %v1557_v3  ;;  %v285_v3 = vld [vmem:[#allocation2] sm:$0xff] }
  0x3b   : > { %1464 = vmatpush3.bf16.msra.mxu1 %v1560_v6 }
  0x3c   : > { %1465 = vmatprep.subr.bf16.mxu1 %v1562_v8  ;;  %v286_v8 = vld [vmem:[#allocation2 + $0x8] sm:$0xff] }
  0x3d   : > { %1444 = vmatpush3.bf16.msra.mxu0 %v1559_v5 }
  0x3e   : > { %1445 = vmatprep.subr.bf16.mxu0 %v1561_v7 }
  0x3f   : > { %1466 = vmatpush3.bf16.msra.mxu1 %v1564_v10 }
  0x40   : > { %1467 = vmatprep.subr.bf16.mxu1 %v1566_v12 }
  0x41   : > { %1446 = vmatpush3.bf16.msra.mxu0 %v1563_v9 }
  0x42   : > { %1447 = vmatprep.subr.bf16.mxu0 %v1565_v11 }
  0x43   : > { %1468 = vmatpush3.bf16.msra.mxu1 %v1568_v14 }
  0x44   : > { %1469 = vmatprep.subr.bf16.mxu1 %v1570_v16 }
  0x45   : > { %1448 = vmatpush3.bf16.msra.mxu0 %v1567_v13 }
  0x46   : > { %1449 = vmatprep.subr.bf16.mxu0 %v1569_v15 }
  0x47   : > { %1470 = vmatpush3.bf16.msra.mxu1 %v1572_v18 }
  0x48   : > { %1471 = vmatprep.subr.bf16.mxu1 %v1577_v25 }
  0x49   : > { %1450 = vmatpush3.bf16.msra.mxu0 %v1571_v17 }
  0x4a   : > { %1484 = vmatprep.subr.bf16.mxu0 %v1595_v31 }
  0x4b   : > { %1472 = vmatpush3.bf16.msra.mxu1 %v1578_v35 }
  0x4c   : > { %904 = vmatmul.mubr.bf16.vlgmr.msra.gmra.mxu0 %v755_v57 }
  0x4d   : > { %1485 = vmatpush3.bf16.msra.mxu0 %v1583_v62  ;;  %1492 = vmatprep.mubr.msk.bf16.mxu0 %vm1596_vm4, %v1595_v31 }
  0x4e   : > { %1104 = vmatmul.mubr.bf16.vlgmr.msra.gmra.mxu1 %v969_v61  ;;  %1486 = vmatprep.subr.bf16.mxu0 %v1595_v31 }
  0x51   : > { %1487 = vmatpush3.bf16.msra.mxu0 %v1584_v63 }
  0x52   : > { %1488 = vmatprep.subr.bf16.mxu0 %v1595_v31 }
  0x55   : > { %1489 = vmatpush3.bf16.msra.mxu0 %v1585_v0 }
  0x56   : > { %1490 = vmatprep.subr.bf16.mxu0 %v1595_v31 }
  0x59   : > { %1491 = vmatpush3.bf16.msra.mxu0 %v1586_v1 }
  0xec   : > { %v1407_v2 = vpop.f32.mrf.mxu0 }
  0xee   : > { %v1408_v4 = vpop.f32.mrf.mxu0  ;;  %v1429_v12 = vpop.f32.mrf.mxu1 }
  0xef   : > { %v1409_v5 = vadd.f32 %v1408_v4, %v1407_v2 }
  0xf0   : > { %v1410_v6 = vpop.f32.mrf.mxu0  ;;  %v1430_v13 = vpop.f32.mrf.mxu1 }
  0xf1   : > { %v466_v7 = vadd.f32 %v1409_v5, %v285_v3  ;;  %v1431_v14 = vadd.f32 %v1430_v13, %v1429_v12 }
  0xf2   : > { %v1411_v9 = vpop.f32.mrf.mxu0  ;;  %v1432_v16 = vpop.f32.mrf.mxu1 }
  0xf3   : > { %468 = vst.msk [vmem:[#allocation2] sm:$0xff] %vm280_vm3, %v466_v7  ;;  %v1412_v10 = vadd.f32 %v1411_v9, %v1410_v6 }
  0xf4   : > { %v1433_v18 = vpop.f32.mrf.mxu1 }
  0xf5   : > { %v467_v11 = vadd.f32 %v1412_v10, %v286_v8  ;;  %v1434_v19 = vadd.f32 %v1433_v18, %v1432_v16 }
  0xf7   : > { %469 = vst.msk [vmem:[#allocation2 + $0x8] sm:$0xff] %vm280_vm3, %v467_v11 }
  0xfa   : > { %v473_v15 = vld [vmem:[#allocation2] sm:$0xff] }
  0xfb   : > { %v684_v17 = vadd.f32 %v1431_v14, %v473_v15 }
  0xfd   : > { %686 = vst.msk [vmem:[#allocation2] sm:$0xff] %vm280_vm3, %v684_v17 }
  0xfe   : > { %v474_v20 = vld [vmem:[#allocation2 + $0x8] sm:$0xff] }
  0xff   : > { %v685_v21 = vadd.f32 %v1434_v19, %v474_v20 }
 0x101   : > { %687 = vst.msk [vmem:[#allocation2 + $0x8] sm:$0xff] %vm280_vm3, %v685_v21 }
 0x104   : > { %v691_v26 = vld [vmem:[#allocation2] sm:$0xff] }
 0x108   : > { %v692_v33 = vld [vmem:[#allocation2 + $0x8] sm:$0xff] }
 0x10c   : > { %v1451_v22 = vpop.f32.mrf.mxu0 }
 0x10e   : > { %v1452_v23 = vpop.f32.mrf.mxu0  ;;  %v1473_v24 = vpop.f32.mrf.mxu1 }
 0x10f   : > { %v1453_v25 = vadd.f32 %v1452_v23, %v1451_v22 }
 0x110   : > { %v1454_v27 = vpop.f32.mrf.mxu0  ;;  %v1474_v30 = vpop.f32.mrf.mxu1 }
 0x111   : > { %v912_v28 = vadd.f32 %v1453_v25, %v691_v26  ;;  %v1475_v36 = vadd.f32 %v1474_v30, %v1473_v24 }
 0x112   : > { %v1455_v29 = vpop.f32.mrf.mxu0  ;;  %v1476_v35 = vpop.f32.mrf.mxu1 }
 0x113   : > { %914 = vst.msk [vmem:[#allocation2] sm:$0xff] %vm280_vm3, %v912_v28  ;;  %v1456_v32 = vadd.f32 %v1455_v29, %v1454_v27 }
 0x114   : > { %v1477_v38 = vpop.f32.mrf.mxu1 }
 0x115   : > { %v913_v34 = vadd.f32 %v1456_v32, %v692_v33  ;;  %v1478_v40 = vadd.f32 %v1477_v38, %v1476_v35 }
 0x117   : > { %915 = vst.msk [vmem:[#allocation2 + $0x8] sm:$0xff] %vm280_vm3, %v913_v34 }
 0x11a   : > { %v919_v37 = vld [vmem:[#allocation2] sm:$0xff] }
 0x11b   : > { %v1112_v39 = vadd.f32 %v1475_v36, %v919_v37 }
 0x11d   : > { %1114 = vst.msk [vmem:[#allocation2] sm:$0xff] %vm280_vm3, %v1112_v39 }
 0x11e   : > { %v920_v41 = vld [vmem:[#allocation2 + $0x8] sm:$0xff] }
 0x11f   : > { %v1113_v42 = vadd.f32 %v1478_v40, %v920_v41 }
 0x121   : > { %1115 = vst.msk [vmem:[#allocation2 + $0x8] sm:$0xff] %vm280_vm3, %v1113_v42 }
 0x124   : > { %v1116_v44 = vld [vmem:[#allocation2] sm:$0xff] }
 0x125   : > { %v1125_v45 = vmul.f32 %v1379_v43, %v1116_v44 }
 0x127   : > { %v1134_v49 = vadd.f32 %v1380_v46, %v1125_v45 }
 0x128   : > { %v1117_v47 = vld [vmem:[#allocation2 + $0x8] sm:$0xff] }
 0x129   : > { %v1126_v48 = vmul.f32 %v1379_v43, %v1117_v47  ;;  %v1136_v51 = vmax.f32 %v1134_v49, 0.0 }
 0x12b   : > { %v1135_v50 = vadd.f32 %v1380_v46, %v1126_v48 }
 0x12d   : > { %v1137_v52 = vmax.f32 %v1135_v50, 0.0 }
 0x12f   : > { %v1138_v53 = vpack.c.bf16 %v1137_v52, %v1136_v51 }
 0x131   : > { %1493 = vmatmul.mubr.msk.bf16.vlgmr.msra.gmra.mxu0 %vm280_vm3, %v1138_v53 }
 0x1f1   : > { %v1208_v55 = vpop.f32.mrf.mxu0 }
 0x1f2   : > { %v1222_v57 = vmul.f32 %v1386_v54, %v1208_v55 }
 0x1f3   : > { %v1494_v58 = vpop.f32.mrf.mxu0 }
 0x1f4   : > { %v1231_v59 = vadd.f32 %v1387_v56, %v1222_v57 }
 0x1f5   : > { %v1211_v60 = vpop.f32.mrf.mxu0 }
 0x1f6   : > { %v1233_v61 = vmax.f32 %v1231_v59, 0.0  ;;  %v1223_v31 = vmul.f32 %v1386_v54, %v1211_v60 }
 0x1f7   : > { %v1495_v62 = vpop.f32.mrf.mxu0 }
 0x1f8   : > { %1236 = vst.msk [vmem:[%s278_s10] sm:$0xff] %vm1235_vm5, %v1233_v61  ;;  %v1232_v63 = vadd.f32 %v1387_v56, %v1223_v31 }
 0x1fa   : > { %v1234_v0 = vmax.f32 %v1232_v63, 0.0 }
 0x1fc   : > { %1237 = vst.msk [vmem:[%s278_s10 + $0x8] sm:$0xff] %vm1235_vm5, %v1234_v0 }
 0x1fd PF: > { %s17_s24 = sadd.s32 1, %s1593_s24  }
 0x1fe   : > { %p14_p4 = scmp.ge.s32.totalorder %s17_s24, 4  }
 0x200   :  { %16 = sbr.rel (!%p14_p4) target bundleno = 1 (0x1), region = 78 }

// kernel: spatial_path_forward.3
= control target key start
LH: loop header
LB: loop body
LE: loop exit
PB: predicated region body
PF: predicated region fallthrough
CT: control target
= control target key end

     0   :  { %s4722_s15 = smov 0   ;;  %s5407_s0 = inlined_call_operand.vmem [shape: bf16[2,132,16], index: 0, kind: input, shape index: {}]   ;;  %s5408_s1 = inlined_call_operand.vmem [shape: bf16[256,64], index: 1, kind: input, shape index: {}]   ;;  %s5409_s2 = inlined_call_operand.vmem [shape: f32[1,64], index: 2, kind: input, shape index: {}]   ;;  %s5410_s3 = inlined_call_operand.vmem [shape: f32[1,64], index: 3, kind: input, shape index: {}]   ;;  %s5411_s4 = inlined_call_operand.vmem [shape: bf16[2,96,64], index: 4, kind: output, shape index: {}]  }
   0x1 LB: > { %s3958_s16 = sadd.s32 4294967295, %s4694_s15   ;;  %p3962_p0 = scmp.ge.s32.totalorder %s4694_s15, 1  ;;  %s4694_s15 = sphi %s4722_s15, %s14_s15  }
   0x2   : > { %p162_p1 = scmp.lt.s32.totalorder %s4694_s15, 3 }
   0x4   : > { %p163_p2 = pnand %p3962_p0, %p162_p1 }
   0x5   : > { %p188_p3 = scmp.lt.s32.totalorder (!%p163_p2), %s3958_s16, 1 }
   0x6   : > { %166 = sbr.rel (%p163_p2) target bundleno = 430 (0x1ae), region = 36 }
   0xb   : > { %v4562_v0 = vld [vmem:[%s5408_s1] sm:$0xff]   ;;  %v4564_v1 = vld [vmem:[%s5408_s1 + $0x10] sm:$0xff]   ;;  %s5413_s16 = smov (!%p188_p3, %s3958_s16), 1  ;;  %v4566_v2 = vld [vmem:[%s5408_s1 + $0x8] sm:$0xff]   ;;  %vm274_vm0 = vcmask 130048   ;;  %vm700_vm2 = vcmask 1046528  }
   0xc   : > { %4327 = vmatprep.subr.bf16.mxu0 %v4562_v0  ;;  %s4551_s23 = smul.u32 68, %s5413_s16  ;;  %4341 = vmatprep.subr.bf16.mxu1 %v4566_v2  ;;  %v4572_v3 = vld [vmem:[%s5408_s1 + $0x18] sm:$0xff]   ;;  %v4753_v4 = vld [vmem:[%s5408_s1 + $0x20] sm:$0xff]   ;;  %vm458_vm1 = vsmask.f32 7424  ;;  %v4771_v25 = vld [vmem:[%s5408_s1 + $0x28] sm:$0xff]  }
   0xd   : > { %4328 = vmatpush3.bf16.msra.mxu0 %v4562_v0  ;;  %4342 = vmatpush3.bf16.msra.mxu1 %v4566_v2  ;;  %vm903_vm3 = vsmask.f32 6400  ;;  %vm1406_vm4 = vcmask 1045504   ;;  %vm1609_vm5 = vsmask.f32 5376  ;;  %vm1861_vm6 = vcmask 1044480  }
   0xe   : > { %4355 = vmatprep.subr.bf16.mxu0 %v4564_v1  ;;  %s4748_s28 = scalar_lea.vmem %s5407_s0, %s4551_s23  ;;  %4369 = vmatprep.subr.bf16.mxu1 %v4572_v3  ;;  %vm199_vm7 = vcmask 523264   ;;  %vm2266_vm8 = vsmask.f32 4352  ;;  %s4552_s7 = smul.u32 48, %s5413_s16  ;;  %vm3890_vm9 = vcmask 519168  }
   0xf   : > { %v4563_v5 = vld [vmem:[%s4748_s28] sm:$0xff]   ;;  %v4565_v6 = vld [vmem:[%s4748_s28 + $0x8] sm:$0xff]   ;;  %v4569_v9 = vld [vmem:[%s4748_s28 + $0x10] sm:$0xff]  }
  0x10   : > { %4329 = vmatprep.mubr.msk.bf16.mxu0 %vm274_vm0, %v4563_v5  ;;  %v4567_v7 = vld [vmem:[%s4748_s28] sm:$0xff]   ;;  %v4568_v8 = vld [vmem:[%s4748_s28 + $0x8] sm:$0xff]   ;;  %v4570_v14 = vld [vmem:[%s4748_s28 + $0x10] sm:$0xff]   ;;  %s5354_s9 = scalar_lea.vmem %s5411_s4, %s4552_s7 }
  0x11   : > { %4330 = vmatmul.mubr.msk.bf16.vlgmr.msra.gmra.mxu0 %vm274_vm0, %v4565_v6  ;;  %v460_v10 = vshrl.u32 %v4567_v7, 16  ;;  %v462_v11 = vshll.u32 %v4567_v7, 16  ;;  %v467_v12 = vshll.u32 %v4568_v8, 16  ;;  %v471_v13 = vshrl.u32 %v4568_v8, 16  ;;  %v4571_v17 = vld [vmem:[%s4748_s28 + $0x18] sm:$0xff]   ;;  %v4574_v24 = vld [vmem:[%s4748_s28 + $0x20] sm:$0xff]  }
  0x12   : > { %4356 = vmatpush3.bf16.msra.mxu0 %v4564_v1  ;;  %4333 = vmatprep.mubr.msk.bf16.mxu0 %vm274_vm0, %v4569_v9  ;;  %v4573_v18 = vld [vmem:[%s4748_s28 + $0x18] sm:$0xff]   ;;  %v475_v19 = vshll.u32 %v4570_v14, 16  ;;  %v479_v20 = vshrl.u32 %v4570_v14, 16  ;;  %v4575_v27 = vld [vmem:[%s4748_s28 + $0x20] sm:$0xff]   ;;  %v4576_v34 = vld [vmem:[%s4748_s28 + $0x28] sm:$0xff]  }
  0x13   : > { %4383 = vmatprep.subr.bf16.mxu0 %v4753_v4  ;;  %v464_v15 = vrot.slane %v462_v11, 1  ;;  %v469_v16 = vrot.slane %v467_v12, 1  ;;  %v483_v23 = vshll.u32 %v4573_v18, 16  ;;  %v487_v30 = vshrl.u32 %v4573_v18, 16  ;;  %v4577_v35 = vld [vmem:[%s4748_s28 + $0x28] sm:$0xff]   ;;  %v4582_v48 = vld [vmem:[%s4748_s28 + $0x10] sm:$0xff]  }
  0x14   : > { %v477_v26 = vrot.slane %v475_v19, 1  ;;  %v491_v33 = vshll.u32 %v4575_v27, 16  ;;  %v495_v36 = vshrl.u32 %v4575_v27, 16  ;;  %v4578_v40 = vld [vmem:[%s4748_s28 + $0x30] ss:$0 sps:$4 sm:$0x11]  }
  0x15   : > { %v465_v21 = vor.u32 %v464_v15, %v460_v10  ;;  %v473_v22 = vor.u32 %v471_v13, %v469_v16  ;;  %v485_v29 = vrot.slane %v483_v23, 1  ;;  %v499_v41 = vshll.u32 %v4577_v35, 16  ;;  %v4579_v45 = vld [vmem:[%s4748_s28] sm:$0xfe]   ;;  %v4580_v46 = vld [vmem:[%s4748_s28 + $0x8] sm:$0xff]   ;;  %v4585_v56 = vld [vmem:[%s4748_s28 + $0x18] sm:$0xff]  }
  0x16   : > { %v481_v32 = vor.u32 %v479_v20, %v477_v26  ;;  %v493_v39 = vrot.slane %v491_v33, 1  ;;  %v503_v42 = vshrl.u32 %v4577_v35, 16  ;;  %v507_v44 = vshll.u32 %v4578_v40, 16  ;;  %v4584_v53 = vld [vmem:[%s4748_s28 + $0x8] sm:$0xff]   ;;  %v4583_v58 = vld [vmem:[%s4748_s28] sm:$0xfe]  }
  0x17   : > { %v470_v28 = vsel %vm458_vm1, %v465_v21, %v469_v16  ;;  %v478_v31 = vsel %vm458_vm1, %v473_v22, %v477_v26  ;;  %v489_v38 = vor.u32 %v487_v30, %v485_v29  ;;  %v501_v47 = vrot.slane %v499_v41, 1  ;;  %v4586_v63 = vld [vmem:[%s4748_s28 + $0x10] sm:$0xff]   ;;  %v4587_v11 = vld [vmem:[%s4748_s28 + $0x20] sm:$0xff]   ;;  %v4589_v12 = vld [vmem:[%s4748_s28 + $0x18] sm:$0xff]  }
  0x18   : > { %4343 = vmatprep.mubr.msk.bf16.mxu1 %vm274_vm0, %v470_v28  ;;  %v486_v37 = vsel %vm458_vm1, %v481_v32, %v485_v29  ;;  %v497_v43 = vor.u32 %v495_v36, %v493_v39  ;;  %v509_v50 = vrot.slane %v507_v44, 1  ;;  %v701_v51 = vrot.slane %v4579_v45, 1  ;;  %v4590_v20 = vld [vmem:[%s4748_s28 + $0x28] sm:$0xff]   ;;  %v4591_v22 = vld [vmem:[%s4748_s28 + $0x20] sm:$0xff]  }
  0x19   : > { %4334 = vmatmul.mubr.msk.bf16.gmra.mxu0 %vm274_vm0, %v4571_v17  ;;  %4344 = vmatmul.mubr.msk.bf16.vlgmr.msra.gmra.mxu1 %vm274_vm0, %v478_v31  ;;  %v494_v49 = vsel %vm458_vm1, %v489_v38, %v493_v39  ;;  %v702_v52 = vrot.slane %v4580_v46, 1  ;;  %v704_v55 = vrot.slane %v4582_v48, 1  ;;  %v913_v59 = vshrl.u32 %v4584_v53, 16  ;;  %v4592_v30 = vld [vmem:[%s4748_s28 + $0x30] ss:$0 sps:$4 sm:$0x11]  }
  0x1a   : > { %4337 = vmatprep.mubr.msk.bf16.mxu0 %vm274_vm0, %v4574_v24  ;;  %4370 = vmatpush3.bf16.msra.mxu1 %v4572_v3  ;;  %v502_v54 = vsel %vm458_vm1, %v497_v43, %v501_v47  ;;  %v916_v60 = vshll.u32 %v4584_v53, 16  ;;  %v505_v61 = vor.u32 %v503_v42, %v501_v47  ;;  %v706_v62 = vrot.slane %v4585_v56, 1  ;;  %v4593_v32 = vld [vmem:[%s4748_s28 + $0x28] sm:$0xff]   ;;  %v4824_v46 = vld [vmem:[%s5408_s1 + $0x30] sm:$0xff]  }
  0x1b   : > { %4347 = vmatprep.mubr.msk.bf16.mxu1 %vm274_vm0, %v486_v37  ;;  %4397 = vmatprep.subr.bf16.mxu1 %v4771_v25  ;;  %v703_v57 = vsel %vm700_vm2, %v701_v51, %v702_v52  ;;  %v905_v0 = vshrl.u32 %v4583_v58, 16  ;;  %v908_v1 = vshll.u32 %v4583_v58, 16  ;;  %v915_v2 = vrot.slane %v913_v59, 1  ;;  %v4595_v44 = vld [vmem:[%s4748_s28 + $0x4] sm:$0xfe]   ;;  %v4596_v45 = vld [vmem:[%s4748_s28 + $0xc] sm:$0xff]  }
  0x1c   : > { %v918_v3 = vrot.slane %v916_v60, 2  ;;  %v922_v5 = vshrl.u32 %v4586_v63, 16  ;;  %v925_v6 = vshll.u32 %v4586_v63, 16  ;;  %v705_v7 = vsel %vm700_vm2, %v702_v52, %v704_v55  ;;  %v4598_v53 = vld [vmem:[%s4748_s28 + $0x14] sm:$0xff]   ;;  %v4601_v60 = vld [vmem:[%s4748_s28 + $0x1c] sm:$0xff]  }
  0x1d   : > { %v907_v8 = vrot.slane %v905_v0, 1  ;;  %v910_v9 = vrot.slane %v908_v1, 2  ;;  %v510_v13 = vsel %vm458_vm1, %v505_v61, %v509_v50  ;;  %v707_v14 = vsel %vm700_vm2, %v704_v55, %v706_v62 }
  0x1e   : > { %v919_v10 = vor.u32 %v918_v3, %v915_v2  ;;  %v924_v15 = vrot.slane %v922_v5, 1  ;;  %v927_v17 = vrot.slane %v925_v6, 2  ;;  %v931_v18 = vshrl.u32 %v4589_v12, 16  ;;  %v4599_v5 = vld [vmem:[%s4748_s28 + $0x4] sm:$0xfc]  }
  0x1f   : > { %v911_v16 = vor.u32 %v910_v9, %v907_v8  ;;  %v934_v19 = vshll.u32 %v4589_v12, 16  ;;  %v708_v21 = vrot.slane %v4587_v11, 1  ;;  %v710_v27 = vrot.slane %v4590_v20, 1  ;;  %v4600_v12 = vld [vmem:[%s4748_s28 + $0xc] sm:$0xff]  }
  0x20   : > { %v933_v24 = vrot.slane %v931_v18, 1  ;;  %v940_v28 = vshrl.u32 %v4591_v22, 16  ;;  %v943_v29 = vshll.u32 %v4591_v22, 16  ;;  %v928_v31 = vor.u32 %v927_v17, %v924_v15 }
  0x21   : > { %4338 = vmatmul.mubr.msk.bf16.gmra.mxu0 %vm274_vm0, %v4576_v34  ;;  %4348 = vmatmul.mubr.msk.bf16.gmra.mxu1 %vm274_vm0, %v494_v49  ;;  %v920_v23 = vsel %vm903_vm3, %v911_v16, %v919_v10  ;;  %v936_v26 = vrot.slane %v934_v19, 2  ;;  %v4594_v34 = vld [vmem:[%s4748_s28 + $0x30] ss:$0 sps:$4 sm:$0x33]   ;;  %v709_v35 = vsel %vm700_vm2, %v706_v62, %v708_v21  ;;  %v949_v36 = vshrl.u32 %v4593_v32, 16 }
  0x22   : > { %4357 = vmatprep.mubr.msk.bf16.mxu0 %vm274_vm0, %v703_v57  ;;  %4351 = vmatprep.mubr.msk.bf16.mxu1 %vm274_vm0, %v502_v54  ;;  %v952_v37 = vshll.u32 %v4593_v32, 16  ;;  %v711_v38 = vsel %vm700_vm2, %v708_v21, %v710_v27  ;;  %v945_v39 = vrot.slane %v943_v29, 2  ;;  %v958_v40 = vshrl.u32 %v4594_v34, 16  ;;  %v4848_v21 = vld [vmem:[%s5408_s1 + $0x38] sm:$0xff]  }
  0x23   : > { %v937_v33 = vor.u32 %v936_v26, %v933_v24  ;;  %v929_v41 = vsel %vm903_vm3, %v919_v10, %v928_v31  ;;  %v712_v42 = vrot.slane %v4592_v30, 1  ;;  %v961_v43 = vshll.u32 %v4594_v34, 16  ;;  %v4603_v10 = vld [vmem:[%s4748_s28 + $0x24] sm:$0xff]   ;;  %v4606_v26 = vld [vmem:[%s4748_s28 + $0x2c] sm:$0xff]  }
  0x24   : > { %v951_v48 = vrot.slane %v949_v36, 1  ;;  %v954_v49 = vrot.slane %v952_v37, 2  ;;  %v1156_v50 = vshrl.u32 %v4595_v44, 16  ;;  %v1159_v51 = vshll.u32 %v4595_v44, 16 }
  0x25   : > { %v938_v47 = vsel %vm903_vm3, %v928_v31, %v937_v33  ;;  %v1164_v52 = vshrl.u32 %v4596_v45, 16  ;;  %v960_v54 = vrot.slane %v958_v40, 1  ;;  %v1167_v55 = vshll.u32 %v4596_v45, 16  ;;  %v4608_v34 = vld [vmem:[%s4748_s28 + $0x34] ss:$0 sps:$4 sm:$0x33]  }
  0x26   : > { %v1158_v57 = vrot.slane %v1156_v50, 1  ;;  %v1161_v58 = vrot.slane %v1159_v51, 2  ;;  %v955_v61 = vor.u32 %v954_v49, %v951_v48  ;;  %v1173_v63 = vshrl.u32 %v4598_v53, 16  ;;  %v4611_v49 = vld [vmem:[%s4748_s28 + $0x4] sm:$0xfc]  }
  0x27   : > { %v1166_v59 = vrot.slane %v1164_v52, 1  ;;  %v1169_v62 = vrot.slane %v1167_v55, 2  ;;  %v1176_v0 = vshll.u32 %v4598_v53, 16  ;;  %v713_v1 = vsel %vm700_vm2, %v710_v27, %v712_v42  ;;  %v4612_v42 = vld [vmem:[%s4748_s28 + $0xc] sm:$0xff]  }
  0x28   : > { %v963_v2 = vrot.slane %v961_v43, 2  ;;  %v1162_v3 = vor.u32 %v1161_v58, %v1158_v57  ;;  %v1182_v6 = vshrl.u32 %v4601_v60, 16  ;;  %v1185_v9 = vshll.u32 %v4601_v60, 16 }
  0x29   : > { %4358 = vmatmul.mubr.msk.bf16.vlgmr.msra.gmra.mxu0 %vm274_vm0, %v705_v7  ;;  %4352 = vmatmul.mubr.msk.bf16.gmra.mxu1 %vm274_vm0, %v510_v13  ;;  %v1175_v7 = vrot.slane %v1173_v63, 1  ;;  %v1178_v8 = vrot.slane %v1176_v0, 2  ;;  %v1191_v18 = vshrl.u32 %v4603_v10, 16  ;;  %v1194_v19 = vshll.u32 %v4603_v10, 16  ;;  %v4609_v0 = vld [vmem:[%s4748_s28 + $0x2c] sm:$0xff]  }
  0x2a   : > { %4384 = vmatpush3.bf16.msra.mxu0 %v4753_v4  ;;  %4361 = vmatprep.mubr.msk.bf16.mxu0 %vm274_vm0, %v707_v14  ;;  %v942_v4 = vrot.slane %v940_v28, 1  ;;  %v1184_v13 = vrot.slane %v1182_v6, 1  ;;  %v1187_v17 = vrot.slane %v1185_v9, 2  ;;  %v964_v22 = vor.u32 %v963_v2, %v960_v54  ;;  %v4602_v28 = vld [vmem:[%s4748_s28 + $0x14] sm:$0xff]   ;;  %v4617_v2 = vld [vmem:[%s4748_s28 + $0x1c] sm:$0xff]  }
  0x2b   : > { %4371 = vmatprep.mubr.msk.bf16.mxu1 %vm274_vm0, %v920_v23  ;;  %4411 = vmatprep.subr.bf16.mxu0 %v4824_v46  ;;  %v1179_v16 = vor.u32 %v1178_v8, %v1175_v7  ;;  %v1407_v23 = vrot.slane %v4599_v5, 2  ;;  %v1408_v24 = vrot.slane %v4600_v12, 2  ;;  %v1193_v29 = vrot.slane %v1191_v18, 1  ;;  %v4619_v12 = vld [vmem:[%s4748_s28 + $0x24] sm:$0xff]  }
  0x2c   : > { %v946_v56 = vor.u32 %v945_v39, %v942_v4  ;;  %v1188_v20 = vor.u32 %v1187_v17, %v1184_v13  ;;  %v1196_v30 = vrot.slane %v1194_v19, 2  ;;  %v1200_v31 = vshrl.u32 %v4606_v26, 16  ;;  %v4857_v4 = vld [vmem:[%s4748_s28 + $0x1c] sm:$0xff]  }
  0x2d   : > { %v1203_v32 = vshll.u32 %v4606_v26, 16  ;;  %v1209_v39 = vshrl.u32 %v4608_v34, 16  ;;  %v1410_v43 = vrot.slane %v4602_v28, 2  ;;  %v1412_v44 = vrot.slane %v4857_v4, 2 }
  0x2e   : > { %v947_v11 = vsel %vm903_vm3, %v937_v33, %v946_v56  ;;  %v956_v14 = vsel %vm903_vm3, %v946_v56, %v955_v61  ;;  %v1189_v33 = vsel %vm903_vm3, %v1179_v16, %v1188_v20  ;;  %v1202_v36 = vrot.slane %v1200_v31, 1  ;;  %v4614_v56 = vld [vmem:[%s4748_s28 + $0x14] sm:$0xff]  }
  0x2f   : > { %v1205_v37 = vrot.slane %v1203_v32, 2  ;;  %v1197_v40 = vor.u32 %v1196_v30, %v1193_v29  ;;  %v1211_v48 = vrot.slane %v1209_v39, 1  ;;  %v1619_v50 = vshrl.u32 %v4612_v42, 16  ;;  %v4618_v39 = vld [vmem:[%s4748_s28 + $0x14] sm:$0xff]  }
  0x30   : > { %v1622_v51 = vshll.u32 %v4612_v42, 16  ;;  %v1611_v54 = vshrl.u32 %v4611_v49, 16  ;;  %v1614_v55 = vshll.u32 %v4611_v49, 16  ;;  %v1411_v60 = vsel %vm1406_vm4, %v1408_v24, %v1410_v43  ;;  %v4915_v42 = vld [vmem:[%s5408_s1 + $0x50] sm:$0xff]  }
  0x31   : > { %4362 = vmatmul.mubr.msk.bf16.gmra.mxu0 %vm274_vm0, %v709_v35  ;;  %4372 = vmatmul.mubr.msk.bf16.vlgmr.msra.gmra.mxu1 %vm274_vm0, %v929_v41  ;;  %v965_v35 = vsel %vm903_vm3, %v955_v61, %v964_v22  ;;  %v1212_v41 = vshll.u32 %v4608_v34, 16  ;;  %v1206_v45 = vor.u32 %v1205_v37, %v1202_v36  ;;  %v1198_v52 = vsel %vm903_vm3, %v1188_v20, %v1197_v40  ;;  %v4622_v20 = vld [vmem:[%s4748_s28 + $0x2c] sm:$0xff]   ;;  %v4624_v34 = vld [vmem:[%s4748_s28 + $0x34] ss:$0 sps:$4 sm:$0x77]  }
  0x32   : > { %4365 = vmatprep.mubr.msk.bf16.mxu0 %vm274_vm0, %v711_v38  ;;  %4398 = vmatpush3.bf16.msra.mxu1 %v4771_v25  ;;  %v1170_v25 = vor.u32 %v1169_v62, %v1166_v59  ;;  %v1409_v38 = vsel %vm1406_vm4, %v1407_v23, %v1408_v24  ;;  %v1621_v58 = vrot.slane %v1619_v50, 2  ;;  %v1624_v59 = vrot.slane %v1622_v51, 3  ;;  %v4615_v23 = vld [vmem:[%s4748_s28 + $0x4] sm:$0xf8]   ;;  %v4616_v24 = vld [vmem:[%s4748_s28 + $0xc] sm:$0xff]  }
  0x33   : > { %4375 = vmatprep.mubr.msk.bf16.mxu1 %vm274_vm0, %v938_v47  ;;  %4425 = vmatprep.subr.bf16.mxu1 %v4848_v21  ;;  %v4607_v47 = vld [vmem:[%s4748_s28 + $0x24] sm:$0xff]   ;;  %v1214_v53 = vrot.slane %v1212_v41, 2  ;;  %v1207_v57 = vsel %vm903_vm3, %v1197_v40, %v1206_v45  ;;  %v1613_v61 = vrot.slane %v1611_v54, 2  ;;  %v1616_v62 = vrot.slane %v1614_v55, 3 }
  0x34   : > { %v1171_v15 = vsel %vm903_vm3, %v1162_v3, %v1170_v25  ;;  %v1180_v27 = vsel %vm903_vm3, %v1170_v25, %v1179_v16  ;;  %v1413_v63 = vsel %vm1406_vm4, %v1410_v43, %v1412_v44  ;;  %v1414_v3 = vrot.slane %v4607_v47, 2  ;;  %v4895_v16 = vld [vmem:[%s5408_s1 + $0x48] sm:$0xff]  }
  0x35   : > { %v1215_v5 = vor.u32 %v1214_v53, %v1211_v48  ;;  %v1631_v6 = vshll.u32 %v4614_v56, 16  ;;  %v1617_v25 = vor.u32 %v1616_v62, %v1613_v61  ;;  %v1625_v7 = vor.u32 %v1624_v59, %v1621_v58  ;;  %v4631_v59 = vld [vmem:[%s4748_s28 + $0x8] sm:$0xf8]   ;;  %v4632_v62 = vld [vmem:[%s4748_s28 + $0x10] sm:$0xff]  }
  0x36   : > { %v1637_v8 = vshrl.u32 %v4617_v2, 16  ;;  %v1640_v9 = vshll.u32 %v4617_v2, 16  ;;  %v1416_v10 = vrot.slane %v4609_v0, 2  ;;  %v1649_v28 = vshll.u32 %v4619_v12, 16  ;;  %v4936_v61 = vld [vmem:[%s4748_s28 + $0x2c] sm:$0xff]   ;;  %v4944_v0 = vld [vmem:[%s5408_s1 + $0x58] sm:$0xff]  }
  0x37   : > { %v1216_v13 = vsel %vm903_vm3, %v1206_v45, %v1215_v5  ;;  %v1626_v17 = vsel %vm1609_vm5, %v1617_v25, %v1625_v7  ;;  %v1655_v30 = vshrl.u32 %v4622_v20, 16  ;;  %v1658_v31 = vshll.u32 %v4622_v20, 16 }
  0x38   : > { %v1639_v18 = vrot.slane %v1637_v8, 2  ;;  %v1642_v19 = vrot.slane %v1640_v9, 3  ;;  %v1417_v22 = vsel %vm1406_vm4, %v1414_v3, %v1416_v10  ;;  %v1863_v4 = vrot.slane %v4616_v24, 3 }
  0x39   : > { %4366 = vmatmul.mubr.msk.bf16.gmra.mxu0 %vm274_vm0, %v713_v1  ;;  %4376 = vmatmul.mubr.msk.bf16.gmra.mxu1 %vm274_vm0, %v947_v11  ;;  %v1628_v1 = vshrl.u32 %v4614_v56, 16  ;;  %v1651_v37 = vrot.slane %v1649_v28, 3  ;;  %v1657_v40 = vrot.slane %v1655_v30, 2  ;;  %v1660_v41 = vrot.slane %v1658_v31, 3 }
  0x3a   : > { %4385 = vmatprep.mubr.msk.bf16.mxu0 %vm274_vm0, %v1171_v15  ;;  %4379 = vmatprep.mubr.msk.bf16.mxu1 %vm274_vm0, %v956_v14  ;;  %v4610_v14 = vld [vmem:[%s4748_s28 + $0x34] ss:$0 sps:$4 sm:$0x33]   ;;  %v1633_v15 = vrot.slane %v1631_v6, 3  ;;  %v1643_v29 = vor.u32 %v1642_v19, %v1639_v18  ;;  %v1664_v48 = vshrl.u32 %v4624_v34, 16  ;;  %v1667_v49 = vshll.u32 %v4624_v34, 16 }
  0x3b   : > { %v1630_v11 = vrot.slane %v1628_v1, 2  ;;  %v1418_v32 = vrot.slane %v4610_v14, 2  ;;  %v1661_v50 = vor.u32 %v1660_v41, %v1657_v40  ;;  %v1865_v51 = vrot.slane %v4618_v39, 3 }
  0x3c   : > { %v1666_v55 = vrot.slane %v1664_v48, 2  ;;  %v1669_v56 = vrot.slane %v1667_v49, 3  ;;  %v2268_v6 = vshrl.u32 %v4631_v59, 16  ;;  %v2271_v25 = vshll.u32 %v4631_v59, 16  ;;  %v4642_v59 = vld [vmem:[%s4748_s28 + $0x38] ss:$0 sps:$4 sm:$0xff]  }
  0x3d   : > { %v1634_v26 = vor.u32 %v1633_v15, %v1630_v11  ;;  %v1419_v43 = vsel %vm1406_vm4, %v1416_v10, %v1418_v32  ;;  %v1871_v8 = vrot.slane %v4936_v61, 3  ;;  %v2279_v9 = vshll.u32 %v4632_v62, 16  ;;  %v4626_v11 = vld [vmem:[%s4748_s28 + $0x34] ss:$0 sps:$4 sm:$0x77]   ;;  %v4634_v15 = vld [vmem:[%s4748_s28 + $0x18] sm:$0xff]  }
  0x3e   : > { %v1670_v2 = vor.u32 %v1669_v56, %v1666_v55  ;;  %v2273_v18 = vrot.slane %v2271_v25, 4  ;;  %v2288_v28 = vshll.u32 %v4634_v15, 16  ;;  %v2324_v25 = vshll.u32 %v4642_v59, 16 }
  0x40   : > { %v1671_v10 = vsel %vm1609_vm5, %v1661_v50, %v1670_v2  ;;  %v2290_v41 = vrot.slane %v2288_v28, 4  ;;  %v5011_v2 = vld [vmem:[%s5408_s1 + $0x68] sm:$0xff]   ;;  %v5035_v28 = vld [vmem:[%s5408_s1 + $0x70] sm:$0xff]  }
  0x41   : > { %4386 = vmatmul.mubr.msk.bf16.vlgmr.msra.gmra.mxu0 %vm274_vm0, %v1180_v27  ;;  %4380 = vmatmul.mubr.msk.bf16.gmra.mxu1 %vm274_vm0, %v965_v35  ;;  %v1646_v27 = vshrl.u32 %v4619_v12, 16  ;;  %v1635_v35 = vsel %vm1609_vm5, %v1625_v7, %v1634_v26  ;;  %v2276_v7 = vshrl.u32 %v4632_v62, 16  ;;  %v4630_v12 = vld [vmem:[%s4748_s28 + $0x18] sm:$0xff]  }
  0x42   : > { %4412 = vmatpush3.bf16.msra.mxu0 %v4824_v46  ;;  %4389 = vmatprep.mubr.msk.bf16.mxu0 %vm274_vm0, %v1189_v33  ;;  %v4874_v46 = vld [vmem:[%s5408_s1 + $0x40] sm:$0xff]   ;;  %v1862_v33 = vrot.slane %v4615_v23, 3  ;;  %v1873_v23 = vrot.slane %v4626_v11, 3  ;;  %v2067_v24 = vrot.slane %v4630_v12, 3  ;;  %v4643_v11 = vld [vmem:[%s4748_s28 + $0xc] sm:$0xff]  }
  0x43   : > { %4399 = vmatprep.mubr.msk.bf16.mxu1 %vm274_vm0, %v1409_v38  ;;  %4439 = vmatprep.subr.bf16.mxu0 %v4874_v46  ;;  %v1648_v36 = vrot.slane %v1646_v27, 2  ;;  %v1644_v38 = vsel %vm1609_vm5, %v1634_v26, %v1643_v29  ;;  %v2278_v19 = vrot.slane %v2276_v7, 3  ;;  %v2285_v27 = vshrl.u32 %v4634_v15, 16  ;;  %v4647_v7 = vld [vmem:[%s4748_s28 + $0x14] sm:$0xff]  }
  0x44   : > { %v1864_v45 = vsel %vm1861_vm6, %v1862_v33, %v1863_v4  ;;  %v1874_v39 = vsel %vm1861_vm6, %v1871_v8, %v1873_v23  ;;  %v2711_v15 = vshll.u32 %v4647_v7, 16  ;;  %v4648_v23 = vld [vmem:[%s4748_s28 + $0x1c] sm:$0xff]  }
  0x45   : > { %v1652_v47 = vor.u32 %v1651_v37, %v1648_v36  ;;  %v4639_v36 = vld [vmem:[%s4748_s28 + $0x28] sm:$0xff]   ;;  %v2287_v40 = vrot.slane %v2285_v27, 3  ;;  %v4658_v27 = vld [vmem:[%s4748_s28 + $0x10] sm:$0xff]  }
  0x46   : > { %v2303_v49 = vshrl.u32 %v4639_v36, 16 }
  0x47   : > { %v1653_v54 = vsel %vm1609_vm5, %v1643_v29, %v1652_v47  ;;  %v1662_v58 = vsel %vm1609_vm5, %v1652_v47, %v1661_v50  ;;  %v4635_v29 = vld [vmem:[%s4748_s28 + $0x28] sm:$0xff]   ;;  %v2306_v50 = vshll.u32 %v4639_v36, 16  ;;  %v2947_v36 = vshll.u32 %v4658_v27, 16 }
  0x48   : > { %v2071_v48 = vrot.slane %v4635_v29, 3  ;;  %v2305_v56 = vrot.slane %v2303_v49, 3 }
  0x49   : > { %4390 = vmatmul.mubr.msk.bf16.gmra.mxu0 %vm274_vm0, %v1198_v52  ;;  %4400 = vmatmul.mubr.msk.bf16.vlgmr.msra.gmra.mxu1 %vm274_vm0, %v1411_v60  ;;  %v4623_v52 = vld [vmem:[%s4748_s28 + $0x24] sm:$0xff]   ;;  %v1866_v60 = vsel %vm1861_vm6, %v1863_v4, %v1865_v51  ;;  %v4696_v4 = vmov 0.0  }
  0x4a   : > { %4393 = vmatprep.mubr.msk.bf16.mxu0 %vm274_vm0, %v1207_v57  ;;  %4426 = vmatpush3.bf16.msra.mxu1 %v4848_v21  ;;  %v1415_v21 = vsel %vm1406_vm4, %v1412_v44, %v1414_v3  ;;  %v4621_v44 = vld [vmem:[%s4748_s28 + $0x1c] sm:$0xff]   ;;  %v4627_v57 = vld [vmem:[%s4748_s28 + $0x8] sm:$0xf8]   ;;  %v1869_v1 = vrot.slane %v4623_v52, 3  ;;  %202 = vst.msk [vmem:[#allocation2 + $0x10] sm:$0xff] %vm199_vm7, %v4696_v4  ;;  %200 = vst.msk [vmem:[#allocation2] sm:$0xff] %vm199_vm7, %v4696_v4  ;;  %v2291_v52 = vor.u32 %v2290_v41, %v2287_v40 }
  0x4b   : > { %4403 = vmatprep.mubr.msk.bf16.mxu1 %vm274_vm0, %v1413_v63  ;;  %4453 = vmatprep.subr.bf16.mxu1 %v4895_v16  ;;  %v1867_v53 = vrot.slane %v4621_v44, 3  ;;  %v2064_v5 = vrot.slane %v4627_v57, 3  ;;  %201 = vst.msk [vmem:[#allocation2 + $0x8] sm:$0xff] %vm199_vm7, %v4696_v4  ;;  %203 = vst.msk [vmem:[#allocation2 + $0x18] sm:$0xff] %vm199_vm7, %v4696_v4  ;;  %v2308_v57 = vrot.slane %v2306_v50, 4 }
  0x4c   : > { %v1872_v20 = vsel %vm1861_vm6, %v1869_v1, %v1871_v8  ;;  %204 = vst.msk [vmem:[#allocation2 + $0x20] sm:$0xff] %vm199_vm7, %v4696_v4  ;;  %205 = vst.msk [vmem:[#allocation2 + $0x28] sm:$0xff] %vm199_vm7, %v4696_v4 }
  0x4d   : > { %v1868_v63 = vsel %vm1861_vm6, %v1865_v51, %v1867_v53  ;;  %206 = vst.msk [vmem:[#allocation2 + $0x30] sm:$0xff] %vm199_vm7, %v4696_v4  ;;  %207 = vst.msk [vmem:[#allocation2 + $0x38] sm:$0xff] %vm199_vm7, %v4696_v4 }
  0x4e   : > { %208 = vst.msk [vmem:[#allocation2 + $0x40] sm:$0xff] %vm199_vm7, %v4696_v4  ;;  %209 = vst.msk [vmem:[#allocation2 + $0x48] sm:$0xff] %vm199_vm7, %v4696_v4 }
  0x4f   : > { %210 = vst.msk [vmem:[#allocation2 + $0x50] sm:$0xff] %vm199_vm7, %v4696_v4  ;;  %211 = vst.msk [vmem:[#allocation2 + $0x58] sm:$0xff] %vm199_vm7, %v4696_v4 }
  0x51   : > { %4394 = vmatmul.mubr.msk.bf16.gmra.mxu0 %vm274_vm0, %v1216_v13  ;;  %4404 = vmatmul.mubr.msk.bf16.gmra.mxu1 %vm274_vm0, %v1415_v21  ;;  %v4957_v13 = vld [vmem:[%s4748_s28 + $0x20] sm:$0xff]   ;;  %v2281_v21 = vrot.slane %v2279_v9, 4 }
  0x52   : > { %4413 = vmatprep.mubr.msk.bf16.mxu0 %vm274_vm0, %v1626_v17  ;;  %4407 = vmatprep.mubr.msk.bf16.mxu1 %vm274_vm0, %v1417_v22  ;;  %v2270_v17 = vrot.slane %v2268_v6, 3  ;;  %v4637_v22 = vld [vmem:[%s4748_s28 + $0x20] sm:$0xff]   ;;  %v2069_v26 = vrot.slane %v4957_v13, 3  ;;  %v2321_v6 = vshrl.u32 %v4642_v59, 16  ;;  %v4655_v59 = vld [vmem:[%s4748_s28 + $0x34] sm:$0xff]  }
  0x53   : > { %v2282_v31 = vor.u32 %v2281_v21, %v2278_v19  ;;  %v2294_v32 = vshrl.u32 %v4637_v22, 16  ;;  %v2297_v33 = vshll.u32 %v4637_v22, 16  ;;  %v2713_v22 = vrot.slane %v2711_v15, 1 }
  0x54   : > { %v2274_v30 = vor.u32 %v2273_v18, %v2270_v17  ;;  %v2070_v37 = vsel %vm1861_vm6, %v2067_v24, %v2069_v26  ;;  %v2323_v13 = vrot.slane %v2321_v6, 3  ;;  %v4649_v18 = vld [vmem:[%s4748_s28 + $0x1c] sm:$0xff]  }
  0x55   : > { %v2299_v47 = vrot.slane %v2297_v33, 4 }
  0x56   : > { %v2283_v44 = vsel %vm2266_vm8, %v2274_v30, %v2282_v31  ;;  %v2715_v30 = vshrl.u32 %v4647_v7, 16 }
  0x59   : > { %4414 = vmatmul.mubr.msk.bf16.vlgmr.msra.gmra.mxu0 %vm274_vm0, %v1635_v35  ;;  %4408 = vmatmul.mubr.msk.bf16.gmra.mxu1 %vm274_vm0, %v1419_v43  ;;  %v4638_v35 = vld [vmem:[%s4748_s28 + $0x30] sm:$0xff]  }
  0x5a   : > { %4440 = vmatpush3.bf16.msra.mxu0 %v4874_v46  ;;  %4417 = vmatprep.mubr.msk.bf16.mxu0 %vm274_vm0, %v1644_v38  ;;  %v4928_v46 = vld [vmem:[%s4748_s28 + $0x10] sm:$0xff]   ;;  %v4989_v38 = vld [vmem:[%s5408_s1 + $0x60] sm:$0xff]   ;;  %v2073_v51 = vrot.slane %v4638_v35, 3  ;;  %v4659_v35 = vld [vmem:[%s4748_s28 + $0x18] sm:$0xff]  }
  0x5b   : > { %4467 = vmatprep.subr.bf16.mxu0 %v4915_v42  ;;  %4427 = vmatprep.mubr.msk.bf16.mxu1 %vm274_vm0, %v1864_v45  ;;  %v2065_v3 = vrot.slane %v4928_v46, 3  ;;  %v4641_v43 = vld [vmem:[%s4748_s28 + $0x30] sm:$0xff]   ;;  %v2296_v45 = vrot.slane %v2294_v32, 3  ;;  %v2723_v32 = vshrl.u32 %v4649_v18, 16 }
  0x5c   : > { %v2315_v55 = vshll.u32 %v4641_v43, 16 }
  0x5d   : > { %v2066_v14 = vsel %vm1861_vm6, %v2064_v5, %v2065_v3  ;;  %v2068_v34 = vsel %vm1861_vm6, %v2065_v3, %v2067_v24  ;;  %v2300_v46 = vor.u32 %v2299_v47, %v2296_v45  ;;  %v2309_v5 = vor.u32 %v2308_v57, %v2305_v56  ;;  %v4664_v57 = vld [vmem:[%s4748_s28 + $0x28] sm:$0xff]  }
  0x5e   : > { %v2719_v24 = vshll.u32 %v4649_v18, 16  ;;  %v2945_v45 = vshrl.u32 %v4658_v27, 16  ;;  %v2949_v47 = vrot.slane %v2947_v36, 1  ;;  %v4674_v27 = vld [vmem:[%s4748_s28 + $0x10] sm:$0xfe]  }
  0x5f   : > { %v2301_v61 = vsel %vm2266_vm8, %v2291_v52, %v2300_v46  ;;  %v2310_v12 = vsel %vm2266_vm8, %v2300_v46, %v2309_v5  ;;  %v4661_v46 = vld [vmem:[%s4748_s28 + $0x20] sm:$0xff]  }
  0x60   : > { %v2721_v4 = vrot.slane %v2719_v24, 1  ;;  %v2964_v6 = vshrl.u32 %v4661_v46, 16 }
  0x61   : > { %4418 = vmatmul.mubr.msk.bf16.gmra.mxu0 %vm274_vm0, %v1653_v54  ;;  %4428 = vmatmul.mubr.msk.bf16.vlgmr.msra.gmra.mxu1 %vm274_vm0, %v1866_v60  ;;  %v2312_v54 = vshrl.u32 %v4641_v43, 16  ;;  %v2292_v60 = vsel %vm2266_vm8, %v2282_v31, %v2291_v52  ;;  %v4656_v43 = vld [vmem:[%s4748_s28 + $0x34] sm:$0xff]  }
  0x62   : > { %4421 = vmatprep.mubr.msk.bf16.mxu0 %vm274_vm0, %v1662_v58  ;;  %4454 = vmatpush3.bf16.msra.mxu1 %v4895_v16  ;;  %v1870_v16 = vsel %vm1861_vm6, %v1867_v53, %v1869_v1  ;;  %v4640_v53 = vld [vmem:[%s4748_s28 + $0x38] ss:$0 sps:$4 sm:$0x77]   ;;  %v2074_v58 = vsel %vm1861_vm6, %v2071_v48, %v2073_v51  ;;  %v4646_v1 = vld [vmem:[%s4748_s28 + $0xc] sm:$0xff]   ;;  %v2725_v40 = vor.u32 %v2723_v32, %v2721_v4 }
  0x63   : > { %4431 = vmatprep.mubr.msk.bf16.mxu1 %vm274_vm0, %v1868_v63  ;;  %4481 = vmatprep.subr.bf16.mxu1 %v4944_v0  ;;  %v2314_v62 = vrot.slane %v2312_v54, 3  ;;  %v2317_v63 = vrot.slane %v2315_v55, 4  ;;  %v2075_v3 = vrot.slane %v4640_v53, 3  ;;  %v2706_v9 = vshll.u32 %v4646_v1, 16  ;;  %v5057_v54 = vld [vmem:[%s5408_s1 + $0x78] sm:$0xff]  }
  0x64   : > { %v2743_v53 = vshll.u32 %v4656_v43, 16 }
  0x65   : > { %v2318_v8 = vor.u32 %v2317_v63, %v2314_v62  ;;  %v2708_v17 = vrot.slane %v2706_v9, 1  ;;  %v2960_v63 = vshll.u32 %v4661_v46, 16  ;;  %v4679_v46 = vld [vmem:[%s4748_s28 + $0x28] sm:$0xff]  }
  0x66   : > { %v2745_v62 = vrot.slane %v2743_v53, 1 }
  0x69   : > { %4422 = vmatmul.mubr.msk.bf16.gmra.mxu0 %vm274_vm0, %v1671_v10  ;;  %4432 = vmatmul.mubr.msk.bf16.gmra.mxu1 %vm274_vm0, %v1870_v16  ;;  %v2076_v10 = vsel %vm1861_vm6, %v2073_v51, %v2075_v3  ;;  %v2319_v16 = vsel %vm2266_vm8, %v2309_v5, %v2318_v8  ;;  %v2747_v3 = vshrl.u32 %v4656_v43, 16 }
  0x6a   : > { %4441 = vmatprep.mubr.msk.bf16.mxu0 %vm274_vm0, %v2066_v14  ;;  %4435 = vmatprep.mubr.msk.bf16.mxu1 %vm274_vm0, %v1872_v20  ;;  %v2326_v14 = vrot.slane %v2324_v25, 4  ;;  %v4645_v20 = vld [vmem:[%s4748_s28 + $0x14] sm:$0xff]  }
  0x6c   : > { %v2327_v19 = vor.u32 %v2326_v14, %v2323_v13  ;;  %v4669_v14 = vld [vmem:[%s4748_s28 + $0x38] sm:$0xff]  }
  0x6d   : > { %v2984_v24 = vshll.u32 %v4669_v14, 16 }
  0x6e   : > { %v2328_v29 = vsel %vm2266_vm8, %v2318_v8, %v2327_v19  ;;  %v4666_v8 = vld [vmem:[%s4748_s28 + $0x30] sm:$0xff]  }
  0x6f   : > { %v2976_v18 = vshll.u32 %v4666_v8, 16  ;;  %v2986_v36 = vrot.slane %v2984_v24, 1 }
  0x71   : > { %4442 = vmatmul.mubr.msk.bf16.vlgmr.msra.gmra.mxu0 %vm274_vm0, %v2068_v34  ;;  %4436 = vmatmul.mubr.msk.bf16.gmra.mxu1 %vm274_vm0, %v1874_v39  ;;  %v4654_v34 = vld [vmem:[%s4748_s28 + $0x2c] sm:$0xff]   ;;  %v4650_v39 = vld [vmem:[%s4748_s28 + $0x24] sm:$0xff]   ;;  %v2978_v32 = vrot.slane %v2976_v18, 1 }
  0x72   : > { %4468 = vmatpush3.bf16.msra.mxu0 %v4915_v42  ;;  %4445 = vmatprep.mubr.msk.bf16.mxu0 %vm274_vm0, %v2070_v37  ;;  %v2072_v42 = vsel %vm1861_vm6, %v2069_v26, %v2071_v48  ;;  %v4652_v26 = vld [vmem:[%s4748_s28 + $0x24] sm:$0xff]   ;;  %v2717_v37 = vor.u32 %v2715_v30, %v2713_v22  ;;  %v2952_v48 = vshll.u32 %v4659_v35, 16  ;;  %v2739_v52 = vshrl.u32 %v4654_v34, 16 }
  0x73   : > { %4495 = vmatprep.subr.bf16.mxu0 %v4989_v38  ;;  %4455 = vmatprep.mubr.msk.bf16.mxu1 %vm274_vm0, %v2283_v44  ;;  %v2727_v33 = vshll.u32 %v4652_v26, 16  ;;  %v4653_v44 = vld [vmem:[%s4748_s28 + $0x2c] sm:$0xff]   ;;  %v2731_v50 = vshrl.u32 %v4652_v26, 16 }
  0x74   : > { %v2722_v49 = vsel %vm458_vm1, %v2717_v37, %v2721_v4  ;;  %v2954_v56 = vrot.slane %v2952_v48, 1  ;;  %v4668_v4 = vld [vmem:[%s4748_s28 + $0x28] sm:$0xff]   ;;  %v4671_v37 = vld [vmem:[%s4748_s28 + $0x40] ss:$0 sps:$4 sm:$0x11]  }
  0x75   : > { %v2729_v41 = vrot.slane %v2727_v33, 1  ;;  %v2992_v48 = vshll.u32 %v4671_v37, 16 }
  0x77   : > { %v2730_v51 = vsel %vm458_vm1, %v2725_v40, %v2729_v41  ;;  %v3391_v40 = vshll.u32 %v4674_v27, 16 }
  0x79   : > { %4446 = vmatmul.mubr.msk.bf16.gmra.mxu0 %vm274_vm0, %v2072_v42  ;;  %4456 = vmatmul.mubr.msk.bf16.vlgmr.msra.gmra.mxu1 %vm274_vm0, %v2292_v60  ;;  %v2950_v42 = vor.u32 %v2949_v47, %v2945_v45  ;;  %v4657_v60 = vld [vmem:[%s4748_s28 + $0x3c] ss:$0 sps:$4 sm:$0x11]   ;;  %v2988_v47 = vshrl.u32 %v4669_v14, 16 }
  0x7a   : > { %4449 = vmatprep.mubr.msk.bf16.mxu0 %vm274_vm0, %v2074_v58  ;;  %4482 = vmatpush3.bf16.msra.mxu1 %v4944_v0  ;;  %v2704_v0 = vshrl.u32 %v4646_v1, 16  ;;  %v2733_v58 = vor.u32 %v2731_v50, %v2729_v41  ;;  %v2956_v1 = vshrl.u32 %v4659_v35, 16  ;;  %v2751_v7 = vshll.u32 %v4657_v60, 16  ;;  %v4673_v14 = vld [vmem:[%s4748_s28 + $0x40] ss:$0 sps:$4 sm:$0x11]  }
  0x7b   : > { %4459 = vmatprep.mubr.msk.bf16.mxu1 %vm274_vm0, %v2301_v61  ;;  %4509 = vmatprep.subr.bf16.mxu1 %v5011_v2  ;;  %v2955_v5 = vsel %vm458_vm1, %v2950_v42, %v2954_v56  ;;  %v4670_v42 = vld [vmem:[%s4748_s28 + $0x30] sm:$0xff]  }
  0x7c   : > { %v2709_v21 = vor.u32 %v2708_v17, %v2704_v0  ;;  %v2958_v13 = vor.u32 %v2956_v1, %v2954_v56  ;;  %v2753_v17 = vrot.slane %v2751_v7, 1  ;;  %v3414_v1 = vshrl.u32 %v4679_v46, 16 }
  0x7e   : > { %v2714_v31 = vsel %vm458_vm1, %v2709_v21, %v2713_v22  ;;  %v2972_v22 = vshrl.u32 %v4664_v57, 16 }
  0x81   : > { %4450 = vmatmul.mubr.msk.bf16.gmra.mxu0 %vm274_vm0, %v2076_v10  ;;  %4460 = vmatmul.mubr.msk.bf16.gmra.mxu1 %vm274_vm0, %v2310_v12  ;;  %v2962_v10 = vrot.slane %v2960_v63, 1  ;;  %v4663_v12 = vld [vmem:[%s4748_s28 + $0x18] sm:$0xff]  }
  0x82   : > { %4469 = vmatprep.mubr.msk.bf16.mxu0 %vm274_vm0, %v4643_v11  ;;  %4463 = vmatprep.mubr.msk.bf16.mxu1 %vm274_vm0, %v2319_v16  ;;  %v4662_v11 = vld [vmem:[%s4748_s28 + $0x10] sm:$0xfe]   ;;  %v2749_v16 = vor.u32 %v2747_v3, %v2745_v62  ;;  %v3417_v3 = vshll.u32 %v4679_v46, 16 }
  0x83   : > { %v2966_v0 = vor.u32 %v2964_v6, %v2962_v10  ;;  %v3185_v19 = vrot.slane %v4662_v11, 1  ;;  %v2963_v21 = vsel %vm458_vm1, %v2958_v13, %v2962_v10  ;;  %v3416_v10 = vrot.slane %v3414_v1, 1 }
  0x84   : > { %v2754_v30 = vsel %vm458_vm1, %v2749_v16, %v2753_v17  ;;  %v3419_v11 = vrot.slane %v3417_v3, 2  ;;  %v227_v3 = vld [vmem:[#allocation2 + $0x18] sm:$0xff] }
  0x89   : > { %4470 = vmatmul.mubr.msk.bf16.vlgmr.msra.gmra.mxu0 %vm274_vm0, %v4645_v20  ;;  %4464 = vmatmul.mubr.msk.bf16.gmra.mxu1 %vm274_vm0, %v2328_v29  ;;  %v3186_v20 = vrot.slane %v4663_v12, 1  ;;  %v4675_v29 = vld [vmem:[%s4748_s28 + $0x18] sm:$0xff]  }
  0x8a   : > { %4496 = vmatpush3.bf16.msra.mxu0 %v4989_v38  ;;  %4473 = vmatprep.mubr.msk.bf16.mxu0 %vm274_vm0, %v4648_v23  ;;  %v2735_v38 = vshll.u32 %v4654_v34, 16  ;;  %v2980_v23 = vshrl.u32 %v4666_v8, 16  ;;  %v3396_v41 = vshrl.u32 %v4675_v29, 16  ;;  %v3399_v43 = vshll.u32 %v4675_v29, 16  ;;  %v4681_v8 = vld [vmem:[%s4748_s28 + $0x30] sm:$0xff]   ;;  %v4683_v12 = vld [vmem:[%s4748_s28 + $0x38] sm:$0xff]  }
  0x8b   : > { %4523 = vmatprep.subr.bf16.mxu0 %v5035_v28  ;;  %4483 = vmatprep.mubr.msk.bf16.mxu1 %vm274_vm0, %v2714_v31  ;;  %v4665_v31 = vld [vmem:[%s4748_s28 + $0x20] sm:$0xff]   ;;  %v3187_v33 = vsel %vm700_vm2, %v3185_v19, %v3186_v20  ;;  %v3423_v17 = vshrl.u32 %v4681_v8, 16  ;;  %v3426_v18 = vshll.u32 %v4681_v8, 16  ;;  %v3420_v19 = vor.u32 %v3419_v11, %v3416_v10  ;;  %v230_v8 = vld [vmem:[#allocation2 + $0x30] sm:$0xff] }
  0x8c   : > { %v2737_v55 = vrot.slane %v2735_v38, 1  ;;  %v2982_v35 = vor.u32 %v2980_v23, %v2978_v32  ;;  %v3401_v53 = vrot.slane %v3399_v43, 2  ;;  %v228_v11 = vld [vmem:[#allocation2 + $0x20] sm:$0xff] }
  0x8d   : > { %v3428_v29 = vrot.slane %v3426_v18, 2 }
  0x8e   : > { %v2741_v61 = vor.u32 %v2739_v52, %v2737_v55  ;;  %v2738_v25 = vsel %vm458_vm1, %v2733_v58, %v2737_v55  ;;  %v2987_v45 = vsel %vm458_vm1, %v2982_v35, %v2986_v36  ;;  %v3398_v52 = vrot.slane %v3396_v41, 1 }
  0x8f   : > { %v2990_v58 = vor.u32 %v2988_v47, %v2986_v36  ;;  %v4682_v36 = vld [vmem:[%s4748_s28 + $0x28] sm:$0xff]  }
  0x90   : > { %v2746_v9 = vsel %vm458_vm1, %v2741_v61, %v2745_v62  ;;  %v3402_v63 = vor.u32 %v3401_v53, %v3398_v52 }
  0x91   : > { %4474 = vmatmul.mubr.msk.bf16.gmra.mxu0 %vm274_vm0, %v4650_v39  ;;  %4484 = vmatmul.mubr.msk.bf16.vlgmr.msra.gmra.mxu1 %vm274_vm0, %v2722_v49  ;;  %v3388_v39 = vshrl.u32 %v4674_v27, 16  ;;  %v4676_v49 = vld [vmem:[%s4748_s28 + $0x20] sm:$0xff]   ;;  %v3425_v27 = vrot.slane %v3423_v17, 1 }
  0x92   : > { %4477 = vmatprep.mubr.msk.bf16.mxu0 %vm274_vm0, %v4653_v44  ;;  %4510 = vmatpush3.bf16.msra.mxu1 %v5011_v2  ;;  %v2968_v2 = vshll.u32 %v4664_v57, 16  ;;  %v3188_v44 = vrot.slane %v4665_v31, 1  ;;  %v4672_v57 = vld [vmem:[%s4748_s28 + $0x38] sm:$0xff]   ;;  %v3405_v60 = vshrl.u32 %v4676_v49, 16  ;;  %v3408_v61 = vshll.u32 %v4676_v49, 16  ;;  %v4684_v49 = vld [vmem:[%s4748_s28 + $0x30] sm:$0xff]  }
  0x93   : > { %4487 = vmatprep.mubr.msk.bf16.mxu1 %vm274_vm0, %v2730_v51  ;;  %4537 = vmatprep.subr.bf16.mxu1 %v5057_v54  ;;  %v3390_v50 = vrot.slane %v3388_v39, 1  ;;  %v3393_v51 = vrot.slane %v3391_v40, 2  ;;  %v3194_v6 = vrot.slane %v4672_v57, 1  ;;  %v3429_v37 = vor.u32 %v3428_v29, %v3425_v27  ;;  %v234_v27 = vld [vmem:[#allocation2 + $0x50] sm:$0xff] }
  0x94   : > { %v2970_v15 = vrot.slane %v2968_v2, 1  ;;  %v3189_v55 = vsel %vm700_vm2, %v3186_v20, %v3188_v44  ;;  %v3410_v7 = vrot.slane %v3408_v61, 2  ;;  %v3432_v20 = vshrl.u32 %v4683_v12, 16 }
  0x95   : > { %v3394_v62 = vor.u32 %v3393_v51, %v3390_v50  ;;  %v4686_v51 = vld [vmem:[%s4748_s28 + $0x38] sm:$0xff]   ;;  %v3645_v53 = vrot.slane %v4684_v49, 2 }
  0x96   : > { %v2971_v26 = vsel %vm458_vm1, %v2966_v0, %v2970_v15  ;;  %v2974_v34 = vor.u32 %v2972_v22, %v2970_v15  ;;  %v4677_v0 = vld [vmem:[%s4748_s28 + $0x10] sm:$0xfc]   ;;  %v4678_v15 = vld [vmem:[%s4748_s28 + $0x18] sm:$0xff]   ;;  %v3196_v22 = vrot.slane %v4673_v14, 1  ;;  %v3647_v46 = vrot.slane %v4686_v51, 2 }
  0x97   : > { %v3638_v23 = vrot.slane %v4677_v0, 2  ;;  %v3639_v24 = vrot.slane %v4678_v15, 2  ;;  %v231_v0 = vld [vmem:[#allocation2 + $0x38] sm:$0xff] }
  0x98   : > { %v2979_v38 = vsel %vm458_vm1, %v2974_v34, %v2978_v32  ;;  %v3434_v32 = vrot.slane %v3432_v20, 1  ;;  %v4680_v34 = vld [vmem:[%s4748_s28 + $0x20] sm:$0xff]   ;;  %v3648_v57 = vsel %vm1406_vm4, %v3645_v53, %v3647_v46  ;;  %v229_v20 = vld [vmem:[#allocation2 + $0x28] sm:$0xff] }
  0x99   : > { %4478 = vmatmul.mubr.msk.bf16.gmra.mxu0 %vm274_vm0, %v4655_v59  ;;  %4488 = vmatmul.mubr.msk.bf16.gmra.mxu1 %vm274_vm0, %v2738_v25  ;;  %v2994_v59 = vrot.slane %v2992_v48, 1  ;;  %v3407_v25 = vrot.slane %v3405_v60, 1  ;;  %v3640_v35 = vsel %vm1406_vm4, %v3638_v23, %v3639_v24  ;;  %v3641_v43 = vrot.slane %v4680_v34, 2 }
  0x9a   : > { %4497 = vmatprep.mubr.msk.bf16.mxu0 %vm274_vm0, %v2955_v5  ;;  %4491 = vmatprep.mubr.msk.bf16.mxu1 %vm274_vm0, %v2746_v9  ;;  %v3192_v5 = vrot.slane %v4670_v42, 1  ;;  %v3403_v9 = vsel %vm903_vm3, %v3394_v62, %v3402_v63  ;;  %v224_v62 = vld [vmem:[#allocation2] sm:$0xff] }
  0x9b   : > { %v2995_v2 = vsel %vm458_vm1, %v2990_v58, %v2994_v59  ;;  %v3411_v16 = vor.u32 %v3410_v7, %v3407_v25  ;;  %v3642_v48 = vsel %vm1406_vm4, %v3639_v24, %v3641_v43  ;;  %v226_v59 = vld [vmem:[#allocation2 + $0x10] sm:$0xff] }
  0x9d   : > { %v3421_v31 = vsel %vm903_vm3, %v3411_v16, %v3420_v19 }
  0xa1   : > { %4498 = vmatmul.mubr.msk.bf16.vlgmr.msra.gmra.mxu0 %vm274_vm0, %v2963_v21  ;;  %4492 = vmatmul.mubr.msk.bf16.gmra.mxu1 %vm274_vm0, %v2754_v30  ;;  %v3435_v21 = vshll.u32 %v4683_v12, 16  ;;  %v4685_v30 = vld [vmem:[%s4748_s28 + $0x40] ss:$0 sps:$4 sm:$0x33]  }
  0xa2   : > { %4524 = vmatpush3.bf16.msra.mxu0 %v5035_v28  ;;  %4501 = vmatprep.mubr.msk.bf16.mxu0 %vm274_vm0, %v2971_v26  ;;  %v3190_v28 = vrot.slane %v4668_v4, 1  ;;  %v3412_v26 = vsel %vm903_vm3, %v3402_v63, %v3411_v16  ;;  %v3197_v4 = vsel %vm700_vm2, %v3194_v6, %v3196_v22  ;;  %v3441_v39 = vshrl.u32 %v4685_v30, 16 }
  0xa3   : > { %4511 = vmatprep.mubr.msk.bf16.mxu1 %vm274_vm0, %v3187_v33  ;;  %v3437_v33 = vrot.slane %v3435_v21, 2  ;;  %v3444_v40 = vshll.u32 %v4685_v30, 16 }
  0xa4   : > { %v3191_v56 = vsel %vm700_vm2, %v3188_v44, %v3190_v28  ;;  %v3193_v13 = vsel %vm700_vm2, %v3190_v28, %v3192_v5  ;;  %v3643_v44 = vrot.slane %v4682_v36, 2  ;;  %v3430_v28 = vsel %vm903_vm3, %v3420_v19, %v3429_v37 }
  0xa5   : > { %v3438_v41 = vor.u32 %v3437_v33, %v3434_v32 }
  0xa6   : > { %v3644_v50 = vsel %vm1406_vm4, %v3641_v43, %v3643_v44  ;;  %v3646_v42 = vsel %vm1406_vm4, %v3643_v44, %v3645_v53 }
  0xa7   : > { %v3439_v47 = vsel %vm903_vm3, %v3429_v37, %v3438_v41 }
  0xa9   : > { %4502 = vmatmul.mubr.msk.bf16.gmra.mxu0 %vm274_vm0, %v2979_v38  ;;  %4512 = vmatmul.mubr.msk.bf16.vlgmr.msra.gmra.mxu1 %vm274_vm0, %v3189_v55  ;;  %v3443_v38 = vrot.slane %v3441_v39, 1 }
  0xaa   : > { %4505 = vmatprep.mubr.msk.bf16.mxu0 %vm274_vm0, %v2987_v45  ;;  %4538 = vmatpush3.bf16.msra.mxu1 %v5057_v54  ;;  %v3195_v54 = vsel %vm700_vm2, %v3192_v5, %v3194_v6  ;;  %v3446_v45 = vrot.slane %v3444_v40, 2  ;;  %v235_v40 = vld [vmem:[#allocation2 + $0x58] sm:$0xff] }
  0xab   : > { %4515 = vmatprep.mubr.msk.bf16.mxu1 %vm274_vm0, %v3191_v56  ;;  %v4687_v56 = vld [vmem:[%s4748_s28 + $0x40] ss:$0 sps:$4 sm:$0x33]  }
  0xac   : > { %v3447_v52 = vor.u32 %v3446_v45, %v3443_v38  ;;  %v3649_v58 = vrot.slane %v4687_v56, 2  ;;  %v233_v45 = vld [vmem:[#allocation2 + $0x48] sm:$0xff] }
  0xae   : > { %v3448_v55 = vsel %vm903_vm3, %v3438_v41, %v3447_v52  ;;  %v3650_v60 = vsel %vm1406_vm4, %v3647_v46, %v3649_v58 }
  0xb1   : > { %4506 = vmatmul.mubr.msk.bf16.gmra.mxu0 %vm274_vm0, %v2995_v2  ;;  %4516 = vmatmul.mubr.msk.bf16.gmra.mxu1 %vm274_vm0, %v3193_v13  ;;  %v225_v2 = vld [vmem:[#allocation2 + $0x8] sm:$0xff] }
  0xb2   : > { %4525 = vmatprep.mubr.msk.bf16.mxu0 %vm274_vm0, %v3403_v9  ;;  %4519 = vmatprep.mubr.msk.bf16.mxu1 %vm274_vm0, %v3195_v54 }
  0xb9   : > { %4526 = vmatmul.mubr.msk.bf16.vlgmr.msra.gmra.mxu0 %vm274_vm0, %v3412_v26  ;;  %4520 = vmatmul.mubr.msk.bf16.gmra.mxu1 %vm274_vm0, %v3197_v4  ;;  %v232_v4 = vld [vmem:[#allocation2 + $0x40] sm:$0xff] }
  0xba   : > { %4529 = vmatprep.mubr.msk.bf16.mxu0 %vm274_vm0, %v3421_v31  ;;  %4539 = vmatprep.mubr.msk.bf16.mxu1 %vm274_vm0, %v3640_v35 }
  0xc1   : > { %4530 = vmatmul.mubr.msk.bf16.gmra.mxu0 %vm274_vm0, %v3430_v28  ;;  %4540 = vmatmul.mubr.msk.bf16.vlgmr.msra.gmra.mxu1 %vm274_vm0, %v3642_v48 }
  0xc2   : > { %4533 = vmatprep.mubr.msk.bf16.mxu0 %vm274_vm0, %v3439_v47  ;;  %4543 = vmatprep.mubr.msk.bf16.mxu1 %vm274_vm0, %v3644_v50 }
  0xc9   : > { %4534 = vmatmul.mubr.msk.bf16.gmra.mxu0 %vm274_vm0, %v3448_v55  ;;  %4544 = vmatmul.mubr.msk.bf16.gmra.mxu1 %vm274_vm0, %v3646_v42 }
  0xca   : > { %4547 = vmatprep.mubr.msk.bf16.mxu1 %vm274_vm0, %v3648_v57 }
  0xd1   : > { %v4331_v61 = vpop.f32.mrf.mxu0  ;;  %4548 = vmatmul.mubr.msk.bf16.gmra.mxu1 %vm274_vm0, %v3650_v60 }
  0xd2   : > { %v376_v63 = vadd.f32 %v4331_v61, %v226_v59 }
  0xd3   : > { %v327_v1 = vpop.f32.mrf.mxu0 }
  0xd4   : > { %388 = vst.msk [vmem:[#allocation2 + $0x10] sm:$0xff] %vm199_vm7, %v376_v63  ;;  %v374_v5 = vadd.f32 %v327_v1, %v224_v62 }
  0xd5   : > { %v4332_v6 = vpop.f32.mrf.mxu0 }
  0xd6   : > { %386 = vst.msk [vmem:[#allocation2] sm:$0xff] %vm199_vm7, %v374_v5  ;;  %v377_v25 = vadd.f32 %v4332_v6, %v227_v3 }
  0xd7   : > { %v330_v7 = vpop.f32.mrf.mxu0 }
  0xd8   : > { %389 = vst.msk [vmem:[#allocation2 + $0x18] sm:$0xff] %vm199_vm7, %v377_v25  ;;  %v375_v9 = vadd.f32 %v330_v7, %v225_v2 }
  0xd9   : > { %v4335_v10 = vpop.f32.mrf.mxu0  ;;  %v4345_v14 = vpop.f32.mrf.mxu1 }
  0xda   : > { %387 = vst.msk [vmem:[#allocation2 + $0x8] sm:$0xff] %vm199_vm7, %v375_v9  ;;  %v380_v12 = vadd.f32 %v4335_v10, %v230_v8 }
  0xdb   : > { %v413_v13 = vld [vmem:[#allocation2 + $0x10] sm:$0xff]  ;;  %v343_v54 = vpop.f32.mrf.mxu0  ;;  %v569_v18 = vpop.f32.mrf.mxu1 }
  0xdc   : > { %v618_v15 = vadd.f32 %v4345_v14, %v413_v13  ;;  %392 = vst.msk [vmem:[#allocation2 + $0x30] sm:$0xff] %vm199_vm7, %v380_v12  ;;  %v378_v16 = vadd.f32 %v343_v54, %v228_v11 }
  0xdd   : > { %v411_v17 = vld [vmem:[#allocation2] sm:$0xff]  ;;  %v4336_v19 = vpop.f32.mrf.mxu0  ;;  %v4346_v24 = vpop.f32.mrf.mxu1 }
  0xde   : > { %630 = vst.msk [vmem:[#allocation2 + $0x10] sm:$0xff] %vm199_vm7, %v618_v15  ;;  %v616_v21 = vadd.f32 %v569_v18, %v411_v17  ;;  %390 = vst.msk [vmem:[#allocation2 + $0x20] sm:$0xff] %vm199_vm7, %v378_v16  ;;  %v381_v22 = vadd.f32 %v4336_v19, %v231_v0 }
  0xdf   : > { %v414_v23 = vld [vmem:[#allocation2 + $0x18] sm:$0xff]  ;;  %v346_v26 = vpop.f32.mrf.mxu0  ;;  %v572_v32 = vpop.f32.mrf.mxu1 }
  0xe0   : > { %628 = vst.msk [vmem:[#allocation2] sm:$0xff] %vm199_vm7, %v616_v21  ;;  %v619_v29 = vadd.f32 %v4346_v24, %v414_v23  ;;  %393 = vst.msk [vmem:[#allocation2 + $0x38] sm:$0xff] %vm199_vm7, %v381_v22  ;;  %v379_v30 = vadd.f32 %v346_v26, %v229_v20 }
  0xe1   : > { %v412_v31 = vld [vmem:[#allocation2 + $0x8] sm:$0xff]  ;;  %v4339_v33 = vpop.f32.mrf.mxu0  ;;  %v4349_v37 = vpop.f32.mrf.mxu1 }
  0xe2   : > { %631 = vst.msk [vmem:[#allocation2 + $0x18] sm:$0xff] %vm199_vm7, %v619_v29  ;;  %v617_v34 = vadd.f32 %v572_v32, %v412_v31  ;;  %391 = vst.msk [vmem:[#allocation2 + $0x28] sm:$0xff] %vm199_vm7, %v379_v30  ;;  %v384_v35 = vadd.f32 %v4339_v33, %v234_v27 }
  0xe3   : > { %v417_v36 = vld [vmem:[#allocation2 + $0x30] sm:$0xff]  ;;  %v359_v39 = vpop.f32.mrf.mxu0  ;;  %v585_v28 = vpop.f32.mrf.mxu1 }
  0xe4   : > { %629 = vst.msk [vmem:[#allocation2 + $0x8] sm:$0xff] %vm199_vm7, %v617_v34  ;;  %v622_v41 = vadd.f32 %v4349_v37, %v417_v36  ;;  %396 = vst.msk [vmem:[#allocation2 + $0x50] sm:$0xff] %vm199_vm7, %v384_v35  ;;  %v382_v43 = vadd.f32 %v359_v39, %v232_v4 }
  0xe5   : > { %v415_v44 = vld [vmem:[#allocation2 + $0x20] sm:$0xff]  ;;  %v4340_v38 = vpop.f32.mrf.mxu0  ;;  %v4350_v50 = vpop.f32.mrf.mxu1  ;;  %v655_v42 = vld [vmem:[#allocation2 + $0x10] sm:$0xff] }
  0xe6   : > { %634 = vst.msk [vmem:[#allocation2 + $0x30] sm:$0xff] %vm199_vm7, %v622_v41  ;;  %v620_v47 = vadd.f32 %v585_v28, %v415_v44  ;;  %394 = vst.msk [vmem:[#allocation2 + $0x40] sm:$0xff] %vm199_vm7, %v382_v43  ;;  %v385_v48 = vadd.f32 %v4340_v38, %v235_v40 }
  0xe7   : > { %v418_v49 = vld [vmem:[#allocation2 + $0x38] sm:$0xff]  ;;  %v362_v51 = vpop.f32.mrf.mxu0  ;;  %v588_v55 = vpop.f32.mrf.mxu1  ;;  %v653_v61 = vld [vmem:[#allocation2] sm:$0xff] }
  0xe8   : > { %632 = vst.msk [vmem:[#allocation2 + $0x20] sm:$0xff] %vm199_vm7, %v620_v47  ;;  %v623_v52 = vadd.f32 %v4350_v50, %v418_v49  ;;  %397 = vst.msk [vmem:[#allocation2 + $0x58] sm:$0xff] %vm199_vm7, %v385_v48  ;;  %v383_v53 = vadd.f32 %v362_v51, %v233_v45 }
  0xe9   : > { %v416_v46 = vld [vmem:[#allocation2 + $0x28] sm:$0xff]  ;;  %v4359_v56 = vpop.f32.mrf.mxu0  ;;  %v4353_v60 = vpop.f32.mrf.mxu1  ;;  %v656_v6 = vld [vmem:[#allocation2 + $0x18] sm:$0xff] }
  0xea   : > { %635 = vst.msk [vmem:[#allocation2 + $0x38] sm:$0xff] %vm199_vm7, %v623_v52  ;;  %v621_v57 = vadd.f32 %v588_v55, %v416_v46  ;;  %395 = vst.msk [vmem:[#allocation2 + $0x48] sm:$0xff] %vm199_vm7, %v383_v53  ;;  %v821_v58 = vadd.f32 %v4359_v56, %v655_v42 }
  0xeb   : > { %v421_v59 = vld [vmem:[#allocation2 + $0x50] sm:$0xff]  ;;  %v772_v62 = vpop.f32.mrf.mxu0  ;;  %v601_v5 = vpop.f32.mrf.mxu1  ;;  %v654_v10 = vld [vmem:[#allocation2 + $0x8] sm:$0xff] }
  0xec   : > { %633 = vst.msk [vmem:[#allocation2 + $0x28] sm:$0xff] %vm199_vm7, %v621_v57  ;;  %v626_v63 = vadd.f32 %v4353_v60, %v421_v59  ;;  %833 = vst.msk [vmem:[#allocation2 + $0x10] sm:$0xff] %vm199_vm7, %v821_v58  ;;  %v819_v1 = vadd.f32 %v772_v62, %v653_v61 }
  0xed   : > { %v419_v3 = vld [vmem:[#allocation2 + $0x40] sm:$0xff]  ;;  %v4360_v2 = vpop.f32.mrf.mxu0  ;;  %v4354_v9 = vpop.f32.mrf.mxu1  ;;  %v659_v0 = vld [vmem:[#allocation2 + $0x30] sm:$0xff] }
  0xee   : > { %638 = vst.msk [vmem:[#allocation2 + $0x50] sm:$0xff] %vm199_vm7, %v626_v63  ;;  %v624_v25 = vadd.f32 %v601_v5, %v419_v3  ;;  %831 = vst.msk [vmem:[#allocation2] sm:$0xff] %vm199_vm7, %v819_v1  ;;  %v822_v7 = vadd.f32 %v4360_v2, %v656_v6 }
  0xef   : > { %v422_v8 = vld [vmem:[#allocation2 + $0x58] sm:$0xff]  ;;  %v775_v11 = vpop.f32.mrf.mxu0  ;;  %v604_v54 = vpop.f32.mrf.mxu1  ;;  %v657_v20 = vld [vmem:[#allocation2 + $0x20] sm:$0xff] }
  0xf0   : > { %636 = vst.msk [vmem:[#allocation2 + $0x40] sm:$0xff] %vm199_vm7, %v624_v25  ;;  %v627_v12 = vadd.f32 %v4354_v9, %v422_v8  ;;  %834 = vst.msk [vmem:[#allocation2 + $0x18] sm:$0xff] %vm199_vm7, %v822_v7  ;;  %v820_v13 = vadd.f32 %v775_v11, %v654_v10 }
  0xf1   : > { %v420_v14 = vld [vmem:[#allocation2 + $0x48] sm:$0xff]  ;;  %v4363_v15 = vpop.f32.mrf.mxu0  ;;  %v4373_v19 = vpop.f32.mrf.mxu1  ;;  %v660_v27 = vld [vmem:[#allocation2 + $0x38] sm:$0xff] }
  0xf2   : > { %639 = vst.msk [vmem:[#allocation2 + $0x58] sm:$0xff] %vm199_vm7, %v627_v12  ;;  %v625_v16 = vadd.f32 %v604_v54, %v420_v14  ;;  %832 = vst.msk [vmem:[#allocation2 + $0x8] sm:$0xff] %vm199_vm7, %v820_v13  ;;  %v825_v17 = vadd.f32 %v4363_v15, %v659_v0 }
  0xf3   : > { %v858_v18 = vld [vmem:[#allocation2 + $0x10] sm:$0xff]  ;;  %v788_v21 = vpop.f32.mrf.mxu0  ;;  %v1024_v26 = vpop.f32.mrf.mxu1  ;;  %v658_v4 = vld [vmem:[#allocation2 + $0x28] sm:$0xff] }
  0xf4   : > { %637 = vst.msk [vmem:[#allocation2 + $0x48] sm:$0xff] %vm199_vm7, %v625_v16  ;;  %v1073_v22 = vadd.f32 %v4373_v19, %v858_v18  ;;  %837 = vst.msk [vmem:[#allocation2 + $0x30] sm:$0xff] %vm199_vm7, %v825_v17  ;;  %v823_v23 = vadd.f32 %v788_v21, %v657_v20 }
  0xf5   : > { %v856_v24 = vld [vmem:[#allocation2] sm:$0xff]  ;;  %v4364_v29 = vpop.f32.mrf.mxu0  ;;  %v4374_v33 = vpop.f32.mrf.mxu1  ;;  %v663_v40 = vld [vmem:[#allocation2 + $0x50] sm:$0xff] }
  0xf6   : > { %1085 = vst.msk [vmem:[#allocation2 + $0x10] sm:$0xff] %vm199_vm7, %v1073_v22  ;;  %v1071_v30 = vadd.f32 %v1024_v26, %v856_v24  ;;  %835 = vst.msk [vmem:[#allocation2 + $0x20] sm:$0xff] %vm199_vm7, %v823_v23  ;;  %v826_v31 = vadd.f32 %v4364_v29, %v660_v27 }
  0xf7   : > { %v859_v32 = vld [vmem:[#allocation2 + $0x18] sm:$0xff]  ;;  %v791_v34 = vpop.f32.mrf.mxu0  ;;  %v1027_v39 = vpop.f32.mrf.mxu1  ;;  %v661_v45 = vld [vmem:[#allocation2 + $0x40] sm:$0xff] }
  0xf8   : > { %1083 = vst.msk [vmem:[#allocation2] sm:$0xff] %vm199_vm7, %v1071_v30  ;;  %v1074_v35 = vadd.f32 %v4374_v33, %v859_v32  ;;  %838 = vst.msk [vmem:[#allocation2 + $0x38] sm:$0xff] %vm199_vm7, %v826_v31  ;;  %v824_v36 = vadd.f32 %v791_v34, %v658_v4 }
  0xf9   : > { %v857_v37 = vld [vmem:[#allocation2 + $0x8] sm:$0xff]  ;;  %v4367_v41 = vpop.f32.mrf.mxu0  ;;  %v4377_v38 = vpop.f32.mrf.mxu1  ;;  %v664_v52 = vld [vmem:[#allocation2 + $0x58] sm:$0xff] }
  0xfa   : > { %1086 = vst.msk [vmem:[#allocation2 + $0x18] sm:$0xff] %vm199_vm7, %v1074_v35  ;;  %v1072_v43 = vadd.f32 %v1027_v39, %v857_v37  ;;  %836 = vst.msk [vmem:[#allocation2 + $0x28] sm:$0xff] %vm199_vm7, %v824_v36  ;;  %v829_v44 = vadd.f32 %v4367_v41, %v663_v40 }
  0xfb   : > { %v862_v28 = vld [vmem:[#allocation2 + $0x30] sm:$0xff]  ;;  %v804_v47 = vpop.f32.mrf.mxu0  ;;  %v1040_v51 = vpop.f32.mrf.mxu1  ;;  %v662_v57 = vld [vmem:[#allocation2 + $0x48] sm:$0xff] }
  0xfc   : > { %1084 = vst.msk [vmem:[#allocation2 + $0x8] sm:$0xff] %vm199_vm7, %v1072_v43  ;;  %v1077_v48 = vadd.f32 %v4377_v38, %v862_v28  ;;  %841 = vst.msk [vmem:[#allocation2 + $0x50] sm:$0xff] %vm199_vm7, %v829_v44  ;;  %v827_v49 = vadd.f32 %v804_v47, %v661_v45 }
  0xfd   : > { %v860_v50 = vld [vmem:[#allocation2 + $0x20] sm:$0xff]  ;;  %v4368_v53 = vpop.f32.mrf.mxu0  ;;  %v4378_v56 = vpop.f32.mrf.mxu1  ;;  %v1110_v63 = vld [vmem:[#allocation2 + $0x10] sm:$0xff] }
  0xfe   : > { %1089 = vst.msk [vmem:[#allocation2 + $0x30] sm:$0xff] %vm199_vm7, %v1077_v48  ;;  %v1075_v46 = vadd.f32 %v1040_v51, %v860_v50  ;;  %839 = vst.msk [vmem:[#allocation2 + $0x40] sm:$0xff] %vm199_vm7, %v827_v49  ;;  %v830_v55 = vadd.f32 %v4368_v53, %v664_v52 }
  0xff   : > { %v863_v42 = vld [vmem:[#allocation2 + $0x38] sm:$0xff]  ;;  %v807_v58 = vpop.f32.mrf.mxu0  ;;  %v1043_v62 = vpop.f32.mrf.mxu1  ;;  %v1108_v25 = vld [vmem:[#allocation2] sm:$0xff] }
 0x100   : > { %1087 = vst.msk [vmem:[#allocation2 + $0x20] sm:$0xff] %vm199_vm7, %v1075_v46  ;;  %v1078_v59 = vadd.f32 %v4378_v56, %v863_v42  ;;  %842 = vst.msk [vmem:[#allocation2 + $0x58] sm:$0xff] %vm199_vm7, %v830_v55  ;;  %v828_v60 = vadd.f32 %v807_v58, %v662_v57 }
 0x101   : > { %v861_v61 = vld [vmem:[#allocation2 + $0x28] sm:$0xff]  ;;  %v4387_v1 = vpop.f32.mrf.mxu0  ;;  %v4381_v2 = vpop.f32.mrf.mxu1  ;;  %v1111_v12 = vld [vmem:[#allocation2 + $0x18] sm:$0xff] }
 0x102   : > { %1090 = vst.msk [vmem:[#allocation2 + $0x38] sm:$0xff] %vm199_vm7, %v1078_v59  ;;  %v1076_v3 = vadd.f32 %v1043_v62, %v861_v61  ;;  %840 = vst.msk [vmem:[#allocation2 + $0x48] sm:$0xff] %vm199_vm7, %v828_v60  ;;  %v1324_v5 = vadd.f32 %v4387_v1, %v1110_v63 }
 0x103   : > { %v866_v6 = vld [vmem:[#allocation2 + $0x50] sm:$0xff]  ;;  %v1275_v7 = vpop.f32.mrf.mxu0  ;;  %v1056_v11 = vpop.f32.mrf.mxu1  ;;  %v1109_v16 = vld [vmem:[#allocation2 + $0x8] sm:$0xff] }
 0x104   : > { %1088 = vst.msk [vmem:[#allocation2 + $0x28] sm:$0xff] %vm199_vm7, %v1076_v3  ;;  %v1081_v8 = vadd.f32 %v4381_v2, %v866_v6  ;;  %1336 = vst.msk [vmem:[#allocation2 + $0x10] sm:$0xff] %vm199_vm7, %v1324_v5  ;;  %v1322_v9 = vadd.f32 %v1275_v7, %v1108_v25 }
 0x105   : > { %v864_v10 = vld [vmem:[#allocation2 + $0x40] sm:$0xff]  ;;  %v4388_v13 = vpop.f32.mrf.mxu0  ;;  %v4382_v15 = vpop.f32.mrf.mxu1  ;;  %v1114_v22 = vld [vmem:[#allocation2 + $0x30] sm:$0xff] }
 0x106   : > { %1093 = vst.msk [vmem:[#allocation2 + $0x50] sm:$0xff] %vm199_vm7, %v1081_v8  ;;  %v1079_v14 = vadd.f32 %v1056_v11, %v864_v10  ;;  %1334 = vst.msk [vmem:[#allocation2] sm:$0xff] %vm199_vm7, %v1322_v9  ;;  %v1325_v54 = vadd.f32 %v4388_v13, %v1111_v12 }
 0x107   : > { %v867_v0 = vld [vmem:[#allocation2 + $0x58] sm:$0xff]  ;;  %v1278_v17 = vpop.f32.mrf.mxu0  ;;  %v1059_v21 = vpop.f32.mrf.mxu1  ;;  %v1112_v30 = vld [vmem:[#allocation2 + $0x20] sm:$0xff] }
 0x108   : > { %1091 = vst.msk [vmem:[#allocation2 + $0x40] sm:$0xff] %vm199_vm7, %v1079_v14  ;;  %v1082_v18 = vadd.f32 %v4382_v15, %v867_v0  ;;  %1337 = vst.msk [vmem:[#allocation2 + $0x18] sm:$0xff] %vm199_vm7, %v1325_v54  ;;  %v1323_v19 = vadd.f32 %v1278_v17, %v1109_v16 }
 0x109   : > { %v865_v20 = vld [vmem:[#allocation2 + $0x48] sm:$0xff]  ;;  %v4391_v23 = vpop.f32.mrf.mxu0  ;;  %v4401_v29 = vpop.f32.mrf.mxu1  ;;  %v1115_v35 = vld [vmem:[#allocation2 + $0x38] sm:$0xff] }
 0x10a   : > { %1094 = vst.msk [vmem:[#allocation2 + $0x58] sm:$0xff] %vm199_vm7, %v1082_v18  ;;  %v1080_v24 = vadd.f32 %v1059_v21, %v865_v20  ;;  %1335 = vst.msk [vmem:[#allocation2 + $0x8] sm:$0xff] %vm199_vm7, %v1323_v19  ;;  %v1328_v26 = vadd.f32 %v4391_v23, %v1114_v22 }
 0x10b   : > { %v1361_v27 = vld [vmem:[#allocation2 + $0x10] sm:$0xff]  ;;  %v1291_v31 = vpop.f32.mrf.mxu0  ;;  %v1478_v34 = vpop.f32.mrf.mxu1  ;;  %v1113_v43 = vld [vmem:[#allocation2 + $0x28] sm:$0xff] }
 0x10c   : > { %1092 = vst.msk [vmem:[#allocation2 + $0x48] sm:$0xff] %vm199_vm7, %v1080_v24  ;;  %v1527_v32 = vadd.f32 %v4401_v29, %v1361_v27  ;;  %1340 = vst.msk [vmem:[#allocation2 + $0x30] sm:$0xff] %vm199_vm7, %v1328_v26  ;;  %v1326_v33 = vadd.f32 %v1291_v31, %v1112_v30 }
 0x10d   : > { %v1359_v4 = vld [vmem:[#allocation2] sm:$0xff]  ;;  %v4392_v36 = vpop.f32.mrf.mxu0  ;;  %v4402_v41 = vpop.f32.mrf.mxu1  ;;  %v1118_v48 = vld [vmem:[#allocation2 + $0x50] sm:$0xff] }
 0x10e   : > { %1539 = vst.msk [vmem:[#allocation2 + $0x10] sm:$0xff] %vm199_vm7, %v1527_v32  ;;  %v1525_v37 = vadd.f32 %v1478_v34, %v1359_v4  ;;  %1338 = vst.msk [vmem:[#allocation2 + $0x20] sm:$0xff] %vm199_vm7, %v1326_v33  ;;  %v1329_v39 = vadd.f32 %v4392_v36, %v1115_v35 }
 0x10f   : > { %v1362_v40 = vld [vmem:[#allocation2 + $0x18] sm:$0xff]  ;;  %v1294_v44 = vpop.f32.mrf.mxu0  ;;  %v1481_v47 = vpop.f32.mrf.mxu1  ;;  %v1116_v46 = vld [vmem:[#allocation2 + $0x40] sm:$0xff] }
 0x110   : > { %1537 = vst.msk [vmem:[#allocation2] sm:$0xff] %vm199_vm7, %v1525_v37  ;;  %v1528_v28 = vadd.f32 %v4402_v41, %v1362_v40  ;;  %1341 = vst.msk [vmem:[#allocation2 + $0x38] sm:$0xff] %vm199_vm7, %v1329_v39  ;;  %v1327_v38 = vadd.f32 %v1294_v44, %v1113_v43 }
 0x111   : > { %v1360_v45 = vld [vmem:[#allocation2 + $0x8] sm:$0xff]  ;;  %v4395_v49 = vpop.f32.mrf.mxu0  ;;  %v4405_v53 = vpop.f32.mrf.mxu1  ;;  %v1119_v59 = vld [vmem:[#allocation2 + $0x58] sm:$0xff] }
 0x112   : > { %1540 = vst.msk [vmem:[#allocation2 + $0x18] sm:$0xff] %vm199_vm7, %v1528_v28  ;;  %v1526_v50 = vadd.f32 %v1481_v47, %v1360_v45  ;;  %1339 = vst.msk [vmem:[#allocation2 + $0x28] sm:$0xff] %vm199_vm7, %v1327_v38  ;;  %v1332_v51 = vadd.f32 %v4395_v49, %v1118_v48 }
 0x113   : > { %v1365_v52 = vld [vmem:[#allocation2 + $0x30] sm:$0xff]  ;;  %v1307_v55 = vpop.f32.mrf.mxu0  ;;  %v1494_v58 = vpop.f32.mrf.mxu1  ;;  %v1117_v3 = vld [vmem:[#allocation2 + $0x48] sm:$0xff] }
 0x114   : > { %1538 = vst.msk [vmem:[#allocation2 + $0x8] sm:$0xff] %vm199_vm7, %v1526_v50  ;;  %v1531_v42 = vadd.f32 %v4405_v53, %v1365_v52  ;;  %1344 = vst.msk [vmem:[#allocation2 + $0x50] sm:$0xff] %vm199_vm7, %v1332_v51  ;;  %v1330_v56 = vadd.f32 %v1307_v55, %v1116_v46 }
 0x115   : > { %v1363_v57 = vld [vmem:[#allocation2 + $0x20] sm:$0xff]  ;;  %v4396_v60 = vpop.f32.mrf.mxu0  ;;  %v4406_v1 = vpop.f32.mrf.mxu1  ;;  %v1564_v8 = vld [vmem:[#allocation2 + $0x10] sm:$0xff] }
 0x116   : > { %1543 = vst.msk [vmem:[#allocation2 + $0x30] sm:$0xff] %vm199_vm7, %v1531_v42  ;;  %v1529_v61 = vadd.f32 %v1494_v58, %v1363_v57  ;;  %1342 = vst.msk [vmem:[#allocation2 + $0x40] sm:$0xff] %vm199_vm7, %v1330_v56  ;;  %v1333_v62 = vadd.f32 %v4396_v60, %v1119_v59 }
 0x117   : > { %v1366_v63 = vld [vmem:[#allocation2 + $0x38] sm:$0xff]  ;;  %v1310_v5 = vpop.f32.mrf.mxu0  ;;  %v1497_v7 = vpop.f32.mrf.mxu1  ;;  %v1562_v14 = vld [vmem:[#allocation2] sm:$0xff] }
 0x118   : > { %1541 = vst.msk [vmem:[#allocation2 + $0x20] sm:$0xff] %vm199_vm7, %v1529_v61  ;;  %v1532_v6 = vadd.f32 %v4406_v1, %v1366_v63  ;;  %1345 = vst.msk [vmem:[#allocation2 + $0x58] sm:$0xff] %vm199_vm7, %v1333_v62  ;;  %v1331_v2 = vadd.f32 %v1310_v5, %v1117_v3 }
 0x119   : > { %v1364_v25 = vld [vmem:[#allocation2 + $0x28] sm:$0xff]  ;;  %v4415_v9 = vpop.f32.mrf.mxu0  ;;  %v4409_v13 = vpop.f32.mrf.mxu1  ;;  %v1565_v18 = vld [vmem:[#allocation2 + $0x18] sm:$0xff] }
 0x11a   : > { %1544 = vst.msk [vmem:[#allocation2 + $0x38] sm:$0xff] %vm199_vm7, %v1532_v6  ;;  %v1530_v10 = vadd.f32 %v1497_v7, %v1364_v25  ;;  %1343 = vst.msk [vmem:[#allocation2 + $0x48] sm:$0xff] %vm199_vm7, %v1331_v2  ;;  %v1779_v11 = vadd.f32 %v4415_v9, %v1564_v8 }
 0x11b   : > { %v1369_v12 = vld [vmem:[#allocation2 + $0x50] sm:$0xff]  ;;  %v1730_v54 = vpop.f32.mrf.mxu0  ;;  %v1510_v17 = vpop.f32.mrf.mxu1  ;;  %v1563_v24 = vld [vmem:[#allocation2 + $0x8] sm:$0xff] }
 0x11c   : > { %1542 = vst.msk [vmem:[#allocation2 + $0x28] sm:$0xff] %vm199_vm7, %v1530_v10  ;;  %v1535_v0 = vadd.f32 %v4409_v13, %v1369_v12  ;;  %1791 = vst.msk [vmem:[#allocation2 + $0x10] sm:$0xff] %vm199_vm7, %v1779_v11  ;;  %v1777_v15 = vadd.f32 %v1730_v54, %v1562_v14 }
 0x11d   : > { %v1367_v16 = vld [vmem:[#allocation2 + $0x40] sm:$0xff]  ;;  %v4416_v19 = vpop.f32.mrf.mxu0  ;;  %v4410_v23 = vpop.f32.mrf.mxu1  ;;  %v1568_v32 = vld [vmem:[#allocation2 + $0x30] sm:$0xff] }
 0x11e   : > { %1547 = vst.msk [vmem:[#allocation2 + $0x50] sm:$0xff] %vm199_vm7, %v1535_v0  ;;  %v1533_v20 = vadd.f32 %v1510_v17, %v1367_v16  ;;  %1789 = vst.msk [vmem:[#allocation2] sm:$0xff] %vm199_vm7, %v1777_v15  ;;  %v1780_v21 = vadd.f32 %v4416_v19, %v1565_v18 }
 0x11f   : > { %v1370_v22 = vld [vmem:[#allocation2 + $0x58] sm:$0xff]  ;;  %v1733_v26 = vpop.f32.mrf.mxu0  ;;  %v1513_v31 = vpop.f32.mrf.mxu1  ;;  %v1566_v37 = vld [vmem:[#allocation2 + $0x20] sm:$0xff] }
 0x120   : > { %1545 = vst.msk [vmem:[#allocation2 + $0x40] sm:$0xff] %vm199_vm7, %v1533_v20  ;;  %v1536_v27 = vadd.f32 %v4410_v23, %v1370_v22  ;;  %1792 = vst.msk [vmem:[#allocation2 + $0x18] sm:$0xff] %vm199_vm7, %v1780_v21  ;;  %v1778_v29 = vadd.f32 %v1733_v26, %v1563_v24 }
 0x121   : > { %v1368_v30 = vld [vmem:[#allocation2 + $0x48] sm:$0xff]  ;;  %v4419_v33 = vpop.f32.mrf.mxu0  ;;  %v4429_v36 = vpop.f32.mrf.mxu1  ;;  %v1569_v28 = vld [vmem:[#allocation2 + $0x38] sm:$0xff] }
 0x122   : > { %1548 = vst.msk [vmem:[#allocation2 + $0x58] sm:$0xff] %vm199_vm7, %v1536_v27  ;;  %v1534_v4 = vadd.f32 %v1513_v31, %v1368_v30  ;;  %1790 = vst.msk [vmem:[#allocation2 + $0x8] sm:$0xff] %vm199_vm7, %v1778_v29  ;;  %v1783_v34 = vadd.f32 %v4419_v33, %v1568_v32 }
 0x123   : > { %v1816_v35 = vld [vmem:[#allocation2 + $0x10] sm:$0xff]  ;;  %v1746_v39 = vpop.f32.mrf.mxu0  ;;  %v1933_v44 = vpop.f32.mrf.mxu1  ;;  %v1567_v50 = vld [vmem:[#allocation2 + $0x28] sm:$0xff] }
 0x124   : > { %1546 = vst.msk [vmem:[#allocation2 + $0x48] sm:$0xff] %vm199_vm7, %v1534_v4  ;;  %v1982_v40 = vadd.f32 %v4429_v36, %v1816_v35  ;;  %1795 = vst.msk [vmem:[#allocation2 + $0x30] sm:$0xff] %vm199_vm7, %v1783_v34  ;;  %v1781_v41 = vadd.f32 %v1746_v39, %v1566_v37 }
 0x125   : > { %v1814_v43 = vld [vmem:[#allocation2] sm:$0xff]  ;;  %v4420_v38 = vpop.f32.mrf.mxu0  ;;  %v4430_v49 = vpop.f32.mrf.mxu1  ;;  %v1572_v42 = vld [vmem:[#allocation2 + $0x50] sm:$0xff] }
 0x126   : > { %1994 = vst.msk [vmem:[#allocation2 + $0x10] sm:$0xff] %vm199_vm7, %v1982_v40  ;;  %v1980_v45 = vadd.f32 %v1933_v44, %v1814_v43  ;;  %1793 = vst.msk [vmem:[#allocation2 + $0x20] sm:$0xff] %vm199_vm7, %v1781_v41  ;;  %v1784_v47 = vadd.f32 %v4420_v38, %v1569_v28 }
 0x127   : > { %v1817_v48 = vld [vmem:[#allocation2 + $0x18] sm:$0xff]  ;;  %v1749_v51 = vpop.f32.mrf.mxu0  ;;  %v1936_v55 = vpop.f32.mrf.mxu1  ;;  %v1570_v61 = vld [vmem:[#allocation2 + $0x40] sm:$0xff] }
 0x128   : > { %1992 = vst.msk [vmem:[#allocation2] sm:$0xff] %vm199_vm7, %v1980_v45  ;;  %v1983_v52 = vadd.f32 %v4430_v49, %v1817_v48  ;;  %1796 = vst.msk [vmem:[#allocation2 + $0x38] sm:$0xff] %vm199_vm7, %v1784_v47  ;;  %v1782_v53 = vadd.f32 %v1749_v51, %v1567_v50 }
 0x129   : > { %v1815_v46 = vld [vmem:[#allocation2 + $0x8] sm:$0xff]  ;;  %v4423_v56 = vpop.f32.mrf.mxu0  ;;  %v4433_v60 = vpop.f32.mrf.mxu1  ;;  %v1573_v6 = vld [vmem:[#allocation2 + $0x58] sm:$0xff] }
 0x12a   : > { %1995 = vst.msk [vmem:[#allocation2 + $0x18] sm:$0xff] %vm199_vm7, %v1983_v52  ;;  %v1981_v57 = vadd.f32 %v1936_v55, %v1815_v46  ;;  %1794 = vst.msk [vmem:[#allocation2 + $0x28] sm:$0xff] %vm199_vm7, %v1782_v53  ;;  %v1787_v58 = vadd.f32 %v4423_v56, %v1572_v42 }
 0x12b   : > { %v1820_v59 = vld [vmem:[#allocation2 + $0x30] sm:$0xff]  ;;  %v1762_v62 = vpop.f32.mrf.mxu0  ;;  %v1949_v5 = vpop.f32.mrf.mxu1  ;;  %v1571_v10 = vld [vmem:[#allocation2 + $0x48] sm:$0xff] }
 0x12c   : > { %1993 = vst.msk [vmem:[#allocation2 + $0x8] sm:$0xff] %vm199_vm7, %v1981_v57  ;;  %v1986_v63 = vadd.f32 %v4433_v60, %v1820_v59  ;;  %1799 = vst.msk [vmem:[#allocation2 + $0x50] sm:$0xff] %vm199_vm7, %v1787_v58  ;;  %v1785_v1 = vadd.f32 %v1762_v62, %v1570_v61 }
 0x12d   : > { %v1818_v3 = vld [vmem:[#allocation2 + $0x20] sm:$0xff]  ;;  %v4424_v2 = vpop.f32.mrf.mxu0  ;;  %v4434_v9 = vpop.f32.mrf.mxu1  ;;  %v2019_v0 = vld [vmem:[#allocation2 + $0x10] sm:$0xff] }
 0x12e   : > { %1998 = vst.msk [vmem:[#allocation2 + $0x30] sm:$0xff] %vm199_vm7, %v1986_v63  ;;  %v1984_v25 = vadd.f32 %v1949_v5, %v1818_v3  ;;  %1797 = vst.msk [vmem:[#allocation2 + $0x40] sm:$0xff] %vm199_vm7, %v1785_v1  ;;  %v1788_v7 = vadd.f32 %v4424_v2, %v1573_v6 }
 0x12f   : > { %v1821_v8 = vld [vmem:[#allocation2 + $0x38] sm:$0xff]  ;;  %v1765_v11 = vpop.f32.mrf.mxu0  ;;  %v1952_v54 = vpop.f32.mrf.mxu1  ;;  %v2017_v20 = vld [vmem:[#allocation2] sm:$0xff] }
 0x130   : > { %1996 = vst.msk [vmem:[#allocation2 + $0x20] sm:$0xff] %vm199_vm7, %v1984_v25  ;;  %v1987_v12 = vadd.f32 %v4434_v9, %v1821_v8  ;;  %1800 = vst.msk [vmem:[#allocation2 + $0x58] sm:$0xff] %vm199_vm7, %v1788_v7  ;;  %v1786_v13 = vadd.f32 %v1765_v11, %v1571_v10 }
 0x131   : > { %v1819_v14 = vld [vmem:[#allocation2 + $0x28] sm:$0xff]  ;;  %v4443_v15 = vpop.f32.mrf.mxu0  ;;  %v4437_v19 = vpop.f32.mrf.mxu1  ;;  %v2020_v27 = vld [vmem:[#allocation2 + $0x18] sm:$0xff] }
 0x132   : > { %1999 = vst.msk [vmem:[#allocation2 + $0x38] sm:$0xff] %vm199_vm7, %v1987_v12  ;;  %v1985_v16 = vadd.f32 %v1952_v54, %v1819_v14  ;;  %1798 = vst.msk [vmem:[#allocation2 + $0x48] sm:$0xff] %vm199_vm7, %v1786_v13  ;;  %v2184_v17 = vadd.f32 %v4443_v15, %v2019_v0 }
 0x133   : > { %v1824_v18 = vld [vmem:[#allocation2 + $0x50] sm:$0xff]  ;;  %v2135_v21 = vpop.f32.mrf.mxu0  ;;  %v1965_v26 = vpop.f32.mrf.mxu1  ;;  %v2018_v4 = vld [vmem:[#allocation2 + $0x8] sm:$0xff] }
 0x134   : > { %1997 = vst.msk [vmem:[#allocation2 + $0x28] sm:$0xff] %vm199_vm7, %v1985_v16  ;;  %v1990_v22 = vadd.f32 %v4437_v19, %v1824_v18  ;;  %2196 = vst.msk [vmem:[#allocation2 + $0x10] sm:$0xff] %vm199_vm7, %v2184_v17  ;;  %v2182_v23 = vadd.f32 %v2135_v21, %v2017_v20 }
 0x135   : > { %v1822_v24 = vld [vmem:[#allocation2 + $0x40] sm:$0xff]  ;;  %v4444_v29 = vpop.f32.mrf.mxu0  ;;  %v4438_v33 = vpop.f32.mrf.mxu1  ;;  %v2023_v40 = vld [vmem:[#allocation2 + $0x30] sm:$0xff] }
 0x136   : > { %2002 = vst.msk [vmem:[#allocation2 + $0x50] sm:$0xff] %vm199_vm7, %v1990_v22  ;;  %v1988_v30 = vadd.f32 %v1965_v26, %v1822_v24  ;;  %2194 = vst.msk [vmem:[#allocation2] sm:$0xff] %vm199_vm7, %v2182_v23  ;;  %v2185_v31 = vadd.f32 %v4444_v29, %v2020_v27 }
 0x137   : > { %v1825_v32 = vld [vmem:[#allocation2 + $0x58] sm:$0xff]  ;;  %v2138_v34 = vpop.f32.mrf.mxu0  ;;  %v1968_v39 = vpop.f32.mrf.mxu1  ;;  %v2021_v45 = vld [vmem:[#allocation2 + $0x20] sm:$0xff] }
 0x138   : > { %2000 = vst.msk [vmem:[#allocation2 + $0x40] sm:$0xff] %vm199_vm7, %v1988_v30  ;;  %v1991_v35 = vadd.f32 %v4438_v33, %v1825_v32  ;;  %2197 = vst.msk [vmem:[#allocation2 + $0x18] sm:$0xff] %vm199_vm7, %v2185_v31  ;;  %v2183_v36 = vadd.f32 %v2138_v34, %v2018_v4 }
 0x139   : > { %v1823_v37 = vld [vmem:[#allocation2 + $0x48] sm:$0xff]  ;;  %v4447_v41 = vpop.f32.mrf.mxu0  ;;  %v4457_v38 = vpop.f32.mrf.mxu1  ;;  %v2024_v52 = vld [vmem:[#allocation2 + $0x38] sm:$0xff] }
 0x13a   : > { %2003 = vst.msk [vmem:[#allocation2 + $0x58] sm:$0xff] %vm199_vm7, %v1991_v35  ;;  %v1989_v43 = vadd.f32 %v1968_v39, %v1823_v37  ;;  %2195 = vst.msk [vmem:[#allocation2 + $0x8] sm:$0xff] %vm199_vm7, %v2183_v36  ;;  %v2188_v44 = vadd.f32 %v4447_v41, %v2023_v40 }
 0x13b   : > { %v2221_v28 = vld [vmem:[#allocation2 + $0x10] sm:$0xff]  ;;  %v2151_v47 = vpop.f32.mrf.mxu0  ;;  %v2387_v51 = vpop.f32.mrf.mxu1  ;;  %v2022_v57 = vld [vmem:[#allocation2 + $0x28] sm:$0xff] }
 0x13c   : > { %2001 = vst.msk [vmem:[#allocation2 + $0x48] sm:$0xff] %vm199_vm7, %v1989_v43  ;;  %v2436_v48 = vadd.f32 %v4457_v38, %v2221_v28  ;;  %2200 = vst.msk [vmem:[#allocation2 + $0x30] sm:$0xff] %vm199_vm7, %v2188_v44  ;;  %v2186_v49 = vadd.f32 %v2151_v47, %v2021_v45 }
 0x13d   : > { %v2219_v50 = vld [vmem:[#allocation2] sm:$0xff]  ;;  %v4448_v53 = vpop.f32.mrf.mxu0  ;;  %v4458_v56 = vpop.f32.mrf.mxu1  ;;  %v2027_v63 = vld [vmem:[#allocation2 + $0x50] sm:$0xff] }
 0x13e   : > { %2448 = vst.msk [vmem:[#allocation2 + $0x10] sm:$0xff] %vm199_vm7, %v2436_v48  ;;  %v2434_v46 = vadd.f32 %v2387_v51, %v2219_v50  ;;  %2198 = vst.msk [vmem:[#allocation2 + $0x20] sm:$0xff] %vm199_vm7, %v2186_v49  ;;  %v2189_v55 = vadd.f32 %v4448_v53, %v2024_v52 }
 0x13f   : > { %v2222_v42 = vld [vmem:[#allocation2 + $0x18] sm:$0xff]  ;;  %v2154_v58 = vpop.f32.mrf.mxu0  ;;  %v2390_v62 = vpop.f32.mrf.mxu1  ;;  %v2025_v25 = vld [vmem:[#allocation2 + $0x40] sm:$0xff] }
 0x140   : > { %2446 = vst.msk [vmem:[#allocation2] sm:$0xff] %vm199_vm7, %v2434_v46  ;;  %v2437_v59 = vadd.f32 %v4458_v56, %v2222_v42  ;;  %2201 = vst.msk [vmem:[#allocation2 + $0x38] sm:$0xff] %vm199_vm7, %v2189_v55  ;;  %v2187_v60 = vadd.f32 %v2154_v58, %v2022_v57 }
 0x141   : > { %v2220_v61 = vld [vmem:[#allocation2 + $0x8] sm:$0xff]  ;;  %v4451_v1 = vpop.f32.mrf.mxu0  ;;  %v4461_v2 = vpop.f32.mrf.mxu1  ;;  %v2028_v12 = vld [vmem:[#allocation2 + $0x58] sm:$0xff] }
 0x142   : > { %2449 = vst.msk [vmem:[#allocation2 + $0x18] sm:$0xff] %vm199_vm7, %v2437_v59  ;;  %v2435_v3 = vadd.f32 %v2390_v62, %v2220_v61  ;;  %2199 = vst.msk [vmem:[#allocation2 + $0x28] sm:$0xff] %vm199_vm7, %v2187_v60  ;;  %v2192_v5 = vadd.f32 %v4451_v1, %v2027_v63 }
 0x143   : > { %v2225_v6 = vld [vmem:[#allocation2 + $0x30] sm:$0xff]  ;;  %v2167_v7 = vpop.f32.mrf.mxu0  ;;  %v2403_v11 = vpop.f32.mrf.mxu1  ;;  %v2026_v16 = vld [vmem:[#allocation2 + $0x48] sm:$0xff] }
 0x144   : > { %2447 = vst.msk [vmem:[#allocation2 + $0x8] sm:$0xff] %vm199_vm7, %v2435_v3  ;;  %v2440_v8 = vadd.f32 %v4461_v2, %v2225_v6  ;;  %2204 = vst.msk [vmem:[#allocation2 + $0x50] sm:$0xff] %vm199_vm7, %v2192_v5  ;;  %v2190_v9 = vadd.f32 %v2167_v7, %v2025_v25 }
 0x145   : > { %v2223_v10 = vld [vmem:[#allocation2 + $0x20] sm:$0xff]  ;;  %v4452_v13 = vpop.f32.mrf.mxu0  ;;  %v4462_v15 = vpop.f32.mrf.mxu1  ;;  %v2472_v22 = vld [vmem:[#allocation2 + $0x10] sm:$0xff] }
 0x146   : > { %2452 = vst.msk [vmem:[#allocation2 + $0x30] sm:$0xff] %vm199_vm7, %v2440_v8  ;;  %v2438_v14 = vadd.f32 %v2403_v11, %v2223_v10  ;;  %2202 = vst.msk [vmem:[#allocation2 + $0x40] sm:$0xff] %vm199_vm7, %v2190_v9  ;;  %v2193_v54 = vadd.f32 %v4452_v13, %v2028_v12 }
 0x147   : > { %v2226_v0 = vld [vmem:[#allocation2 + $0x38] sm:$0xff]  ;;  %v2170_v17 = vpop.f32.mrf.mxu0  ;;  %v2406_v21 = vpop.f32.mrf.mxu1  ;;  %v2470_v30 = vld [vmem:[#allocation2] sm:$0xff] }
 0x148   : > { %2450 = vst.msk [vmem:[#allocation2 + $0x20] sm:$0xff] %vm199_vm7, %v2438_v14  ;;  %v2441_v18 = vadd.f32 %v4462_v15, %v2226_v0  ;;  %2205 = vst.msk [vmem:[#allocation2 + $0x58] sm:$0xff] %vm199_vm7, %v2193_v54  ;;  %v2191_v19 = vadd.f32 %v2170_v17, %v2026_v16 }
 0x149   : > { %v2224_v20 = vld [vmem:[#allocation2 + $0x28] sm:$0xff]  ;;  %v4471_v23 = vpop.f32.mrf.mxu0  ;;  %v4465_v29 = vpop.f32.mrf.mxu1  ;;  %v2473_v35 = vld [vmem:[#allocation2 + $0x18] sm:$0xff] }
 0x14a   : > { %2453 = vst.msk [vmem:[#allocation2 + $0x38] sm:$0xff] %vm199_vm7, %v2441_v18  ;;  %v2439_v24 = vadd.f32 %v2406_v21, %v2224_v20  ;;  %2203 = vst.msk [vmem:[#allocation2 + $0x48] sm:$0xff] %vm199_vm7, %v2191_v19  ;;  %v2621_v26 = vadd.f32 %v4471_v23, %v2472_v22 }
 0x14b   : > { %v2229_v27 = vld [vmem:[#allocation2 + $0x50] sm:$0xff]  ;;  %v2572_v31 = vpop.f32.mrf.mxu0  ;;  %v2419_v34 = vpop.f32.mrf.mxu1  ;;  %v2471_v43 = vld [vmem:[#allocation2 + $0x8] sm:$0xff] }
 0x14c   : > { %2451 = vst.msk [vmem:[#allocation2 + $0x28] sm:$0xff] %vm199_vm7, %v2439_v24  ;;  %v2444_v32 = vadd.f32 %v4465_v29, %v2229_v27  ;;  %2633 = vst.msk [vmem:[#allocation2 + $0x10] sm:$0xff] %vm199_vm7, %v2621_v26  ;;  %v2619_v33 = vadd.f32 %v2572_v31, %v2470_v30 }
 0x14d   : > { %v2227_v4 = vld [vmem:[#allocation2 + $0x40] sm:$0xff]  ;;  %v4472_v36 = vpop.f32.mrf.mxu0  ;;  %v4466_v41 = vpop.f32.mrf.mxu1  ;;  %v2476_v48 = vld [vmem:[#allocation2 + $0x30] sm:$0xff] }
 0x14e   : > { %2456 = vst.msk [vmem:[#allocation2 + $0x50] sm:$0xff] %vm199_vm7, %v2444_v32  ;;  %v2442_v37 = vadd.f32 %v2419_v34, %v2227_v4  ;;  %2631 = vst.msk [vmem:[#allocation2] sm:$0xff] %vm199_vm7, %v2619_v33  ;;  %v2622_v39 = vadd.f32 %v4472_v36, %v2473_v35 }
 0x14f   : > { %v2230_v40 = vld [vmem:[#allocation2 + $0x58] sm:$0xff]  ;;  %v2575_v44 = vpop.f32.mrf.mxu0  ;;  %v2422_v47 = vpop.f32.mrf.mxu1  ;;  %v2474_v46 = vld [vmem:[#allocation2 + $0x20] sm:$0xff] }
 0x150   : > { %2454 = vst.msk [vmem:[#allocation2 + $0x40] sm:$0xff] %vm199_vm7, %v2442_v37  ;;  %v2445_v28 = vadd.f32 %v4466_v41, %v2230_v40  ;;  %2634 = vst.msk [vmem:[#allocation2 + $0x18] sm:$0xff] %vm199_vm7, %v2622_v39  ;;  %v2620_v38 = vadd.f32 %v2575_v44, %v2471_v43 }
 0x151   : > { %v2228_v45 = vld [vmem:[#allocation2 + $0x48] sm:$0xff]  ;;  %v4475_v49 = vpop.f32.mrf.mxu0  ;;  %v4485_v53 = vpop.f32.mrf.mxu1  ;;  %v2477_v59 = vld [vmem:[#allocation2 + $0x38] sm:$0xff] }
 0x152   : > { %2457 = vst.msk [vmem:[#allocation2 + $0x58] sm:$0xff] %vm199_vm7, %v2445_v28  ;;  %v2443_v50 = vadd.f32 %v2422_v47, %v2228_v45  ;;  %2632 = vst.msk [vmem:[#allocation2 + $0x8] sm:$0xff] %vm199_vm7, %v2620_v38  ;;  %v2625_v51 = vadd.f32 %v4475_v49, %v2476_v48 }
 0x153   : > { %v2658_v52 = vld [vmem:[#allocation2 + $0x10] sm:$0xff]  ;;  %v2588_v55 = vpop.f32.mrf.mxu0  ;;  %v2813_v58 = vpop.f32.mrf.mxu1  ;;  %v2475_v3 = vld [vmem:[#allocation2 + $0x28] sm:$0xff] }
 0x154   : > { %2455 = vst.msk [vmem:[#allocation2 + $0x48] sm:$0xff] %vm199_vm7, %v2443_v50  ;;  %v2862_v42 = vadd.f32 %v4485_v53, %v2658_v52  ;;  %2637 = vst.msk [vmem:[#allocation2 + $0x30] sm:$0xff] %vm199_vm7, %v2625_v51  ;;  %v2623_v56 = vadd.f32 %v2588_v55, %v2474_v46 }
 0x155   : > { %v2656_v57 = vld [vmem:[#allocation2] sm:$0xff]  ;;  %v4476_v60 = vpop.f32.mrf.mxu0  ;;  %v4486_v1 = vpop.f32.mrf.mxu1  ;;  %v2480_v8 = vld [vmem:[#allocation2 + $0x50] sm:$0xff] }
 0x156   : > { %2874 = vst.msk [vmem:[#allocation2 + $0x10] sm:$0xff] %vm199_vm7, %v2862_v42  ;;  %v2860_v61 = vadd.f32 %v2813_v58, %v2656_v57  ;;  %2635 = vst.msk [vmem:[#allocation2 + $0x20] sm:$0xff] %vm199_vm7, %v2623_v56  ;;  %v2626_v62 = vadd.f32 %v4476_v60, %v2477_v59 }
 0x157   : > { %v2659_v63 = vld [vmem:[#allocation2 + $0x18] sm:$0xff]  ;;  %v2591_v5 = vpop.f32.mrf.mxu0  ;;  %v2816_v7 = vpop.f32.mrf.mxu1  ;;  %v2478_v14 = vld [vmem:[#allocation2 + $0x40] sm:$0xff] }
 0x158   : > { %2872 = vst.msk [vmem:[#allocation2] sm:$0xff] %vm199_vm7, %v2860_v61  ;;  %v2863_v6 = vadd.f32 %v4486_v1, %v2659_v63  ;;  %2638 = vst.msk [vmem:[#allocation2 + $0x38] sm:$0xff] %vm199_vm7, %v2626_v62  ;;  %v2624_v2 = vadd.f32 %v2591_v5, %v2475_v3 }
 0x159   : > { %v2657_v25 = vld [vmem:[#allocation2 + $0x8] sm:$0xff]  ;;  %v4479_v9 = vpop.f32.mrf.mxu0  ;;  %v4489_v13 = vpop.f32.mrf.mxu1  ;;  %v2481_v18 = vld [vmem:[#allocation2 + $0x58] sm:$0xff] }
 0x15a   : > { %2875 = vst.msk [vmem:[#allocation2 + $0x18] sm:$0xff] %vm199_vm7, %v2863_v6  ;;  %v2861_v10 = vadd.f32 %v2816_v7, %v2657_v25  ;;  %2636 = vst.msk [vmem:[#allocation2 + $0x28] sm:$0xff] %vm199_vm7, %v2624_v2  ;;  %v2629_v11 = vadd.f32 %v4479_v9, %v2480_v8 }
 0x15b   : > { %v2662_v12 = vld [vmem:[#allocation2 + $0x30] sm:$0xff]  ;;  %v2604_v54 = vpop.f32.mrf.mxu0  ;;  %v2829_v17 = vpop.f32.mrf.mxu1  ;;  %v2479_v24 = vld [vmem:[#allocation2 + $0x48] sm:$0xff] }
 0x15c   : > { %2873 = vst.msk [vmem:[#allocation2 + $0x8] sm:$0xff] %vm199_vm7, %v2861_v10  ;;  %v2866_v0 = vadd.f32 %v4489_v13, %v2662_v12  ;;  %2641 = vst.msk [vmem:[#allocation2 + $0x50] sm:$0xff] %vm199_vm7, %v2629_v11  ;;  %v2627_v15 = vadd.f32 %v2604_v54, %v2478_v14 }
 0x15d   : > { %v2660_v16 = vld [vmem:[#allocation2 + $0x20] sm:$0xff]  ;;  %v4480_v19 = vpop.f32.mrf.mxu0  ;;  %v4490_v23 = vpop.f32.mrf.mxu1  ;;  %v2899_v32 = vld [vmem:[#allocation2 + $0x10] sm:$0xff] }
 0x15e   : > { %2878 = vst.msk [vmem:[#allocation2 + $0x30] sm:$0xff] %vm199_vm7, %v2866_v0  ;;  %v2864_v20 = vadd.f32 %v2829_v17, %v2660_v16  ;;  %2639 = vst.msk [vmem:[#allocation2 + $0x40] sm:$0xff] %vm199_vm7, %v2627_v15  ;;  %v2630_v21 = vadd.f32 %v4480_v19, %v2481_v18 }
 0x15f   : > { %v2663_v22 = vld [vmem:[#allocation2 + $0x38] sm:$0xff]  ;;  %v2607_v26 = vpop.f32.mrf.mxu0  ;;  %v2832_v31 = vpop.f32.mrf.mxu1  ;;  %v2897_v37 = vld [vmem:[#allocation2] sm:$0xff] }
 0x160   : > { %2876 = vst.msk [vmem:[#allocation2 + $0x20] sm:$0xff] %vm199_vm7, %v2864_v20  ;;  %v2867_v27 = vadd.f32 %v4490_v23, %v2663_v22  ;;  %2642 = vst.msk [vmem:[#allocation2 + $0x58] sm:$0xff] %vm199_vm7, %v2630_v21  ;;  %v2628_v29 = vadd.f32 %v2607_v26, %v2479_v24 }
 0x161   : > { %v2661_v30 = vld [vmem:[#allocation2 + $0x28] sm:$0xff]  ;;  %v4499_v33 = vpop.f32.mrf.mxu0  ;;  %v4493_v36 = vpop.f32.mrf.mxu1  ;;  %v2900_v28 = vld [vmem:[#allocation2 + $0x18] sm:$0xff] }
 0x162   : > { %2879 = vst.msk [vmem:[#allocation2 + $0x38] sm:$0xff] %vm199_vm7, %v2867_v27  ;;  %v2865_v4 = vadd.f32 %v2832_v31, %v2661_v30  ;;  %2640 = vst.msk [vmem:[#allocation2 + $0x48] sm:$0xff] %vm199_vm7, %v2628_v29  ;;  %v3103_v34 = vadd.f32 %v4499_v33, %v2899_v32 }
 0x163   : > { %v2666_v35 = vld [vmem:[#allocation2 + $0x50] sm:$0xff]  ;;  %v3054_v39 = vpop.f32.mrf.mxu0  ;;  %v2845_v44 = vpop.f32.mrf.mxu1  ;;  %v2898_v50 = vld [vmem:[#allocation2 + $0x8] sm:$0xff] }
 0x164   : > { %2877 = vst.msk [vmem:[#allocation2 + $0x28] sm:$0xff] %vm199_vm7, %v2865_v4  ;;  %v2870_v40 = vadd.f32 %v4493_v36, %v2666_v35  ;;  %3115 = vst.msk [vmem:[#allocation2 + $0x10] sm:$0xff] %vm199_vm7, %v3103_v34  ;;  %v3101_v41 = vadd.f32 %v3054_v39, %v2897_v37 }
 0x165   : > { %v2664_v43 = vld [vmem:[#allocation2 + $0x40] sm:$0xff]  ;;  %v4500_v38 = vpop.f32.mrf.mxu0  ;;  %v4494_v49 = vpop.f32.mrf.mxu1  ;;  %v2903_v42 = vld [vmem:[#allocation2 + $0x30] sm:$0xff] }
 0x166   : > { %2882 = vst.msk [vmem:[#allocation2 + $0x50] sm:$0xff] %vm199_vm7, %v2870_v40  ;;  %v2868_v45 = vadd.f32 %v2845_v44, %v2664_v43  ;;  %3113 = vst.msk [vmem:[#allocation2] sm:$0xff] %vm199_vm7, %v3101_v41  ;;  %v3104_v47 = vadd.f32 %v4500_v38, %v2900_v28 }
 0x167   : > { %v2667_v48 = vld [vmem:[#allocation2 + $0x58] sm:$0xff]  ;;  %v3057_v51 = vpop.f32.mrf.mxu0  ;;  %v2848_v55 = vpop.f32.mrf.mxu1  ;;  %v2901_v61 = vld [vmem:[#allocation2 + $0x20] sm:$0xff] }
 0x168   : > { %2880 = vst.msk [vmem:[#allocation2 + $0x40] sm:$0xff] %vm199_vm7, %v2868_v45  ;;  %v2871_v52 = vadd.f32 %v4494_v49, %v2667_v48  ;;  %3116 = vst.msk [vmem:[#allocation2 + $0x18] sm:$0xff] %vm199_vm7, %v3104_v47  ;;  %v3102_v53 = vadd.f32 %v3057_v51, %v2898_v50 }
 0x169   : > { %v2665_v46 = vld [vmem:[#allocation2 + $0x48] sm:$0xff]  ;;  %v4503_v56 = vpop.f32.mrf.mxu0  ;;  %v4513_v60 = vpop.f32.mrf.mxu1  ;;  %v2904_v6 = vld [vmem:[#allocation2 + $0x38] sm:$0xff] }
 0x16a   : > { %2883 = vst.msk [vmem:[#allocation2 + $0x58] sm:$0xff] %vm199_vm7, %v2871_v52  ;;  %v2869_v57 = vadd.f32 %v2848_v55, %v2665_v46  ;;  %3114 = vst.msk [vmem:[#allocation2 + $0x8] sm:$0xff] %vm199_vm7, %v3102_v53  ;;  %v3107_v58 = vadd.f32 %v4503_v56, %v2903_v42 }
 0x16b   : > { %v3140_v59 = vld [vmem:[#allocation2 + $0x10] sm:$0xff]  ;;  %v3070_v62 = vpop.f32.mrf.mxu0  ;;  %v3256_v5 = vpop.f32.mrf.mxu1  ;;  %v2902_v10 = vld [vmem:[#allocation2 + $0x28] sm:$0xff] }
 0x16c   : > { %2881 = vst.msk [vmem:[#allocation2 + $0x48] sm:$0xff] %vm199_vm7, %v2869_v57  ;;  %v3305_v63 = vadd.f32 %v4513_v60, %v3140_v59  ;;  %3119 = vst.msk [vmem:[#allocation2 + $0x30] sm:$0xff] %vm199_vm7, %v3107_v58  ;;  %v3105_v1 = vadd.f32 %v3070_v62, %v2901_v61 }
 0x16d   : > { %v3138_v3 = vld [vmem:[#allocation2] sm:$0xff]  ;;  %v4504_v2 = vpop.f32.mrf.mxu0  ;;  %v4514_v9 = vpop.f32.mrf.mxu1  ;;  %v2907_v0 = vld [vmem:[#allocation2 + $0x50] sm:$0xff] }
 0x16e   : > { %3317 = vst.msk [vmem:[#allocation2 + $0x10] sm:$0xff] %vm199_vm7, %v3305_v63  ;;  %v3303_v25 = vadd.f32 %v3256_v5, %v3138_v3  ;;  %3117 = vst.msk [vmem:[#allocation2 + $0x20] sm:$0xff] %vm199_vm7, %v3105_v1  ;;  %v3108_v7 = vadd.f32 %v4504_v2, %v2904_v6 }
 0x16f   : > { %v3141_v8 = vld [vmem:[#allocation2 + $0x18] sm:$0xff]  ;;  %v3073_v11 = vpop.f32.mrf.mxu0  ;;  %v3259_v54 = vpop.f32.mrf.mxu1  ;;  %v2905_v20 = vld [vmem:[#allocation2 + $0x40] sm:$0xff] }
 0x170   : > { %3315 = vst.msk [vmem:[#allocation2] sm:$0xff] %vm199_vm7, %v3303_v25  ;;  %v3306_v12 = vadd.f32 %v4514_v9, %v3141_v8  ;;  %3120 = vst.msk [vmem:[#allocation2 + $0x38] sm:$0xff] %vm199_vm7, %v3108_v7  ;;  %v3106_v13 = vadd.f32 %v3073_v11, %v2902_v10 }
 0x171   : > { %v3139_v14 = vld [vmem:[#allocation2 + $0x8] sm:$0xff]  ;;  %v4507_v15 = vpop.f32.mrf.mxu0  ;;  %v4517_v19 = vpop.f32.mrf.mxu1  ;;  %v2908_v27 = vld [vmem:[#allocation2 + $0x58] sm:$0xff] }
 0x172   : > { %3318 = vst.msk [vmem:[#allocation2 + $0x18] sm:$0xff] %vm199_vm7, %v3306_v12  ;;  %v3304_v16 = vadd.f32 %v3259_v54, %v3139_v14  ;;  %3118 = vst.msk [vmem:[#allocation2 + $0x28] sm:$0xff] %vm199_vm7, %v3106_v13  ;;  %v3111_v17 = vadd.f32 %v4507_v15, %v2907_v0 }
 0x173   : > { %v3144_v18 = vld [vmem:[#allocation2 + $0x30] sm:$0xff]  ;;  %v3086_v21 = vpop.f32.mrf.mxu0  ;;  %v3272_v26 = vpop.f32.mrf.mxu1  ;;  %v2906_v4 = vld [vmem:[#allocation2 + $0x48] sm:$0xff] }
 0x174   : > { %3316 = vst.msk [vmem:[#allocation2 + $0x8] sm:$0xff] %vm199_vm7, %v3304_v16  ;;  %v3309_v22 = vadd.f32 %v4517_v19, %v3144_v18  ;;  %3123 = vst.msk [vmem:[#allocation2 + $0x50] sm:$0xff] %vm199_vm7, %v3111_v17  ;;  %v3109_v23 = vadd.f32 %v3086_v21, %v2905_v20 }
 0x175   : > { %v3142_v24 = vld [vmem:[#allocation2 + $0x20] sm:$0xff]  ;;  %v4508_v29 = vpop.f32.mrf.mxu0  ;;  %v4518_v33 = vpop.f32.mrf.mxu1  ;;  %v3342_v40 = vld [vmem:[#allocation2 + $0x10] sm:$0xff] }
 0x176   : > { %3321 = vst.msk [vmem:[#allocation2 + $0x30] sm:$0xff] %vm199_vm7, %v3309_v22  ;;  %v3307_v30 = vadd.f32 %v3272_v26, %v3142_v24  ;;  %3121 = vst.msk [vmem:[#allocation2 + $0x40] sm:$0xff] %vm199_vm7, %v3109_v23  ;;  %v3112_v31 = vadd.f32 %v4508_v29, %v2908_v27  ;;  %v5330_v27 = vld [vmem:[%s5409_s2] ss:$0 sm:$0xff] }
 0x177   : > { %v3145_v32 = vld [vmem:[#allocation2 + $0x38] sm:$0xff]  ;;  %v3089_v34 = vpop.f32.mrf.mxu0  ;;  %v3275_v39 = vpop.f32.mrf.mxu1  ;;  %v3340_v45 = vld [vmem:[#allocation2] sm:$0xff] }
 0x178   : > { %3319 = vst.msk [vmem:[#allocation2 + $0x20] sm:$0xff] %vm199_vm7, %v3307_v30  ;;  %v3310_v35 = vadd.f32 %v4518_v33, %v3145_v32  ;;  %3124 = vst.msk [vmem:[#allocation2 + $0x58] sm:$0xff] %vm199_vm7, %v3112_v31  ;;  %v3110_v36 = vadd.f32 %v3089_v34, %v2906_v4  ;;  %v5335_v33 = vld [vmem:[%s5410_s3] ss:$0 sm:$0xff] }
 0x179   : > { %v3143_v37 = vld [vmem:[#allocation2 + $0x28] sm:$0xff]  ;;  %v4527_v41 = vpop.f32.mrf.mxu0  ;;  %v4521_v38 = vpop.f32.mrf.mxu1  ;;  %v3343_v52 = vld [vmem:[#allocation2 + $0x18] sm:$0xff] }
 0x17a   : > { %3322 = vst.msk [vmem:[#allocation2 + $0x38] sm:$0xff] %vm199_vm7, %v3310_v35  ;;  %v3308_v43 = vadd.f32 %v3275_v39, %v3143_v37  ;;  %3122 = vst.msk [vmem:[#allocation2 + $0x48] sm:$0xff] %vm199_vm7, %v3110_v36  ;;  %v3556_v44 = vadd.f32 %v4527_v41, %v3342_v40 }
 0x17b   : > { %v3148_v28 = vld [vmem:[#allocation2 + $0x50] sm:$0xff]  ;;  %v3507_v47 = vpop.f32.mrf.mxu0  ;;  %v3288_v51 = vpop.f32.mrf.mxu1  ;;  %v3341_v57 = vld [vmem:[#allocation2 + $0x8] sm:$0xff] }
 0x17c   : > { %3320 = vst.msk [vmem:[#allocation2 + $0x28] sm:$0xff] %vm199_vm7, %v3308_v43  ;;  %v3313_v48 = vadd.f32 %v4521_v38, %v3148_v28  ;;  %3568 = vst.msk [vmem:[#allocation2 + $0x10] sm:$0xff] %vm199_vm7, %v3556_v44  ;;  %v3554_v49 = vadd.f32 %v3507_v47, %v3340_v45 }
 0x17d   : > { %v3146_v50 = vld [vmem:[#allocation2 + $0x40] sm:$0xff]  ;;  %v4528_v53 = vpop.f32.mrf.mxu0  ;;  %v4522_v56 = vpop.f32.mrf.mxu1  ;;  %v3346_v63 = vld [vmem:[#allocation2 + $0x30] sm:$0xff] }
 0x17e   : > { %3325 = vst.msk [vmem:[#allocation2 + $0x50] sm:$0xff] %vm199_vm7, %v3313_v48  ;;  %v3311_v46 = vadd.f32 %v3288_v51, %v3146_v50  ;;  %3566 = vst.msk [vmem:[#allocation2] sm:$0xff] %vm199_vm7, %v3554_v49  ;;  %v3557_v55 = vadd.f32 %v4528_v53, %v3343_v52 }
 0x17f   : > { %v3149_v42 = vld [vmem:[#allocation2 + $0x58] sm:$0xff]  ;;  %v3510_v58 = vpop.f32.mrf.mxu0  ;;  %v3291_v62 = vpop.f32.mrf.mxu1  ;;  %v3344_v25 = vld [vmem:[#allocation2 + $0x20] sm:$0xff] }
 0x180   : > { %3323 = vst.msk [vmem:[#allocation2 + $0x40] sm:$0xff] %vm199_vm7, %v3311_v46  ;;  %v3314_v59 = vadd.f32 %v4522_v56, %v3149_v42  ;;  %3569 = vst.msk [vmem:[#allocation2 + $0x18] sm:$0xff] %vm199_vm7, %v3557_v55  ;;  %v3555_v60 = vadd.f32 %v3510_v58, %v3341_v57 }
 0x181   : > { %v3147_v61 = vld [vmem:[#allocation2 + $0x48] sm:$0xff]  ;;  %v4531_v1 = vpop.f32.mrf.mxu0  ;;  %v4541_v2 = vpop.f32.mrf.mxu1  ;;  %v3347_v12 = vld [vmem:[#allocation2 + $0x38] sm:$0xff] }
 0x182   : > { %3326 = vst.msk [vmem:[#allocation2 + $0x58] sm:$0xff] %vm199_vm7, %v3314_v59  ;;  %v3312_v3 = vadd.f32 %v3291_v62, %v3147_v61  ;;  %3567 = vst.msk [vmem:[#allocation2 + $0x8] sm:$0xff] %vm199_vm7, %v3555_v60  ;;  %v3560_v5 = vadd.f32 %v4531_v1, %v3346_v63 }
 0x183   : > { %v3593_v6 = vld [vmem:[#allocation2 + $0x10] sm:$0xff]  ;;  %v3523_v7 = vpop.f32.mrf.mxu0  ;;  %v3709_v11 = vpop.f32.mrf.mxu1  ;;  %v3345_v16 = vld [vmem:[#allocation2 + $0x28] sm:$0xff] }
 0x184   : > { %3324 = vst.msk [vmem:[#allocation2 + $0x48] sm:$0xff] %vm199_vm7, %v3312_v3  ;;  %v3758_v8 = vadd.f32 %v4541_v2, %v3593_v6  ;;  %3572 = vst.msk [vmem:[#allocation2 + $0x30] sm:$0xff] %vm199_vm7, %v3560_v5  ;;  %v3558_v9 = vadd.f32 %v3523_v7, %v3344_v25 }
 0x185   : > { %v3591_v10 = vld [vmem:[#allocation2] sm:$0xff]  ;;  %v4532_v13 = vpop.f32.mrf.mxu0  ;;  %v4542_v15 = vpop.f32.mrf.mxu1  ;;  %v3350_v22 = vld [vmem:[#allocation2 + $0x50] sm:$0xff] }
 0x186   : > { %3770 = vst.msk [vmem:[#allocation2 + $0x10] sm:$0xff] %vm199_vm7, %v3758_v8  ;;  %v3756_v14 = vadd.f32 %v3709_v11, %v3591_v10  ;;  %3570 = vst.msk [vmem:[#allocation2 + $0x20] sm:$0xff] %vm199_vm7, %v3558_v9  ;;  %v3561_v54 = vadd.f32 %v4532_v13, %v3347_v12 }
 0x187   : > { %v3594_v0 = vld [vmem:[#allocation2 + $0x18] sm:$0xff]  ;;  %v3526_v17 = vpop.f32.mrf.mxu0  ;;  %v3712_v21 = vpop.f32.mrf.mxu1  ;;  %v3348_v31 = vld [vmem:[#allocation2 + $0x40] sm:$0xff] }
 0x188   : > { %3768 = vst.msk [vmem:[#allocation2] sm:$0xff] %vm199_vm7, %v3756_v14  ;;  %v3759_v18 = vadd.f32 %v4542_v15, %v3594_v0  ;;  %3573 = vst.msk [vmem:[#allocation2 + $0x38] sm:$0xff] %vm199_vm7, %v3561_v54  ;;  %v3559_v19 = vadd.f32 %v3526_v17, %v3345_v16 }
 0x189   : > { %v3592_v20 = vld [vmem:[#allocation2 + $0x8] sm:$0xff]  ;;  %v4535_v23 = vpop.f32.mrf.mxu0  ;;  %v4545_v30 = vpop.f32.mrf.mxu1  ;;  %v3351_v39 = vld [vmem:[#allocation2 + $0x58] sm:$0xff] }
 0x18a   : > { %3771 = vst.msk [vmem:[#allocation2 + $0x18] sm:$0xff] %vm199_vm7, %v3759_v18  ;;  %v3757_v24 = vadd.f32 %v3712_v21, %v3592_v20  ;;  %3571 = vst.msk [vmem:[#allocation2 + $0x28] sm:$0xff] %vm199_vm7, %v3559_v19  ;;  %v3564_v26 = vadd.f32 %v4535_v23, %v3350_v22 }
 0x18b   : > { %v3597_v29 = vld [vmem:[#allocation2 + $0x30] sm:$0xff]  ;;  %v3539_v32 = vpop.f32.mrf.mxu0  ;;  %v3725_v37 = vpop.f32.mrf.mxu1  ;;  %v3349_v47 = vld [vmem:[#allocation2 + $0x48] sm:$0xff] }
 0x18c   : > { %3769 = vst.msk [vmem:[#allocation2 + $0x8] sm:$0xff] %vm199_vm7, %v3757_v24  ;;  %v3762_v4 = vadd.f32 %v4545_v30, %v3597_v29  ;;  %3576 = vst.msk [vmem:[#allocation2 + $0x50] sm:$0xff] %vm199_vm7, %v3564_v26  ;;  %v3562_v34 = vadd.f32 %v3539_v32, %v3348_v31 }
 0x18d   : > { %v3782_v35 = vld [vmem:[#allocation2 + $0x10] sm:$0xff]  ;;  %v3595_v36 = vld [vmem:[#allocation2 + $0x20] sm:$0xff]  ;;  %v4536_v40 = vpop.f32.mrf.mxu0  ;;  %v4546_v45 = vpop.f32.mrf.mxu1 }
 0x18e   : > { %v3801_v41 = vmul.f32 %v5330_v27, %v3782_v35  ;;  %3774 = vst.msk [vmem:[#allocation2 + $0x30] sm:$0xff] %vm199_vm7, %v3762_v4  ;;  %v3760_v43 = vadd.f32 %v3725_v37, %v3595_v36  ;;  %3574 = vst.msk [vmem:[#allocation2 + $0x40] sm:$0xff] %vm199_vm7, %v3562_v34  ;;  %v3565_v44 = vadd.f32 %v4536_v40, %v3351_v39 }
 0x18f   : > { %v3780_v28 = vld [vmem:[#allocation2] sm:$0xff]  ;;  %v3598_v38 = vld [vmem:[#allocation2 + $0x38] sm:$0xff]  ;;  %v3542_v48 = vpop.f32.mrf.mxu0  ;;  %v3728_v55 = vpop.f32.mrf.mxu1 }
 0x190   : > { %v3820_v49 = vadd.f32 %v5335_v33, %v3801_v41  ;;  %v3799_v50 = vmul.f32 %v5330_v27, %v3780_v28  ;;  %3772 = vst.msk [vmem:[#allocation2 + $0x20] sm:$0xff] %vm199_vm7, %v3760_v43  ;;  %v3763_v51 = vadd.f32 %v4546_v45, %v3598_v38  ;;  %3577 = vst.msk [vmem:[#allocation2 + $0x58] sm:$0xff] %vm199_vm7, %v3565_v44 }
 0x191   : > { %v3563_v52 = vadd.f32 %v3542_v48, %v3349_v47  ;;  %v3783_v53 = vld [vmem:[#allocation2 + $0x18] sm:$0xff]  ;;  %v3596_v46 = vld [vmem:[#allocation2 + $0x28] sm:$0xff]  ;;  %v4549_v61 = vpop.f32.mrf.mxu1 }
 0x192   : > { %v3832_v42 = vmax.f32 %v3820_v49, 0.0  ;;  %v3818_v56 = vadd.f32 %v5335_v33, %v3799_v50  ;;  %v3802_v57 = vmul.f32 %v5330_v27, %v3783_v53  ;;  %3775 = vst.msk [vmem:[#allocation2 + $0x38] sm:$0xff] %vm199_vm7, %v3763_v51  ;;  %v3761_v58 = vadd.f32 %v3728_v55, %v3596_v46 }
 0x193   : > { %3575 = vst.msk [vmem:[#allocation2 + $0x48] sm:$0xff] %vm199_vm7, %v3563_v52  ;;  %v3781_v59 = vld [vmem:[#allocation2 + $0x8] sm:$0xff]  ;;  %v3601_v60 = vld [vmem:[#allocation2 + $0x50] sm:$0xff]  ;;  %v3741_v25 = vpop.f32.mrf.mxu1 }
 0x194   : > { %v4205_v62 = vpack.c.bf16 %v3832_v42, %v3832_v42  ;;  %v3830_v63 = vmax.f32 %v3818_v56, 0.0  ;;  %v3821_v1 = vadd.f32 %v5335_v33, %v3802_v57  ;;  %v3800_v3 = vmul.f32 %v5330_v27, %v3781_v59  ;;  %3773 = vst.msk [vmem:[#allocation2 + $0x28] sm:$0xff] %vm199_vm7, %v3761_v58 }
 0x195   : > { %v3786_v5 = vld [vmem:[#allocation2 + $0x30] sm:$0xff]  ;;  %v3766_v6 = vadd.f32 %v4549_v61, %v3601_v60  ;;  %v3599_v2 = vld [vmem:[#allocation2 + $0x40] sm:$0xff]  ;;  %v4550_v14 = vpop.f32.mrf.mxu1 }
 0x196   : > { %3893 = vst.msk [vmem:[%s5354_s9 + $0x8] sm:$0xf] %vm3890_vm9, %v4205_v62  ;;  %v4203_v7 = vpack.c.bf16 %v3830_v63, %v3830_v63  ;;  %v3833_v8 = vmax.f32 %v3821_v1, 0.0  ;;  %v3819_v9 = vadd.f32 %v5335_v33, %v3800_v3  ;;  %v3805_v10 = vmul.f32 %v5330_v27, %v3786_v5 }
 0x197   : > { %v3784_v11 = vld [vmem:[#allocation2 + $0x20] sm:$0xff]  ;;  %3778 = vst.msk [vmem:[#allocation2 + $0x50] sm:$0xff] %vm199_vm7, %v3766_v6  ;;  %v3764_v12 = vadd.f32 %v3741_v25, %v3599_v2  ;;  %v3602_v13 = vld [vmem:[#allocation2 + $0x58] sm:$0xff]  ;;  %v3744_v24 = vpop.f32.mrf.mxu1 }
 0x198   : > { %3891 = vst.msk [vmem:[%s5354_s9] sm:$0xf] %vm3890_vm9, %v4203_v7  ;;  %v4206_v54 = vpack.c.bf16 %v3833_v8, %v3833_v8  ;;  %v3831_v0 = vmax.f32 %v3819_v9, 0.0  ;;  %v3824_v15 = vadd.f32 %v5335_v33, %v3805_v10  ;;  %v3803_v16 = vmul.f32 %v5330_v27, %v3784_v11 }
 0x199   : > { %v3787_v17 = vld [vmem:[#allocation2 + $0x38] sm:$0xff]  ;;  %3776 = vst.msk [vmem:[#allocation2 + $0x40] sm:$0xff] %vm199_vm7, %v3764_v12  ;;  %v3767_v18 = vadd.f32 %v4550_v14, %v3602_v13 }
 0x19a   : > { %v3600_v19 = vld [vmem:[#allocation2 + $0x48] sm:$0xff]  ;;  %3894 = vst.msk [vmem:[%s5354_s9 + $0xc] sm:$0xf] %vm3890_vm9, %v4206_v54  ;;  %v4204_v20 = vpack.c.bf16 %v3831_v0, %v3831_v0  ;;  %v3836_v21 = vmax.f32 %v3824_v15, 0.0  ;;  %v3822_v22 = vadd.f32 %v5335_v33, %v3803_v16  ;;  %v3806_v23 = vmul.f32 %v5330_v27, %v3787_v17 }
 0x19b   : > { %v3785_v26 = vld [vmem:[#allocation2 + $0x28] sm:$0xff]  ;;  %3779 = vst.msk [vmem:[#allocation2 + $0x58] sm:$0xff] %vm199_vm7, %v3767_v18  ;;  %v3765_v29 = vadd.f32 %v3744_v24, %v3600_v19 }
 0x19c   : > { %3892 = vst.msk [vmem:[%s5354_s9 + $0x4] sm:$0xf] %vm3890_vm9, %v4204_v20  ;;  %v4209_v30 = vpack.c.bf16 %v3836_v21, %v3836_v21  ;;  %v3834_v31 = vmax.f32 %v3822_v22, 0.0  ;;  %v3825_v32 = vadd.f32 %v5335_v33, %v3806_v23  ;;  %v3804_v4 = vmul.f32 %v5330_v27, %v3785_v26 }
 0x19d   : > { %3777 = vst.msk [vmem:[#allocation2 + $0x48] sm:$0xff] %vm199_vm7, %v3765_v29 }
 0x19e   : > { %3897 = vst.msk [vmem:[%s5354_s9 + $0x18] sm:$0xf] %vm3890_vm9, %v4209_v30  ;;  %v4207_v34 = vpack.c.bf16 %v3834_v31, %v3834_v31  ;;  %v3837_v35 = vmax.f32 %v3825_v32, 0.0  ;;  %v3823_v36 = vadd.f32 %v5335_v33, %v3804_v4  ;;  %v3790_v37 = vld [vmem:[#allocation2 + $0x50] sm:$0xff] }
 0x19f   : > { %v3809_v39 = vmul.f32 %v5330_v27, %v3790_v37 }
 0x1a0   : > { %3895 = vst.msk [vmem:[%s5354_s9 + $0x10] sm:$0xf] %vm3890_vm9, %v4207_v34  ;;  %v4210_v40 = vpack.c.bf16 %v3837_v35, %v3837_v35  ;;  %v3835_v41 = vmax.f32 %v3823_v36, 0.0  ;;  %v3788_v43 = vld [vmem:[#allocation2 + $0x40] sm:$0xff] }
 0x1a1   : > { %v3828_v44 = vadd.f32 %v5335_v33, %v3809_v39  ;;  %v3807_v28 = vmul.f32 %v5330_v27, %v3788_v43 }
 0x1a2   : > { %3898 = vst.msk [vmem:[%s5354_s9 + $0x1c] sm:$0xf] %vm3890_vm9, %v4210_v40  ;;  %v4208_v38 = vpack.c.bf16 %v3835_v41, %v3835_v41  ;;  %v3791_v45 = vld [vmem:[#allocation2 + $0x58] sm:$0xff] }
 0x1a3   : > { %v3840_v47 = vmax.f32 %v3828_v44, 0.0  ;;  %v3826_v48 = vadd.f32 %v5335_v33, %v3807_v28  ;;  %v3810_v49 = vmul.f32 %v5330_v27, %v3791_v45 }
 0x1a4   : > { %3896 = vst.msk [vmem:[%s5354_s9 + $0x14] sm:$0xf] %vm3890_vm9, %v4208_v38  ;;  %v3789_v50 = vld [vmem:[#allocation2 + $0x48] sm:$0xff] }
 0x1a5   : > { %v4213_v51 = vpack.c.bf16 %v3840_v47, %v3840_v47  ;;  %v3838_v52 = vmax.f32 %v3826_v48, 0.0  ;;  %v3829_v53 = vadd.f32 %v5335_v33, %v3810_v49  ;;  %v3808_v46 = vmul.f32 %v5330_v27, %v3789_v50 }
 0x1a7   : > { %3901 = vst.msk [vmem:[%s5354_s9 + $0x28] sm:$0xf] %vm3890_vm9, %v4213_v51  ;;  %v4211_v55 = vpack.c.bf16 %v3838_v52, %v3838_v52  ;;  %v3841_v42 = vmax.f32 %v3829_v53, 0.0  ;;  %v3827_v56 = vadd.f32 %v5335_v33, %v3808_v46 }
 0x1a9   : > { %3899 = vst.msk [vmem:[%s5354_s9 + $0x20] sm:$0xf] %vm3890_vm9, %v4211_v55  ;;  %v4214_v57 = vpack.c.bf16 %v3841_v42, %v3841_v42  ;;  %v3839_v58 = vmax.f32 %v3827_v56, 0.0 }
 0x1ab   : > { %3902 = vst.msk [vmem:[%s5354_s9 + $0x2c] sm:$0xf] %vm3890_vm9, %v4214_v57  ;;  %v4212_v59 = vpack.c.bf16 %v3839_v58, %v3839_v58 }
 0x1ad   : > { %3900 = vst.msk [vmem:[%s5354_s9 + $0x24] sm:$0xf] %vm3890_vm9, %v4212_v59 }
 0x1ae PF: > { %s14_s15 = sadd.s32 1, %s4694_s15  }
 0x1af   : > { %p11_p4 = scmp.ge.s32.totalorder %s14_s15, 4  }
 0x1b1   :  { %13 = sbr.rel (!%p11_p4) target bundleno = 1 (0x1), region = 66 }

</bundles_post_ra>
